<compile_context>
chip_gen: v5e
topology: v5e:2x2
jax: 0.10.0
libtpu: 0.0.40
codegen_flags: <defaults>
</compile_context>

<pallas_src>
import functools
import math

import jax
import jax.numpy as jnp
from jax.experimental import pallas as pl
from jax.experimental.pallas import tpu as pltpu

_HIGH = jax.lax.Precision.HIGHEST
_NEG_BIG = -1e9       # additive mask bias (matches reference's -1e9 masking)
_M_INIT = -1e30       # online-softmax running-max init (finite -> no inf-inf NaN)


# --------------------------------- fused kernel ---------------------------------
def _esegat_kernel(origin_ref, neigh_ref, adj_ref, efp_ref,
                   w_all_ref, a_dst_ref, a_src_t_ref, c_ref, v_ref,
                   ln_g_ref, ln_b_ref, w1_ref, b1_ref, w2_ref, b2_ref,
                   out_ref,
                   m_sc, l_sc, acc_sc,
                   *, num_heads, head_dim, feat_dim, compute_dtype):
    H, Dh, F = num_heads, head_dim, feat_dim
    j = pl.program_id(1)
    nj = pl.num_programs(1)

    @pl.when(j == 0)
    def _init():
        m_sc[...] = jnp.full_like(m_sc, _M_INIT)
        l_sc[...] = jnp.zeros_like(l_sc)
        acc_sc[...] = jnp.zeros_like(acc_sc)

    origin = origin_ref[...]                                   # [TM, Din]
    neigh = neigh_ref[...]                                     # [TN, Din]
    # one additive mask per tile, shared by all heads (0 on edges, -1e9 elsewhere/padding)
    mask_bias = jnp.where(adj_ref[...] > 0.0, 0.0, _NEG_BIG)   # [TM, TN]

    oc = origin.astype(compute_dtype)
    nc = neigh.astype(compute_dtype)

    # ---- folded multi-head score terms & messages: one MXU pass each, all heads ----
    s_dst = jnp.dot(oc, a_dst_ref[...].astype(compute_dtype),
                    preferred_element_type=jnp.float32, precision=_HIGH) + c_ref[...]  # [TM, H]
    s_src = jax.lax.dot_general(a_src_t_ref[...].astype(compute_dtype), nc,
                                dimension_numbers=(((1,), (1,)), ((), ())),
                                preferred_element_type=jnp.float32, precision=_HIGH)   # [H, TN]
    z_src = jnp.dot(nc, w_all_ref[...].astype(compute_dtype),
                    preferred_element_type=jnp.float32, precision=_HIGH)               # [TN, H*Dh]

    # ---- edge-feature logits: direct F-contraction (no O(Nn^2) block matrix) ----
    # sc[h][o, n] = s_dst[o, h] + s_src[h, n] + sum_f efeat[o, n, f] * v[f, h]
    sc = [s_dst[:, h:h + 1] + s_src[h:h + 1, :] for h in range(H)]       # H x [TM, TN]
    for f in range(F):                                                   # small static loops
        plane = efp_ref[f]                                               # [TM, TN] lane-dense
        for h in range(H):
            sc[h] = sc[h] + plane * v_ref[f, h]                          # scalar from SMEM

    # ---- online softmax over the neighbor (reduction) grid axis, per head ----
    for h in range(H):
        logits = jnp.maximum(sc[h], 0.01 * sc[h]) + mask_bias            # leaky-relu + mask
        m_prev = m_sc[:, h:h + 1]
        m_new = jnp.maximum(m_prev, jnp.max(logits, axis=1, keepdims=True))
        corr = jnp.exp(m_prev - m_new)
        p = jnp.exp(logits - m_new)                                      # masked cols -> 0.0
        l_sc[:, h:h + 1] = corr * l_sc[:, h:h + 1] + jnp.sum(p, axis=1, keepdims=True)
        acc_sc[:, h * Dh:(h + 1) * Dh] = (
            corr * acc_sc[:, h * Dh:(h + 1) * Dh]
            + jnp.dot(p.astype(compute_dtype),
                      z_src[:, h * Dh:(h + 1) * Dh].astype(compute_dtype),
                      preferred_element_type=jnp.float32, precision=_HIGH))
        m_sc[:, h:h + 1] = m_new

    # ---- epilogue at the last neighbor step: normalize + ELU + residual + LN + FFN ----
    @pl.when(j == nj - 1)
    def _epilogue():
        for h in range(H):
            denom = jnp.maximum(l_sc[:, h:h + 1], 1e-30)                 # exact normalization
            acc_sc[:, h * Dh:(h + 1) * Dh] = acc_sc[:, h * Dh:(h + 1) * Dh] / denom
        gat = acc_sc[...]                                                # [TM, H*Dh]
        hres = jnp.where(gat > 0.0, gat, jnp.exp(jnp.minimum(gat, 0.0)) - 1.0) + origin
        mu = jnp.mean(hres, axis=-1, keepdims=True)                      # LayerNorm eps=1e-6
        var = jnp.mean((hres - mu) ** 2, axis=-1, keepdims=True)
        xn = (hres - mu) * jax.lax.rsqrt(var + 1e-6) * ln_g_ref[...] + ln_b_ref[...]
        inter = jnp.dot(xn.astype(compute_dtype), w1_ref[...].astype(compute_dtype),
                        preferred_element_type=jnp.float32, precision=_HIGH) + b1_ref[...]
        cg = math.sqrt(2.0 / math.pi)                                    # HSG tanh-gelu
        inter = 0.5 * inter * (1.0 + jnp.tanh(cg * (inter + 0.044715 * inter ** 3)))
        out_ref[...] = (jnp.dot(inter.astype(compute_dtype), w2_ref[...].astype(compute_dtype),
                                preferred_element_type=jnp.float32, precision=_HIGH)
                        + b2_ref[...] + hres)


# ---------------------------- one-time parameter folding ----------------------------
def fold_params(params):
    """Fold per-head GAT weights into fused lane-dense operands (graph-size independent)."""
    W, Wf, bf, A = params["W"], params["Wf"], params["bf"], params["A"]
    H, Din, Dh = W.shape
    a = A[:, :, 0]                                                   # [H, 3*Dh]
    a_src, a_dst, a_ft = a[:, :Dh], a[:, Dh:2 * Dh], a[:, 2 * Dh:]
    w_all = jnp.transpose(W, (1, 0, 2)).reshape(Din, H * Dh)         # head h -> cols h*Dh:(h+1)*Dh
    a_dst_f = jnp.einsum("hid,hd->ih", W, a_dst, precision=_HIGH)    # [Din, H]
    a_src_t = jnp.einsum("hid,hd->hi", W, a_src, precision=_HIGH)    # [H, Din]
    v = jnp.einsum("hfd,hd->fh", Wf, a_ft, precision=_HIGH)          # [F, H]   (SMEM scalars)
    c = jnp.einsum("hod,hd->oh", bf, a_ft, precision=_HIGH)          # [1, H]
    return dict(w_all=w_all, a_dst=a_dst_f, a_src_t=a_src_t, c=c, v=v,
                ln_g=params["ln_g"], ln_b=params["ln_b"],
                w1=params["w1"], b1=params["b1"], w2=params["w2"], b2=params["b2"])


def _round_up(x, m):
    return ((x + m - 1) // m) * m


# --------------------------------------- forward ---------------------------------------
def ese_gat_forward(fused, e, s, efeat, adj, layer_type="E2S", *,
                    block_m=256, block_n=512, compute_dtype=jnp.float32):
    if layer_type == "E2S":
        origin, neighbor = s, e
    elif layer_type == "S2E":
        origin, neighbor = e, s
    else:
        raise NotImplementedError("GAT Layer has not been implemented!")

    No, Din = origin.shape
    Nn = neighbor.shape[0]
    F_ = efeat.shape[-1]
    H = fused["c"].shape[1]
    out_dim = fused["w_all"].shape[1]
    Dh = out_dim // H
    ffn_h = fused["w1"].shape[1]
    assert Din == out_dim, "residual connection requires in_dim == out_dim"
    assert efeat.shape[:2] == (No, Nn) and adj.shape == (No, Nn)

    # tile sizes: row tiles multiple of 8, neighbor tiles multiple of 128 (lane-dense)
    tm = min(block_m, _round_up(No, 8))
    tn = min(block_n, _round_up(Nn, 128))
    No_p = _round_up(No, tm)
    Nn_p = _round_up(Nn, tn)

    origin_p = jnp.pad(origin, ((0, No_p - No), (0, 0)))
    neigh_p = jnp.pad(neighbor, ((0, Nn_p - Nn), (0, 0)))
    adj_p = jnp.pad(adj, ((0, No_p - No), (0, Nn_p - Nn)))      # padding => masked out
    # layout plumbing only: [No,Nn,F] -> [F,No,Nn] so every feature plane is a lane-dense tile
    efp = jnp.pad(jnp.transpose(efeat, (2, 0, 1)),
                  ((0, 0), (0, No_p - No), (0, Nn_p - Nn)))

    grid = (No_p // tm, Nn_p // tn)
    const = lambda i, j: (0, 0)

    kernel = functools.partial(_esegat_kernel, num_heads=H, head_dim=Dh,
                               feat_dim=F_, compute_dtype=compute_dtype)
    out_p = pl.pallas_call(
        kernel,
        out_shape=jax.ShapeDtypeStruct((No_p, out_dim), jnp.float32),
        grid=grid,
        in_specs=[
            pl.BlockSpec((tm, Din), lambda i, j: (i, 0)),           # origin rows
            pl.BlockSpec((tn, Din), lambda i, j: (j, 0)),           # neighbor rows
            pl.BlockSpec((tm, tn), lambda i, j: (i, j)),            # adjacency tile
            pl.BlockSpec((F_, tm, tn), lambda i, j: (0, i, j)),     # efeat planes
            pl.BlockSpec((Din, out_dim), const),                    # w_all   (VMEM-resident)
            pl.BlockSpec((Din, H), const),                          # a_dst
            pl.BlockSpec((H, Din), const),                          # a_src_t
            pl.BlockSpec((1, H), const),                            # c
            pl.BlockSpec(memory_space=pltpu.MemorySpace.SMEM),      # v [F, H] scalar table
            pl.BlockSpec((1, out_dim), const),                      # ln_g
            pl.BlockSpec((1, out_dim), const),                      # ln_b
            pl.BlockSpec((out_dim, ffn_h), const),                  # w1
            pl.BlockSpec((1, ffn_h), const),                        # b1
            pl.BlockSpec((ffn_h, out_dim), const),                  # w2
            pl.BlockSpec((1, out_dim), const),                      # b2
        ],
        out_specs=pl.BlockSpec((tm, out_dim), lambda i, j: (i, 0)),
        scratch_shapes=[pltpu.VMEM((tm, H), jnp.float32),           # running max
                        pltpu.VMEM((tm, H), jnp.float32),           # running denominator
                        pltpu.VMEM((tm, out_dim), jnp.float32)],    # running numerator
        compiler_params=pltpu.CompilerParams(
            dimension_semantics=("parallel", "arbitrary"),
            vmem_limit_bytes=48 * 1024 * 1024),
    )(origin_p, neigh_p, adj_p, efp,
      fused["w_all"], fused["a_dst"], fused["a_src_t"], fused["c"], fused["v"],
      fused["ln_g"], fused["ln_b"], fused["w1"], fused["b1"], fused["w2"], fused["b2"])
    return out_p[:No]


# ------------------------------ reference (plain JAX, f32) ------------------------------
def reference_forward(params, e, s, efeat, adj, layer_type="E2S"):
    P = _HIGH
    origin, neighbor = (s, e) if layer_type == "E2S" else (e, s)
    W, Wf, bf, A = params["W"], params["Wf"], params["bf"], params["A"]
    H, Din, Dh = W.shape
    heads = []
    for h in range(H):
        z_src = jnp.dot(neighbor, W[h], precision=P)
        z_dst = jnp.dot(origin, W[h], precision=P)
        dfeat = jnp.einsum("onf,fd->ond", efeat, Wf[h], precision=P) + bf[h]
        a = A[h][:, 0]
        sc = (jnp.dot(z_dst, a[Dh:2 * Dh], precision=P)[:, None]
              + jnp.dot(z_src, a[:Dh], precision=P)[None, :]
              + jnp.einsum("ond,d->on", dfeat, a[2 * Dh:], precision=P))
        sc = jnp.where(sc >= 0.0, sc, 0.01 * sc)
        sc = jnp.where(adj > 0.0, sc, -1e9)
        alpha = jax.nn.softmax(sc, axis=1)
        heads.append(jnp.dot(alpha, z_src, precision=P))
    gat = jnp.concatenate(heads, axis=-1)
    hres = jax.nn.elu(gat) + origin
    mu = jnp.mean(hres, -1, keepdims=True)
    var = jnp.mean((hres - mu) ** 2, -1, keepdims=True)
    xn = (hres - mu) / jnp.sqrt(var + 1e-6) * params["ln_g"] + params["ln_b"]
    inter = jnp.dot(xn, params["w1"], precision=P) + params["b1"]
    cg = math.sqrt(2.0 / math.pi)
    inter = 0.5 * inter * (1.0 + jnp.tanh(cg * (inter + 0.044715 * inter ** 3)))
    return jnp.dot(inter, params["w2"], precision=P) + params["b2"] + hres


def init_params(key, in_dim, out_dim, num_heads, feat_embed_size, ffn_hidden):
    Dh = out_dim // num_heads
    ks = jax.random.split(key, 6)
    nrm = lambda k, shape, fan: jax.random.normal(k, shape, jnp.float32) / math.sqrt(fan)
    return {
        "W":    nrm(ks[0], (num_heads, in_dim, Dh), in_dim),
        "Wf":   nrm(ks[1], (num_heads, feat_embed_size, Dh), feat_embed_size),
        "bf":   jnp.zeros((num_heads, 1, Dh), jnp.float32),
        "A":    nrm(ks[2], (num_heads, 3 * Dh, 1), 3 * Dh),
        "ln_g": jnp.ones((1, out_dim), jnp.float32),
        "ln_b": jnp.zeros((1, out_dim), jnp.float32),
        "w1":   nrm(ks[3], (out_dim, ffn_hidden), out_dim),
        "b1":   jnp.zeros((1, ffn_hidden), jnp.float32),
        "w2":   nrm(ks[4], (ffn_hidden, out_dim), ffn_hidden),
        "b2":   jnp.zeros((1, out_dim), jnp.float32),
    }


if __name__ == "__main__":
    in_dim = out_dim = 32
    num_heads = 4
    feat_embed_size = 8
    ffn_inner_hidden_size = 64

    key = jax.random.PRNGKey(0)
    k_p, k_e, k_s, k_f, k_a = jax.random.split(key, 5)
    params = init_params(k_p, in_dim, out_dim, num_heads, feat_embed_size,
                         ffn_inner_hidden_size)
    fused = fold_params(params)        # graph-size independent; reusable for E2S and S2E

    # ---- test 1: module-scale bipartite E2S graph, fully connected (single grid step) ----
    num_s, num_e = 8, 16
    e = jax.random.normal(k_e, (num_e, in_dim), jnp.float32)
    s = jax.random.normal(k_s, (num_s, in_dim), jnp.float32)
    efeat = jax.random.uniform(k_f, (num_s, num_e, feat_embed_size), jnp.float32)
    adj = jnp.ones((num_s, num_e), jnp.float32)

    fwd = jax.jit(functools.partial(ese_gat_forward, layer_type="E2S"))
    out = jax.block_until_ready(fwd(fused, e, s, efeat, adj))
    ref = reference_forward(params, e, s, efeat, adj, layer_type="E2S")
    assert out.shape == (num_s, out_dim)
    assert bool(jnp.all(jnp.isfinite(out)))
    err = float(jnp.max(jnp.abs(out - ref)))
    assert jnp.allclose(out, ref, rtol=2e-3, atol=2e-3), f"mismatch, max abs err {err}"

    # ---- test 2: multi-tile path (2x2 grid): padding, masking, online softmax across tiles ----
    num_s2, num_e2 = 20, 200
    k_e2, k_s2, k_f2, k_a2 = jax.random.split(k_a, 4)
    e2 = jax.random.normal(k_e2, (num_e2, in_dim), jnp.float32)
    s2 = jax.random.normal(k_s2, (num_s2, in_dim), jnp.float32)
    ef2 = jax.random.uniform(k_f2, (num_s2, num_e2, feat_embed_size), jnp.float32)
    adj2 = (jax.random.uniform(k_a2, (num_s2, num_e2)) < 0.3).astype(jnp.float32)
    adj2 = adj2.at[:, 0].set(1.0)      # every origin node has >= 1 neighbor
    fwd2 = jax.jit(functools.partial(ese_gat_forward, layer_type="E2S",
                                     block_m=16, block_n=128))
    out2 = jax.block_until_ready(fwd2(fused, e2, s2, ef2, adj2))
    ref2 = reference_forward(params, e2, s2, ef2, adj2, layer_type="E2S")
    err2 = float(jnp.max(jnp.abs(out2 - ref2)))
    assert jnp.allclose(out2, ref2, rtol=2e-3, atol=2e-3), f"tiled mismatch, max abs err {err2}"

    print("KERNEL_OK")
</pallas_src>

<mosaic_0001>
module attributes {stable_mosaic.version = 11 : i64} {
  func.func @_esegat_kernel(%arg0: i32, %arg1: i32, %arg2: memref<8x32xf32, #tpu.memory_space<vmem>>, %arg3: memref<128x32xf32, #tpu.memory_space<vmem>>, %arg4: memref<8x128xf32, #tpu.memory_space<vmem>>, %arg5: memref<8x8x128xf32, #tpu.memory_space<vmem>>, %arg6: memref<32x32xf32, #tpu.memory_space<vmem>>, %arg7: memref<32x4xf32, #tpu.memory_space<vmem>>, %arg8: memref<4x32xf32, #tpu.memory_space<vmem>>, %arg9: memref<1x4xf32, #tpu.memory_space<vmem>>, %arg10: memref<8x4xf32, #tpu.memory_space<smem>>, %arg11: memref<1x32xf32, #tpu.memory_space<vmem>>, %arg12: memref<1x32xf32, #tpu.memory_space<vmem>>, %arg13: memref<32x64xf32, #tpu.memory_space<vmem>>, %arg14: memref<1x64xf32, #tpu.memory_space<vmem>>, %arg15: memref<64x32xf32, #tpu.memory_space<vmem>>, %arg16: memref<1x32xf32, #tpu.memory_space<vmem>>, %arg17: memref<8x32xf32, #tpu.memory_space<vmem>>, %arg18: memref<8x4xf32, #tpu.memory_space<vmem>>, %arg19: memref<8x4xf32, #tpu.memory_space<vmem>>, %arg20: memref<8x32xf32, #tpu.memory_space<vmem>>) attributes {dimension_semantics = [#tpu.dimension_semantics<parallel>, #tpu.dimension_semantics<arbitrary>], iteration_bounds = array<i64: 1, 1>, scalar_prefetch = 0 : i64, scratch_operands = 3 : i64, tpu.core_type = #tpu.core_type<tc>, window_params = [{transform_indices = @transform_0, window_bounds = array<i64: 8, 32>}, {transform_indices = @transform_1, window_bounds = array<i64: 128, 32>}, {transform_indices = @transform_2, window_bounds = array<i64: 8, 128>}, {transform_indices = @transform_3, window_bounds = array<i64: 8, 8, 128>}, {pipeline_mode = #tpu.pipeline_mode<synchronous>, transform_indices = @transform_4, window_bounds = array<i64: 32, 32>}, {pipeline_mode = #tpu.pipeline_mode<synchronous>, transform_indices = @transform_5, window_bounds = array<i64: 32, 4>}, {pipeline_mode = #tpu.pipeline_mode<synchronous>, transform_indices = @transform_6, window_bounds = array<i64: 4, 32>}, {pipeline_mode = #tpu.pipeline_mode<synchronous>, transform_indices = @transform_7, window_bounds = array<i64: 1, 4>}, {transform_indices = @transform_8, window_bounds = array<i64: 8, 4>}, {pipeline_mode = #tpu.pipeline_mode<synchronous>, transform_indices = @transform_9, window_bounds = array<i64: 1, 32>}, {pipeline_mode = #tpu.pipeline_mode<synchronous>, transform_indices = @transform_10, window_bounds = array<i64: 1, 32>}, {pipeline_mode = #tpu.pipeline_mode<synchronous>, transform_indices = @transform_11, window_bounds = array<i64: 32, 64>}, {pipeline_mode = #tpu.pipeline_mode<synchronous>, transform_indices = @transform_12, window_bounds = array<i64: 1, 64>}, {pipeline_mode = #tpu.pipeline_mode<synchronous>, transform_indices = @transform_13, window_bounds = array<i64: 64, 32>}, {pipeline_mode = #tpu.pipeline_mode<synchronous>, transform_indices = @transform_14, window_bounds = array<i64: 1, 32>}, {transform_indices = @transform_15, window_bounds = array<i64: 8, 32>}]} {
    %c0_i32 = arith.constant 0 : i32
    %0 = arith.cmpi eq, %arg1, %c0_i32 : i32
    %1 = arith.extui %0 : i1 to i32
    %c0_i32_0 = arith.constant 0 : i32
    %2 = arith.cmpi ne, %1, %c0_i32_0 : i32
    scf.if %2 {
      %cst_163 = arith.constant -1.000000e+30 : f32
      %295 = vector.broadcast %cst_163 : f32 to vector<8x4xf32>
      %c0_164 = arith.constant 0 : index
      %c0_165 = arith.constant 0 : index
      %296 = vector.load %arg18[%c0_164, %c0_165] : memref<8x4xf32, #tpu.memory_space<vmem>>, vector<8x4xf32>
      tpu.vector_store %arg18[%c0_164, %c0_165], %295 {strides = array<i32>} : memref<8x4xf32, #tpu.memory_space<vmem>>, vector<8x4xf32>,
      %cst_166 = arith.constant 0.000000e+00 : f32
      %297 = vector.broadcast %cst_166 : f32 to vector<8x4xf32>
      %c0_167 = arith.constant 0 : index
      %c0_168 = arith.constant 0 : index
      %298 = vector.load %arg19[%c0_167, %c0_168] : memref<8x4xf32, #tpu.memory_space<vmem>>, vector<8x4xf32>
      tpu.vector_store %arg19[%c0_167, %c0_168], %297 {strides = array<i32>} : memref<8x4xf32, #tpu.memory_space<vmem>>, vector<8x4xf32>,
      %cst_169 = arith.constant 0.000000e+00 : f32
      %299 = vector.broadcast %cst_169 : f32 to vector<8x32xf32>
      %c0_170 = arith.constant 0 : index
      %c0_171 = arith.constant 0 : index
      %300 = vector.load %arg20[%c0_170, %c0_171] : memref<8x32xf32, #tpu.memory_space<vmem>>, vector<8x32xf32>
      tpu.vector_store %arg20[%c0_170, %c0_171], %299 {strides = array<i32>} : memref<8x32xf32, #tpu.memory_space<vmem>>, vector<8x32xf32>,
    } else {
    }
    %c0 = arith.constant 0 : index
    %c0_1 = arith.constant 0 : index
    %3 = vector.load %arg2[%c0, %c0_1] : memref<8x32xf32, #tpu.memory_space<vmem>>, vector<8x32xf32>
    %c0_2 = arith.constant 0 : index
    %c0_3 = arith.constant 0 : index
    %4 = vector.load %arg3[%c0_2, %c0_3] : memref<128x32xf32, #tpu.memory_space<vmem>>, vector<128x32xf32>
    %c0_4 = arith.constant 0 : index
    %c0_5 = arith.constant 0 : index
    %5 = vector.load %arg4[%c0_4, %c0_5] : memref<8x128xf32, #tpu.memory_space<vmem>>, vector<8x128xf32>
    %cst = arith.constant 0.000000e+00 : f32
    %6 = vector.broadcast %cst : f32 to vector<8x128xf32>
    %7 = arith.cmpf ogt, %5, %6 : vector<8x128xf32>
    %cst_6 = arith.constant 0.000000e+00 : f32
    %cst_7 = arith.constant -1.000000e+09 : f32
    %8 = vector.broadcast %cst_6 : f32 to vector<8x128xf32>
    %9 = vector.broadcast %cst_7 : f32 to vector<8x128xf32>
    %10 = arith.select %7, %8, %9 : vector<8x128xi1>, vector<8x128xf32>
    %c0_8 = arith.constant 0 : index
    %c0_9 = arith.constant 0 : index
    %11 = vector.load %arg7[%c0_8, %c0_9] : memref<32x4xf32, #tpu.memory_space<vmem>>, vector<32x4xf32>
    %cst_10 = arith.constant dense<0.000000e+00> : vector<8x4xf32>
    %12 = tpu.matmul %3, %11, %cst_10 {dimension_numbers = #tpu.dot_dimension_numbers<[1], [0], [0], [1], [0, 0, 1, 1], [], []>, precision = #tpu.contract_precision<fp32>} : vector<8x32xf32>, vector<32x4xf32>, vector<8x4xf32> -> vector<8x4xf32>
    %c0_11 = arith.constant 0 : index
    %c0_12 = arith.constant 0 : index
    %13 = vector.load %arg9[%c0_11, %c0_12] : memref<1x4xf32, #tpu.memory_space<vmem>>, vector<1x4xf32>
    %14 = vector.broadcast %13 : vector<1x4xf32> to vector<8x4xf32>
    %15 = arith.addf %12, %14 : vector<8x4xf32>
    %c0_13 = arith.constant 0 : index
    %c0_14 = arith.constant 0 : index
    %16 = vector.load %arg8[%c0_13, %c0_14] : memref<4x32xf32, #tpu.memory_space<vmem>>, vector<4x32xf32>
    %cst_15 = arith.constant dense<0.000000e+00> : vector<4x128xf32>
    %17 = tpu.matmul %16, %4, %cst_15 {dimension_numbers = #tpu.dot_dimension_numbers<[1], [1], [0], [0], [0, 0, 1, 0], [], []>, precision = #tpu.contract_precision<fp32>} : vector<4x32xf32>, vector<128x32xf32>, vector<4x128xf32> -> vector<4x128xf32>
    %c0_16 = arith.constant 0 : index
    %c0_17 = arith.constant 0 : index
    %18 = vector.load %arg6[%c0_16, %c0_17] : memref<32x32xf32, #tpu.memory_space<vmem>>, vector<32x32xf32>
    %cst_18 = arith.constant dense<0.000000e+00> : vector<128x32xf32>
    %19 = tpu.matmul %4, %18, %cst_18 {dimension_numbers = #tpu.dot_dimension_numbers<[1], [0], [0], [1], [0, 0, 1, 1], [], []>, precision = #tpu.contract_precision<fp32>} : vector<128x32xf32>, vector<32x32xf32>, vector<128x32xf32> -> vector<128x32xf32>
    %20 = vector.extract_strided_slice %15 {offsets = [0, 0], sizes = [8, 1], strides = [1, 1]} : vector<8x4xf32> to vector<8x1xf32>
    %21 = vector.extract_strided_slice %17 {offsets = [0, 0], sizes = [1, 128], strides = [1, 1]} : vector<4x128xf32> to vector<1x128xf32>
    %22 = vector.broadcast %20 : vector<8x1xf32> to vector<8x128xf32>
    %23 = vector.broadcast %21 : vector<1x128xf32> to vector<8x128xf32>
    %24 = arith.addf %22, %23 : vector<8x128xf32>
    %25 = vector.extract_strided_slice %15 {offsets = [0, 1], sizes = [8, 1], strides = [1, 1]} : vector<8x4xf32> to vector<8x1xf32>
    %26 = vector.extract_strided_slice %17 {offsets = [1, 0], sizes = [1, 128], strides = [1, 1]} : vector<4x128xf32> to vector<1x128xf32>
    %27 = vector.broadcast %25 : vector<8x1xf32> to vector<8x128xf32>
    %28 = vector.broadcast %26 : vector<1x128xf32> to vector<8x128xf32>
    %29 = arith.addf %27, %28 : vector<8x128xf32>
    %30 = vector.extract_strided_slice %15 {offsets = [0, 2], sizes = [8, 1], strides = [1, 1]} : vector<8x4xf32> to vector<8x1xf32>
    %31 = vector.extract_strided_slice %17 {offsets = [2, 0], sizes = [1, 128], strides = [1, 1]} : vector<4x128xf32> to vector<1x128xf32>
    %32 = vector.broadcast %30 : vector<8x1xf32> to vector<8x128xf32>
    %33 = vector.broadcast %31 : vector<1x128xf32> to vector<8x128xf32>
    %34 = arith.addf %32, %33 : vector<8x128xf32>
    %35 = vector.extract_strided_slice %15 {offsets = [0, 3], sizes = [8, 1], strides = [1, 1]} : vector<8x4xf32> to vector<8x1xf32>
    %36 = vector.extract_strided_slice %17 {offsets = [3, 0], sizes = [1, 128], strides = [1, 1]} : vector<4x128xf32> to vector<1x128xf32>
    %37 = vector.broadcast %35 : vector<8x1xf32> to vector<8x128xf32>
    %38 = vector.broadcast %36 : vector<1x128xf32> to vector<8x128xf32>
    %39 = arith.addf %37, %38 : vector<8x128xf32>
    %c0_19 = arith.constant 0 : index
    %c0_20 = arith.constant 0 : index
    %c0_21 = arith.constant 0 : index
    %40 = vector.load %arg5[%c0_19, %c0_20, %c0_21] : memref<8x8x128xf32, #tpu.memory_space<vmem>>, vector<1x8x128xf32>
    %41 = vector.shape_cast %40 : vector<1x8x128xf32> to vector<8x128xf32>
    %c0_22 = arith.constant 0 : index
    %c0_23 = arith.constant 0 : index
    %42 = memref.load %arg10[%c0_22, %c0_23] : memref<8x4xf32, #tpu.memory_space<smem>>
    %43 = vector.broadcast %42 : f32 to vector<8x128xf32>
    %44 = arith.mulf %41, %43 : vector<8x128xf32>
    %45 = arith.addf %24, %44 : vector<8x128xf32>
    %c0_24 = arith.constant 0 : index
    %c1 = arith.constant 1 : index
    %46 = memref.load %arg10[%c0_24, %c1] : memref<8x4xf32, #tpu.memory_space<smem>>
    %47 = vector.broadcast %46 : f32 to vector<8x128xf32>
    %48 = arith.mulf %41, %47 : vector<8x128xf32>
    %49 = arith.addf %29, %48 : vector<8x128xf32>
    %c0_25 = arith.constant 0 : index
    %c2 = arith.constant 2 : index
    %50 = memref.load %arg10[%c0_25, %c2] : memref<8x4xf32, #tpu.memory_space<smem>>
    %51 = vector.broadcast %50 : f32 to vector<8x128xf32>
    %52 = arith.mulf %41, %51 : vector<8x128xf32>
    %53 = arith.addf %34, %52 : vector<8x128xf32>
    %c0_26 = arith.constant 0 : index
    %c3 = arith.constant 3 : index
    %54 = memref.load %arg10[%c0_26, %c3] : memref<8x4xf32, #tpu.memory_space<smem>>
    %55 = vector.broadcast %54 : f32 to vector<8x128xf32>
    %56 = arith.mulf %41, %55 : vector<8x128xf32>
    %57 = arith.addf %39, %56 : vector<8x128xf32>
    %c1_27 = arith.constant 1 : index
    %c0_28 = arith.constant 0 : index
    %c0_29 = arith.constant 0 : index
    %58 = vector.load %arg5[%c1_27, %c0_28, %c0_29] : memref<8x8x128xf32, #tpu.memory_space<vmem>>, vector<1x8x128xf32>
    %59 = vector.shape_cast %58 : vector<1x8x128xf32> to vector<8x128xf32>
    %c1_30 = arith.constant 1 : index
    %c0_31 = arith.constant 0 : index
    %60 = memref.load %arg10[%c1_30, %c0_31] : memref<8x4xf32, #tpu.memory_space<smem>>
    %61 = vector.broadcast %60 : f32 to vector<8x128xf32>
    %62 = arith.mulf %59, %61 : vector<8x128xf32>
    %63 = arith.addf %45, %62 : vector<8x128xf32>
    %c1_32 = arith.constant 1 : index
    %c1_33 = arith.constant 1 : index
    %64 = memref.load %arg10[%c1_32, %c1_33] : memref<8x4xf32, #tpu.memory_space<smem>>
    %65 = vector.broadcast %64 : f32 to vector<8x128xf32>
    %66 = arith.mulf %59, %65 : vector<8x128xf32>
    %67 = arith.addf %49, %66 : vector<8x128xf32>
    %c1_34 = arith.constant 1 : index
    %c2_35 = arith.constant 2 : index
    %68 = memref.load %arg10[%c1_34, %c2_35] : memref<8x4xf32, #tpu.memory_space<smem>>
    %69 = vector.broadcast %68 : f32 to vector<8x128xf32>
    %70 = arith.mulf %59, %69 : vector<8x128xf32>
    %71 = arith.addf %53, %70 : vector<8x128xf32>
    %c1_36 = arith.constant 1 : index
    %c3_37 = arith.constant 3 : index
    %72 = memref.load %arg10[%c1_36, %c3_37] : memref<8x4xf32, #tpu.memory_space<smem>>
    %73 = vector.broadcast %72 : f32 to vector<8x128xf32>
    %74 = arith.mulf %59, %73 : vector<8x128xf32>
    %75 = arith.addf %57, %74 : vector<8x128xf32>
    %c2_38 = arith.constant 2 : index
    %c0_39 = arith.constant 0 : index
    %c0_40 = arith.constant 0 : index
    %76 = vector.load %arg5[%c2_38, %c0_39, %c0_40] : memref<8x8x128xf32, #tpu.memory_space<vmem>>, vector<1x8x128xf32>
    %77 = vector.shape_cast %76 : vector<1x8x128xf32> to vector<8x128xf32>
    %c2_41 = arith.constant 2 : index
    %c0_42 = arith.constant 0 : index
    %78 = memref.load %arg10[%c2_41, %c0_42] : memref<8x4xf32, #tpu.memory_space<smem>>
    %79 = vector.broadcast %78 : f32 to vector<8x128xf32>
    %80 = arith.mulf %77, %79 : vector<8x128xf32>
    %81 = arith.addf %63, %80 : vector<8x128xf32>
    %c2_43 = arith.constant 2 : index
    %c1_44 = arith.constant 1 : index
    %82 = memref.load %arg10[%c2_43, %c1_44] : memref<8x4xf32, #tpu.memory_space<smem>>
    %83 = vector.broadcast %82 : f32 to vector<8x128xf32>
    %84 = arith.mulf %77, %83 : vector<8x128xf32>
    %85 = arith.addf %67, %84 : vector<8x128xf32>
    %c2_45 = arith.constant 2 : index
    %c2_46 = arith.constant 2 : index
    %86 = memref.load %arg10[%c2_45, %c2_46] : memref<8x4xf32, #tpu.memory_space<smem>>
    %87 = vector.broadcast %86 : f32 to vector<8x128xf32>
    %88 = arith.mulf %77, %87 : vector<8x128xf32>
    %89 = arith.addf %71, %88 : vector<8x128xf32>
    %c2_47 = arith.constant 2 : index
    %c3_48 = arith.constant 3 : index
    %90 = memref.load %arg10[%c2_47, %c3_48] : memref<8x4xf32, #tpu.memory_space<smem>>
    %91 = vector.broadcast %90 : f32 to vector<8x128xf32>
    %92 = arith.mulf %77, %91 : vector<8x128xf32>
    %93 = arith.addf %75, %92 : vector<8x128xf32>
    %c3_49 = arith.constant 3 : index
    %c0_50 = arith.constant 0 : index
    %c0_51 = arith.constant 0 : index
    %94 = vector.load %arg5[%c3_49, %c0_50, %c0_51] : memref<8x8x128xf32, #tpu.memory_space<vmem>>, vector<1x8x128xf32>
    %95 = vector.shape_cast %94 : vector<1x8x128xf32> to vector<8x128xf32>
    %c3_52 = arith.constant 3 : index
    %c0_53 = arith.constant 0 : index
    %96 = memref.load %arg10[%c3_52, %c0_53] : memref<8x4xf32, #tpu.memory_space<smem>>
    %97 = vector.broadcast %96 : f32 to vector<8x128xf32>
    %98 = arith.mulf %95, %97 : vector<8x128xf32>
    %99 = arith.addf %81, %98 : vector<8x128xf32>
    %c3_54 = arith.constant 3 : index
    %c1_55 = arith.constant 1 : index
    %100 = memref.load %arg10[%c3_54, %c1_55] : memref<8x4xf32, #tpu.memory_space<smem>>
    %101 = vector.broadcast %100 : f32 to vector<8x128xf32>
    %102 = arith.mulf %95, %101 : vector<8x128xf32>
    %103 = arith.addf %85, %102 : vector<8x128xf32>
    %c3_56 = arith.constant 3 : index
    %c2_57 = arith.constant 2 : index
    %104 = memref.load %arg10[%c3_56, %c2_57] : memref<8x4xf32, #tpu.memory_space<smem>>
    %105 = vector.broadcast %104 : f32 to vector<8x128xf32>
    %106 = arith.mulf %95, %105 : vector<8x128xf32>
    %107 = arith.addf %89, %106 : vector<8x128xf32>
    %c3_58 = arith.constant 3 : index
    %c3_59 = arith.constant 3 : index
    %108 = memref.load %arg10[%c3_58, %c3_59] : memref<8x4xf32, #tpu.memory_space<smem>>
    %109 = vector.broadcast %108 : f32 to vector<8x128xf32>
    %110 = arith.mulf %95, %109 : vector<8x128xf32>
    %111 = arith.addf %93, %110 : vector<8x128xf32>
    %c4 = arith.constant 4 : index
    %c0_60 = arith.constant 0 : index
    %c0_61 = arith.constant 0 : index
    %112 = vector.load %arg5[%c4, %c0_60, %c0_61] : memref<8x8x128xf32, #tpu.memory_space<vmem>>, vector<1x8x128xf32>
    %113 = vector.shape_cast %112 : vector<1x8x128xf32> to vector<8x128xf32>
    %c4_62 = arith.constant 4 : index
    %c0_63 = arith.constant 0 : index
    %114 = memref.load %arg10[%c4_62, %c0_63] : memref<8x4xf32, #tpu.memory_space<smem>>
    %115 = vector.broadcast %114 : f32 to vector<8x128xf32>
    %116 = arith.mulf %113, %115 : vector<8x128xf32>
    %117 = arith.addf %99, %116 : vector<8x128xf32>
    %c4_64 = arith.constant 4 : index
    %c1_65 = arith.constant 1 : index
    %118 = memref.load %arg10[%c4_64, %c1_65] : memref<8x4xf32, #tpu.memory_space<smem>>
    %119 = vector.broadcast %118 : f32 to vector<8x128xf32>
    %120 = arith.mulf %113, %119 : vector<8x128xf32>
    %121 = arith.addf %103, %120 : vector<8x128xf32>
    %c4_66 = arith.constant 4 : index
    %c2_67 = arith.constant 2 : index
    %122 = memref.load %arg10[%c4_66, %c2_67] : memref<8x4xf32, #tpu.memory_space<smem>>
    %123 = vector.broadcast %122 : f32 to vector<8x128xf32>
    %124 = arith.mulf %113, %123 : vector<8x128xf32>
    %125 = arith.addf %107, %124 : vector<8x128xf32>
    %c4_68 = arith.constant 4 : index
    %c3_69 = arith.constant 3 : index
    %126 = memref.load %arg10[%c4_68, %c3_69] : memref<8x4xf32, #tpu.memory_space<smem>>
    %127 = vector.broadcast %126 : f32 to vector<8x128xf32>
    %128 = arith.mulf %113, %127 : vector<8x128xf32>
    %129 = arith.addf %111, %128 : vector<8x128xf32>
    %c5 = arith.constant 5 : index
    %c0_70 = arith.constant 0 : index
    %c0_71 = arith.constant 0 : index
    %130 = vector.load %arg5[%c5, %c0_70, %c0_71] : memref<8x8x128xf32, #tpu.memory_space<vmem>>, vector<1x8x128xf32>
    %131 = vector.shape_cast %130 : vector<1x8x128xf32> to vector<8x128xf32>
    %c5_72 = arith.constant 5 : index
    %c0_73 = arith.constant 0 : index
    %132 = memref.load %arg10[%c5_72, %c0_73] : memref<8x4xf32, #tpu.memory_space<smem>>
    %133 = vector.broadcast %132 : f32 to vector<8x128xf32>
    %134 = arith.mulf %131, %133 : vector<8x128xf32>
    %135 = arith.addf %117, %134 : vector<8x128xf32>
    %c5_74 = arith.constant 5 : index
    %c1_75 = arith.constant 1 : index
    %136 = memref.load %arg10[%c5_74, %c1_75] : memref<8x4xf32, #tpu.memory_space<smem>>
    %137 = vector.broadcast %136 : f32 to vector<8x128xf32>
    %138 = arith.mulf %131, %137 : vector<8x128xf32>
    %139 = arith.addf %121, %138 : vector<8x128xf32>
    %c5_76 = arith.constant 5 : index
    %c2_77 = arith.constant 2 : index
    %140 = memref.load %arg10[%c5_76, %c2_77] : memref<8x4xf32, #tpu.memory_space<smem>>
    %141 = vector.broadcast %140 : f32 to vector<8x128xf32>
    %142 = arith.mulf %131, %141 : vector<8x128xf32>
    %143 = arith.addf %125, %142 : vector<8x128xf32>
    %c5_78 = arith.constant 5 : index
    %c3_79 = arith.constant 3 : index
    %144 = memref.load %arg10[%c5_78, %c3_79] : memref<8x4xf32, #tpu.memory_space<smem>>
    %145 = vector.broadcast %144 : f32 to vector<8x128xf32>
    %146 = arith.mulf %131, %145 : vector<8x128xf32>
    %147 = arith.addf %129, %146 : vector<8x128xf32>
    %c6 = arith.constant 6 : index
    %c0_80 = arith.constant 0 : index
    %c0_81 = arith.constant 0 : index
    %148 = vector.load %arg5[%c6, %c0_80, %c0_81] : memref<8x8x128xf32, #tpu.memory_space<vmem>>, vector<1x8x128xf32>
    %149 = vector.shape_cast %148 : vector<1x8x128xf32> to vector<8x128xf32>
    %c6_82 = arith.constant 6 : index
    %c0_83 = arith.constant 0 : index
    %150 = memref.load %arg10[%c6_82, %c0_83] : memref<8x4xf32, #tpu.memory_space<smem>>
    %151 = vector.broadcast %150 : f32 to vector<8x128xf32>
    %152 = arith.mulf %149, %151 : vector<8x128xf32>
    %153 = arith.addf %135, %152 : vector<8x128xf32>
    %c6_84 = arith.constant 6 : index
    %c1_85 = arith.constant 1 : index
    %154 = memref.load %arg10[%c6_84, %c1_85] : memref<8x4xf32, #tpu.memory_space<smem>>
    %155 = vector.broadcast %154 : f32 to vector<8x128xf32>
    %156 = arith.mulf %149, %155 : vector<8x128xf32>
    %157 = arith.addf %139, %156 : vector<8x128xf32>
    %c6_86 = arith.constant 6 : index
    %c2_87 = arith.constant 2 : index
    %158 = memref.load %arg10[%c6_86, %c2_87] : memref<8x4xf32, #tpu.memory_space<smem>>
    %159 = vector.broadcast %158 : f32 to vector<8x128xf32>
    %160 = arith.mulf %149, %159 : vector<8x128xf32>
    %161 = arith.addf %143, %160 : vector<8x128xf32>
    %c6_88 = arith.constant 6 : index
    %c3_89 = arith.constant 3 : index
    %162 = memref.load %arg10[%c6_88, %c3_89] : memref<8x4xf32, #tpu.memory_space<smem>>
    %163 = vector.broadcast %162 : f32 to vector<8x128xf32>
    %164 = arith.mulf %149, %163 : vector<8x128xf32>
    %165 = arith.addf %147, %164 : vector<8x128xf32>
    %c7 = arith.constant 7 : index
    %c0_90 = arith.constant 0 : index
    %c0_91 = arith.constant 0 : index
    %166 = vector.load %arg5[%c7, %c0_90, %c0_91] : memref<8x8x128xf32, #tpu.memory_space<vmem>>, vector<1x8x128xf32>
    %167 = vector.shape_cast %166 : vector<1x8x128xf32> to vector<8x128xf32>
    %c7_92 = arith.constant 7 : index
    %c0_93 = arith.constant 0 : index
    %168 = memref.load %arg10[%c7_92, %c0_93] : memref<8x4xf32, #tpu.memory_space<smem>>
    %169 = vector.broadcast %168 : f32 to vector<8x128xf32>
    %170 = arith.mulf %167, %169 : vector<8x128xf32>
    %171 = arith.addf %153, %170 : vector<8x128xf32>
    %c7_94 = arith.constant 7 : index
    %c1_95 = arith.constant 1 : index
    %172 = memref.load %arg10[%c7_94, %c1_95] : memref<8x4xf32, #tpu.memory_space<smem>>
    %173 = vector.broadcast %172 : f32 to vector<8x128xf32>
    %174 = arith.mulf %167, %173 : vector<8x128xf32>
    %175 = arith.addf %157, %174 : vector<8x128xf32>
    %c7_96 = arith.constant 7 : index
    %c2_97 = arith.constant 2 : index
    %176 = memref.load %arg10[%c7_96, %c2_97] : memref<8x4xf32, #tpu.memory_space<smem>>
    %177 = vector.broadcast %176 : f32 to vector<8x128xf32>
    %178 = arith.mulf %167, %177 : vector<8x128xf32>
    %179 = arith.addf %161, %178 : vector<8x128xf32>
    %c7_98 = arith.constant 7 : index
    %c3_99 = arith.constant 3 : index
    %180 = memref.load %arg10[%c7_98, %c3_99] : memref<8x4xf32, #tpu.memory_space<smem>>
    %181 = vector.broadcast %180 : f32 to vector<8x128xf32>
    %182 = arith.mulf %167, %181 : vector<8x128xf32>
    %183 = arith.addf %165, %182 : vector<8x128xf32>
    %cst_100 = arith.constant 0.00999999977 : f32
    %184 = vector.broadcast %cst_100 : f32 to vector<8x128xf32>
    %185 = arith.mulf %184, %171 : vector<8x128xf32>
    %186 = arith.maximumf %171, %185 : vector<8x128xf32>
    %187 = arith.addf %186, %10 : vector<8x128xf32>
    %c0_101 = arith.constant 0 : index
    %c0_102 = arith.constant 0 : index
    %188 = vector.load %arg18[%c0_101, %c0_102] : memref<8x4xf32, #tpu.memory_space<vmem>>, vector<8x1xf32>
    %cst_103 = arith.constant dense<0xFF800000> : vector<8xf32>
    %189 = vector.multi_reduction <maximumf>, %187, %cst_103 [1] : vector<8x128xf32> to vector<8xf32>
    %190 = vector.shape_cast %189 : vector<8xf32> to vector<8x1xf32>
    %191 = arith.maximumf %188, %190 : vector<8x1xf32>
    %192 = arith.subf %188, %191 : vector<8x1xf32>
    %193 = math.exp %192 : vector<8x1xf32>
    %194 = vector.broadcast %191 : vector<8x1xf32> to vector<8x128xf32>
    %195 = arith.subf %187, %194 : vector<8x128xf32>
    %196 = math.exp %195 : vector<8x128xf32>
    %c0_104 = arith.constant 0 : index
    %c0_105 = arith.constant 0 : index
    %197 = vector.load %arg19[%c0_104, %c0_105] : memref<8x4xf32, #tpu.memory_space<vmem>>, vector<8x1xf32>
    %198 = arith.mulf %193, %197 : vector<8x1xf32>
    %cst_106 = arith.constant dense<0.000000e+00> : vector<8xf32>
    %199 = vector.multi_reduction <add>, %196, %cst_106 [1] : vector<8x128xf32> to vector<8xf32>
    %200 = vector.shape_cast %199 : vector<8xf32> to vector<8x1xf32>
    %201 = arith.addf %198, %200 : vector<8x1xf32>
    %c0_107 = arith.constant 0 : index
    %c0_108 = arith.constant 0 : index
    %202 = vector.load %arg19[%c0_107, %c0_108] : memref<8x4xf32, #tpu.memory_space<vmem>>, vector<8x1xf32>
    tpu.vector_store %arg19[%c0_107, %c0_108], %201 {strides = array<i32>} : memref<8x4xf32, #tpu.memory_space<vmem>>, vector<8x1xf32>,
    %c0_109 = arith.constant 0 : index
    %c0_110 = arith.constant 0 : index
    %203 = vector.load %arg20[%c0_109, %c0_110] : memref<8x32xf32, #tpu.memory_space<vmem>>, vector<8x8xf32>
    %204 = vector.broadcast %193 : vector<8x1xf32> to vector<8x8xf32>
    %205 = arith.mulf %204, %203 : vector<8x8xf32>
    %206 = vector.extract_strided_slice %19 {offsets = [0, 0], sizes = [128, 8], strides = [1, 1]} : vector<128x32xf32> to vector<128x8xf32>
    %cst_111 = arith.constant dense<0.000000e+00> : vector<8x8xf32>
    %207 = tpu.matmul %196, %206, %cst_111 {dimension_numbers = #tpu.dot_dimension_numbers<[1], [0], [0], [1], [0, 0, 1, 1], [], []>, precision = #tpu.contract_precision<fp32>} : vector<8x128xf32>, vector<128x8xf32>, vector<8x8xf32> -> vector<8x8xf32>
    %208 = arith.addf %205, %207 : vector<8x8xf32>
    %c0_112 = arith.constant 0 : index
    %c0_113 = arith.constant 0 : index
    %209 = vector.load %arg20[%c0_112, %c0_113] : memref<8x32xf32, #tpu.memory_space<vmem>>, vector<8x8xf32>
    tpu.vector_store %arg20[%c0_112, %c0_113], %208 {strides = array<i32>} : memref<8x32xf32, #tpu.memory_space<vmem>>, vector<8x8xf32>,
    %c0_114 = arith.constant 0 : index
    %c0_115 = arith.constant 0 : index
    %210 = vector.load %arg18[%c0_114, %c0_115] : memref<8x4xf32, #tpu.memory_space<vmem>>, vector<8x1xf32>
    tpu.vector_store %arg18[%c0_114, %c0_115], %191 {strides = array<i32>} : memref<8x4xf32, #tpu.memory_space<vmem>>, vector<8x1xf32>,
    %cst_116 = arith.constant 0.00999999977 : f32
    %211 = vector.broadcast %cst_116 : f32 to vector<8x128xf32>
    %212 = arith.mulf %211, %175 : vector<8x128xf32>
    %213 = arith.maximumf %175, %212 : vector<8x128xf32>
    %214 = arith.addf %213, %10 : vector<8x128xf32>
    %c0_117 = arith.constant 0 : index
    %c1_118 = arith.constant 1 : index
    %215 = vector.load %arg18[%c0_117, %c1_118] : memref<8x4xf32, #tpu.memory_space<vmem>>, vector<8x1xf32>
    %cst_119 = arith.constant dense<0xFF800000> : vector<8xf32>
    %216 = vector.multi_reduction <maximumf>, %214, %cst_119 [1] : vector<8x128xf32> to vector<8xf32>
    %217 = vector.shape_cast %216 : vector<8xf32> to vector<8x1xf32>
    %218 = arith.maximumf %215, %217 : vector<8x1xf32>
    %219 = arith.subf %215, %218 : vector<8x1xf32>
    %220 = math.exp %219 : vector<8x1xf32>
    %221 = vector.broadcast %218 : vector<8x1xf32> to vector<8x128xf32>
    %222 = arith.subf %214, %221 : vector<8x128xf32>
    %223 = math.exp %222 : vector<8x128xf32>
    %c0_120 = arith.constant 0 : index
    %c1_121 = arith.constant 1 : index
    %224 = vector.load %arg19[%c0_120, %c1_121] : memref<8x4xf32, #tpu.memory_space<vmem>>, vector<8x1xf32>
    %225 = arith.mulf %220, %224 : vector<8x1xf32>
    %cst_122 = arith.constant dense<0.000000e+00> : vector<8xf32>
    %226 = vector.multi_reduction <add>, %223, %cst_122 [1] : vector<8x128xf32> to vector<8xf32>
    %227 = vector.shape_cast %226 : vector<8xf32> to vector<8x1xf32>
    %228 = arith.addf %225, %227 : vector<8x1xf32>
    %c0_123 = arith.constant 0 : index
    %c1_124 = arith.constant 1 : index
    %229 = vector.load %arg19[%c0_123, %c1_124] : memref<8x4xf32, #tpu.memory_space<vmem>>, vector<8x1xf32>
    tpu.vector_store %arg19[%c0_123, %c1_124], %228 {strides = array<i32>} : memref<8x4xf32, #tpu.memory_space<vmem>>, vector<8x1xf32>,
    %c0_125 = arith.constant 0 : index
    %c8 = arith.constant 8 : index
    %230 = vector.load %arg20[%c0_125, %c8] : memref<8x32xf32, #tpu.memory_space<vmem>>, vector<8x8xf32>
    %231 = vector.broadcast %220 : vector<8x1xf32> to vector<8x8xf32>
    %232 = arith.mulf %231, %230 : vector<8x8xf32>
    %233 = vector.extract_strided_slice %19 {offsets = [0, 8], sizes = [128, 8], strides = [1, 1]} : vector<128x32xf32> to vector<128x8xf32>
    %cst_126 = arith.constant dense<0.000000e+00> : vector<8x8xf32>
    %234 = tpu.matmul %223, %233, %cst_126 {dimension_numbers = #tpu.dot_dimension_numbers<[1], [0], [0], [1], [0, 0, 1, 1], [], []>, precision = #tpu.contract_precision<fp32>} : vector<8x128xf32>, vector<128x8xf32>, vector<8x8xf32> -> vector<8x8xf32>
    %235 = arith.addf %232, %234 : vector<8x8xf32>
    %c0_127 = arith.constant 0 : index
    %c8_128 = arith.constant 8 : index
    %236 = vector.load %arg20[%c0_127, %c8_128] : memref<8x32xf32, #tpu.memory_space<vmem>>, vector<8x8xf32>
    tpu.vector_store %arg20[%c0_127, %c8_128], %235 {strides = array<i32>} : memref<8x32xf32, #tpu.memory_space<vmem>>, vector<8x8xf32>,
    %c0_129 = arith.constant 0 : index
    %c1_130 = arith.constant 1 : index
    %237 = vector.load %arg18[%c0_129, %c1_130] : memref<8x4xf32, #tpu.memory_space<vmem>>, vector<8x1xf32>
    tpu.vector_store %arg18[%c0_129, %c1_130], %218 {strides = array<i32>} : memref<8x4xf32, #tpu.memory_space<vmem>>, vector<8x1xf32>,
    %cst_131 = arith.constant 0.00999999977 : f32
    %238 = vector.broadcast %cst_131 : f32 to vector<8x128xf32>
    %239 = arith.mulf %238, %179 : vector<8x128xf32>
    %240 = arith.maximumf %179, %239 : vector<8x128xf32>
    %241 = arith.addf %240, %10 : vector<8x128xf32>
    %c0_132 = arith.constant 0 : index
    %c2_133 = arith.constant 2 : index
    %242 = vector.load %arg18[%c0_132, %c2_133] : memref<8x4xf32, #tpu.memory_space<vmem>>, vector<8x1xf32>
    %cst_134 = arith.constant dense<0xFF800000> : vector<8xf32>
    %243 = vector.multi_reduction <maximumf>, %241, %cst_134 [1] : vector<8x128xf32> to vector<8xf32>
    %244 = vector.shape_cast %243 : vector<8xf32> to vector<8x1xf32>
    %245 = arith.maximumf %242, %244 : vector<8x1xf32>
    %246 = arith.subf %242, %245 : vector<8x1xf32>
    %247 = math.exp %246 : vector<8x1xf32>
    %248 = vector.broadcast %245 : vector<8x1xf32> to vector<8x128xf32>
    %249 = arith.subf %241, %248 : vector<8x128xf32>
    %250 = math.exp %249 : vector<8x128xf32>
    %c0_135 = arith.constant 0 : index
    %c2_136 = arith.constant 2 : index
    %251 = vector.load %arg19[%c0_135, %c2_136] : memref<8x4xf32, #tpu.memory_space<vmem>>, vector<8x1xf32>
    %252 = arith.mulf %247, %251 : vector<8x1xf32>
    %cst_137 = arith.constant dense<0.000000e+00> : vector<8xf32>
    %253 = vector.multi_reduction <add>, %250, %cst_137 [1] : vector<8x128xf32> to vector<8xf32>
    %254 = vector.shape_cast %253 : vector<8xf32> to vector<8x1xf32>
    %255 = arith.addf %252, %254 : vector<8x1xf32>
    %c0_138 = arith.constant 0 : index
    %c2_139 = arith.constant 2 : index
    %256 = vector.load %arg19[%c0_138, %c2_139] : memref<8x4xf32, #tpu.memory_space<vmem>>, vector<8x1xf32>
    tpu.vector_store %arg19[%c0_138, %c2_139], %255 {strides = array<i32>} : memref<8x4xf32, #tpu.memory_space<vmem>>, vector<8x1xf32>,
    %c0_140 = arith.constant 0 : index
    %c16 = arith.constant 16 : index
    %257 = vector.load %arg20[%c0_140, %c16] : memref<8x32xf32, #tpu.memory_space<vmem>>, vector<8x8xf32>
    %258 = vector.broadcast %247 : vector<8x1xf32> to vector<8x8xf32>
    %259 = arith.mulf %258, %257 : vector<8x8xf32>
    %260 = vector.extract_strided_slice %19 {offsets = [0, 16], sizes = [128, 8], strides = [1, 1]} : vector<128x32xf32> to vector<128x8xf32>
    %cst_141 = arith.constant dense<0.000000e+00> : vector<8x8xf32>
    %261 = tpu.matmul %250, %260, %cst_141 {dimension_numbers = #tpu.dot_dimension_numbers<[1], [0], [0], [1], [0, 0, 1, 1], [], []>, precision = #tpu.contract_precision<fp32>} : vector<8x128xf32>, vector<128x8xf32>, vector<8x8xf32> -> vector<8x8xf32>
    %262 = arith.addf %259, %261 : vector<8x8xf32>
    %c0_142 = arith.constant 0 : index
    %c16_143 = arith.constant 16 : index
    %263 = vector.load %arg20[%c0_142, %c16_143] : memref<8x32xf32, #tpu.memory_space<vmem>>, vector<8x8xf32>
    tpu.vector_store %arg20[%c0_142, %c16_143], %262 {strides = array<i32>} : memref<8x32xf32, #tpu.memory_space<vmem>>, vector<8x8xf32>,
    %c0_144 = arith.constant 0 : index
    %c2_145 = arith.constant 2 : index
    %264 = vector.load %arg18[%c0_144, %c2_145] : memref<8x4xf32, #tpu.memory_space<vmem>>, vector<8x1xf32>
    tpu.vector_store %arg18[%c0_144, %c2_145], %245 {strides = array<i32>} : memref<8x4xf32, #tpu.memory_space<vmem>>, vector<8x1xf32>,
    %cst_146 = arith.constant 0.00999999977 : f32
    %265 = vector.broadcast %cst_146 : f32 to vector<8x128xf32>
    %266 = arith.mulf %265, %183 : vector<8x128xf32>
    %267 = arith.maximumf %183, %266 : vector<8x128xf32>
    %268 = arith.addf %267, %10 : vector<8x128xf32>
    %c0_147 = arith.constant 0 : index
    %c3_148 = arith.constant 3 : index
    %269 = vector.load %arg18[%c0_147, %c3_148] : memref<8x4xf32, #tpu.memory_space<vmem>>, vector<8x1xf32>
    %cst_149 = arith.constant dense<0xFF800000> : vector<8xf32>
    %270 = vector.multi_reduction <maximumf>, %268, %cst_149 [1] : vector<8x128xf32> to vector<8xf32>
    %271 = vector.shape_cast %270 : vector<8xf32> to vector<8x1xf32>
    %272 = arith.maximumf %269, %271 : vector<8x1xf32>
    %273 = arith.subf %269, %272 : vector<8x1xf32>
    %274 = math.exp %273 : vector<8x1xf32>
    %275 = vector.broadcast %272 : vector<8x1xf32> to vector<8x128xf32>
    %276 = arith.subf %268, %275 : vector<8x128xf32>
    %277 = math.exp %276 : vector<8x128xf32>
    %c0_150 = arith.constant 0 : index
    %c3_151 = arith.constant 3 : index
    %278 = vector.load %arg19[%c0_150, %c3_151] : memref<8x4xf32, #tpu.memory_space<vmem>>, vector<8x1xf32>
    %279 = arith.mulf %274, %278 : vector<8x1xf32>
    %cst_152 = arith.constant dense<0.000000e+00> : vector<8xf32>
    %280 = vector.multi_reduction <add>, %277, %cst_152 [1] : vector<8x128xf32> to vector<8xf32>
    %281 = vector.shape_cast %280 : vector<8xf32> to vector<8x1xf32>
    %282 = arith.addf %279, %281 : vector<8x1xf32>
    %c0_153 = arith.constant 0 : index
    %c3_154 = arith.constant 3 : index
    %283 = vector.load %arg19[%c0_153, %c3_154] : memref<8x4xf32, #tpu.memory_space<vmem>>, vector<8x1xf32>
    tpu.vector_store %arg19[%c0_153, %c3_154], %282 {strides = array<i32>} : memref<8x4xf32, #tpu.memory_space<vmem>>, vector<8x1xf32>,
    %c0_155 = arith.constant 0 : index
    %c24 = arith.constant 24 : index
    %284 = vector.load %arg20[%c0_155, %c24] : memref<8x32xf32, #tpu.memory_space<vmem>>, vector<8x8xf32>
    %285 = vector.broadcast %274 : vector<8x1xf32> to vector<8x8xf32>
    %286 = arith.mulf %285, %284 : vector<8x8xf32>
    %287 = vector.extract_strided_slice %19 {offsets = [0, 24], sizes = [128, 8], strides = [1, 1]} : vector<128x32xf32> to vector<128x8xf32>
    %cst_156 = arith.constant dense<0.000000e+00> : vector<8x8xf32>
    %288 = tpu.matmul %277, %287, %cst_156 {dimension_numbers = #tpu.dot_dimension_numbers<[1], [0], [0], [1], [0, 0, 1, 1], [], []>, precision = #tpu.contract_precision<fp32>} : vector<8x128xf32>, vector<128x8xf32>, vector<8x8xf32> -> vector<8x8xf32>
    %289 = arith.addf %286, %288 : vector<8x8xf32>
    %c0_157 = arith.constant 0 : index
    %c24_158 = arith.constant 24 : index
    %290 = vector.load %arg20[%c0_157, %c24_158] : memref<8x32xf32, #tpu.memory_space<vmem>>, vector<8x8xf32>
    tpu.vector_store %arg20[%c0_157, %c24_158], %289 {strides = array<i32>} : memref<8x32xf32, #tpu.memory_space<vmem>>, vector<8x8xf32>,
    %c0_159 = arith.constant 0 : index
    %c3_160 = arith.constant 3 : index
    %291 = vector.load %arg18[%c0_159, %c3_160] : memref<8x4xf32, #tpu.memory_space<vmem>>, vector<8x1xf32>
    tpu.vector_store %arg18[%c0_159, %c3_160], %272 {strides = array<i32>} : memref<8x4xf32, #tpu.memory_space<vmem>>, vector<8x1xf32>,
    %c0_i32_161 = arith.constant 0 : i32
    %292 = arith.cmpi eq, %arg1, %c0_i32_161 : i32
    %293 = arith.extui %292 : i1 to i32
    %c0_i32_162 = arith.constant 0 : i32
    %294 = arith.cmpi ne, %293, %c0_i32_162 : i32
    scf.if %294 {
      %c0_163 = arith.constant 0 : index
      %c0_164 = arith.constant 0 : index
      %295 = vector.load %arg19[%c0_163, %c0_164] : memref<8x4xf32, #tpu.memory_space<vmem>>, vector<8x1xf32>
      %cst_165 = arith.constant 1.000000e-30 : f32
      %296 = vector.broadcast %cst_165 : f32 to vector<8x1xf32>
      %297 = arith.maximumf %295, %296 : vector<8x1xf32>
      %c0_166 = arith.constant 0 : index
      %c0_167 = arith.constant 0 : index
      %298 = vector.load %arg20[%c0_166, %c0_167] : memref<8x32xf32, #tpu.memory_space<vmem>>, vector<8x8xf32>
      %299 = vector.broadcast %297 : vector<8x1xf32> to vector<8x8xf32>
      %300 = arith.divf %298, %299 : vector<8x8xf32>
      %c0_168 = arith.constant 0 : index
      %c0_169 = arith.constant 0 : index
      %301 = vector.load %arg20[%c0_168, %c0_169] : memref<8x32xf32, #tpu.memory_space<vmem>>, vector<8x8xf32>
      tpu.vector_store %arg20[%c0_168, %c0_169], %300 {strides = array<i32>} : memref<8x32xf32, #tpu.memory_space<vmem>>, vector<8x8xf32>,
      %c0_170 = arith.constant 0 : index
      %c1_171 = arith.constant 1 : index
      %302 = vector.load %arg19[%c0_170, %c1_171] : memref<8x4xf32, #tpu.memory_space<vmem>>, vector<8x1xf32>
      %cst_172 = arith.constant 1.000000e-30 : f32
      %303 = vector.broadcast %cst_172 : f32 to vector<8x1xf32>
      %304 = arith.maximumf %302, %303 : vector<8x1xf32>
      %c0_173 = arith.constant 0 : index
      %c8_174 = arith.constant 8 : index
      %305 = vector.load %arg20[%c0_173, %c8_174] : memref<8x32xf32, #tpu.memory_space<vmem>>, vector<8x8xf32>
      %306 = vector.broadcast %304 : vector<8x1xf32> to vector<8x8xf32>
      %307 = arith.divf %305, %306 : vector<8x8xf32>
      %c0_175 = arith.constant 0 : index
      %c8_176 = arith.constant 8 : index
      %308 = vector.load %arg20[%c0_175, %c8_176] : memref<8x32xf32, #tpu.memory_space<vmem>>, vector<8x8xf32>
      tpu.vector_store %arg20[%c0_175, %c8_176], %307 {strides = array<i32>} : memref<8x32xf32, #tpu.memory_space<vmem>>, vector<8x8xf32>,
      %c0_177 = arith.constant 0 : index
      %c2_178 = arith.constant 2 : index
      %309 = vector.load %arg19[%c0_177, %c2_178] : memref<8x4xf32, #tpu.memory_space<vmem>>, vector<8x1xf32>
      %cst_179 = arith.constant 1.000000e-30 : f32
      %310 = vector.broadcast %cst_179 : f32 to vector<8x1xf32>
      %311 = arith.maximumf %309, %310 : vector<8x1xf32>
      %c0_180 = arith.constant 0 : index
      %c16_181 = arith.constant 16 : index
      %312 = vector.load %arg20[%c0_180, %c16_181] : memref<8x32xf32, #tpu.memory_space<vmem>>, vector<8x8xf32>
      %313 = vector.broadcast %311 : vector<8x1xf32> to vector<8x8xf32>
      %314 = arith.divf %312, %313 : vector<8x8xf32>
      %c0_182 = arith.constant 0 : index
      %c16_183 = arith.constant 16 : index
      %315 = vector.load %arg20[%c0_182, %c16_183] : memref<8x32xf32, #tpu.memory_space<vmem>>, vector<8x8xf32>
      tpu.vector_store %arg20[%c0_182, %c16_183], %314 {strides = array<i32>} : memref<8x32xf32, #tpu.memory_space<vmem>>, vector<8x8xf32>,
      %c0_184 = arith.constant 0 : index
      %c3_185 = arith.constant 3 : index
      %316 = vector.load %arg19[%c0_184, %c3_185] : memref<8x4xf32, #tpu.memory_space<vmem>>, vector<8x1xf32>
      %cst_186 = arith.constant 1.000000e-30 : f32
      %317 = vector.broadcast %cst_186 : f32 to vector<8x1xf32>
      %318 = arith.maximumf %316, %317 : vector<8x1xf32>
      %c0_187 = arith.constant 0 : index
      %c24_188 = arith.constant 24 : index
      %319 = vector.load %arg20[%c0_187, %c24_188] : memref<8x32xf32, #tpu.memory_space<vmem>>, vector<8x8xf32>
      %320 = vector.broadcast %318 : vector<8x1xf32> to vector<8x8xf32>
      %321 = arith.divf %319, %320 : vector<8x8xf32>
      %c0_189 = arith.constant 0 : index
      %c24_190 = arith.constant 24 : index
      %322 = vector.load %arg20[%c0_189, %c24_190] : memref<8x32xf32, #tpu.memory_space<vmem>>, vector<8x8xf32>
      tpu.vector_store %arg20[%c0_189, %c24_190], %321 {strides = array<i32>} : memref<8x32xf32, #tpu.memory_space<vmem>>, vector<8x8xf32>,
      %c0_191 = arith.constant 0 : index
      %c0_192 = arith.constant 0 : index
      %323 = vector.load %arg20[%c0_191, %c0_192] : memref<8x32xf32, #tpu.memory_space<vmem>>, vector<8x32xf32>
      %cst_193 = arith.constant 0.000000e+00 : f32
      %324 = vector.broadcast %cst_193 : f32 to vector<8x32xf32>
      %325 = arith.cmpf ogt, %323, %324 : vector<8x32xf32>
      %cst_194 = arith.constant 0.000000e+00 : f32
      %326 = vector.broadcast %cst_194 : f32 to vector<8x32xf32>
      %327 = arith.minimumf %323, %326 : vector<8x32xf32>
      %328 = math.exp %327 : vector<8x32xf32>
      %cst_195 = arith.constant 1.000000e+00 : f32
      %329 = vector.broadcast %cst_195 : f32 to vector<8x32xf32>
      %330 = arith.subf %328, %329 : vector<8x32xf32>
      %331 = arith.select %325, %323, %330 : vector<8x32xi1>, vector<8x32xf32>
      %332 = arith.addf %331, %3 : vector<8x32xf32>
      %cst_196 = arith.constant dense<0.000000e+00> : vector<8xf32>
      %333 = vector.multi_reduction <add>, %332, %cst_196 [1] : vector<8x32xf32> to vector<8xf32>
      %334 = vector.shape_cast %333 : vector<8xf32> to vector<8x1xf32>
      %cst_197 = arith.constant 3.200000e+01 : f32
      %335 = vector.broadcast %cst_197 : f32 to vector<8x1xf32>
      %336 = arith.divf %334, %335 : vector<8x1xf32>
      %337 = vector.broadcast %336 : vector<8x1xf32> to vector<8x32xf32>
      %338 = arith.subf %332, %337 : vector<8x32xf32>
      %339 = arith.mulf %338, %338 : vector<8x32xf32>
      %cst_198 = arith.constant dense<0.000000e+00> : vector<8xf32>
      %340 = vector.multi_reduction <add>, %339, %cst_198 [1] : vector<8x32xf32> to vector<8xf32>
      %341 = vector.shape_cast %340 : vector<8xf32> to vector<8x1xf32>
      %cst_199 = arith.constant 3.200000e+01 : f32
      %342 = vector.broadcast %cst_199 : f32 to vector<8x1xf32>
      %343 = arith.divf %341, %342 : vector<8x1xf32>
      %344 = vector.broadcast %336 : vector<8x1xf32> to vector<8x32xf32>
      %345 = arith.subf %332, %344 : vector<8x32xf32>
      %cst_200 = arith.constant 9.99999997E-7 : f32
      %346 = vector.broadcast %cst_200 : f32 to vector<8x1xf32>
      %347 = arith.addf %343, %346 : vector<8x1xf32>
      %348 = math.rsqrt %347 : vector<8x1xf32>
      %349 = vector.broadcast %348 : vector<8x1xf32> to vector<8x32xf32>
      %350 = arith.mulf %345, %349 : vector<8x32xf32>
      %c0_201 = arith.constant 0 : index
      %c0_202 = arith.constant 0 : index
      %351 = vector.load %arg11[%c0_201, %c0_202] : memref<1x32xf32, #tpu.memory_space<vmem>>, vector<1x32xf32>
      %352 = vector.broadcast %351 : vector<1x32xf32> to vector<8x32xf32>
      %353 = arith.mulf %350, %352 : vector<8x32xf32>
      %c0_203 = arith.constant 0 : index
      %c0_204 = arith.constant 0 : index
      %354 = vector.load %arg12[%c0_203, %c0_204] : memref<1x32xf32, #tpu.memory_space<vmem>>, vector<1x32xf32>
      %355 = vector.broadcast %354 : vector<1x32xf32> to vector<8x32xf32>
      %356 = arith.addf %353, %355 : vector<8x32xf32>
      %c0_205 = arith.constant 0 : index
      %c0_206 = arith.constant 0 : index
      %357 = vector.load %arg13[%c0_205, %c0_206] : memref<32x64xf32, #tpu.memory_space<vmem>>, vector<32x64xf32>
      %cst_207 = arith.constant dense<0.000000e+00> : vector<8x64xf32>
      %358 = tpu.matmul %356, %357, %cst_207 {dimension_numbers = #tpu.dot_dimension_numbers<[1], [0], [0], [1], [0, 0, 1, 1], [], []>, precision = #tpu.contract_precision<fp32>} : vector<8x32xf32>, vector<32x64xf32>, vector<8x64xf32> -> vector<8x64xf32>
      %c0_208 = arith.constant 0 : index
      %c0_209 = arith.constant 0 : index
      %359 = vector.load %arg14[%c0_208, %c0_209] : memref<1x64xf32, #tpu.memory_space<vmem>>, vector<1x64xf32>
      %360 = vector.broadcast %359 : vector<1x64xf32> to vector<8x64xf32>
      %361 = arith.addf %358, %360 : vector<8x64xf32>
      %cst_210 = arith.constant 5.000000e-01 : f32
      %362 = vector.broadcast %cst_210 : f32 to vector<8x64xf32>
      %363 = arith.mulf %362, %361 : vector<8x64xf32>
      %364 = arith.mulf %361, %361 : vector<8x64xf32>
      %365 = arith.mulf %361, %364 : vector<8x64xf32>
      %cst_211 = arith.constant 4.471500e-02 : f32
      %366 = vector.broadcast %cst_211 : f32 to vector<8x64xf32>
      %367 = arith.mulf %366, %365 : vector<8x64xf32>
      %368 = arith.addf %361, %367 : vector<8x64xf32>
      %cst_212 = arith.constant 0.797884583 : f32
      %369 = vector.broadcast %cst_212 : f32 to vector<8x64xf32>
      %370 = arith.mulf %369, %368 : vector<8x64xf32>
      %371 = math.tanh %370 : vector<8x64xf32>
      %cst_213 = arith.constant 1.000000e+00 : f32
      %372 = vector.broadcast %cst_213 : f32 to vector<8x64xf32>
      %373 = arith.addf %372, %371 : vector<8x64xf32>
      %374 = arith.mulf %363, %373 : vector<8x64xf32>
      %c0_214 = arith.constant 0 : index
      %c0_215 = arith.constant 0 : index
      %375 = vector.load %arg15[%c0_214, %c0_215] : memref<64x32xf32, #tpu.memory_space<vmem>>, vector<64x32xf32>
      %cst_216 = arith.constant dense<0.000000e+00> : vector<8x32xf32>
      %376 = tpu.matmul %374, %375, %cst_216 {dimension_numbers = #tpu.dot_dimension_numbers<[1], [0], [0], [1], [0, 0, 1, 1], [], []>, precision = #tpu.contract_precision<fp32>} : vector<8x64xf32>, vector<64x32xf32>, vector<8x32xf32> -> vector<8x32xf32>
      %c0_217 = arith.constant 0 : index
      %c0_218 = arith.constant 0 : index
      %377 = vector.load %arg16[%c0_217, %c0_218] : memref<1x32xf32, #tpu.memory_space<vmem>>, vector<1x32xf32>
      %378 = vector.broadcast %377 : vector<1x32xf32> to vector<8x32xf32>
      %379 = arith.addf %376, %378 : vector<8x32xf32>
      %380 = arith.addf %379, %332 : vector<8x32xf32>
      %c0_219 = arith.constant 0 : index
      %c0_220 = arith.constant 0 : index
      %381 = vector.load %arg17[%c0_219, %c0_220] : memref<8x32xf32, #tpu.memory_space<vmem>>, vector<8x32xf32>
      tpu.vector_store %arg17[%c0_219, %c0_220], %380 {strides = array<i32>} : memref<8x32xf32, #tpu.memory_space<vmem>>, vector<8x32xf32>,
    } else {
    }
    return
  }
  func.func @transform_0(%arg0: i32, %arg1: i32) -> (i32, i32) {
    %c0_i32 = arith.constant 0 : i32
    %c0_i32_0 = arith.constant 0 : i32
    return %arg0, %c0_i32 : i32, i32
  }
  func.func @transform_1(%arg0: i32, %arg1: i32) -> (i32, i32) {
    %c0_i32 = arith.constant 0 : i32
    %c0_i32_0 = arith.constant 0 : i32
    return %arg1, %c0_i32 : i32, i32
  }
  func.func @transform_2(%arg0: i32, %arg1: i32) -> (i32, i32) {
    %c0_i32 = arith.constant 0 : i32
    return %arg0, %arg1 : i32, i32
  }
  func.func @transform_3(%arg0: i32, %arg1: i32) -> (i32, i32, i32) {
    %c0_i32 = arith.constant 0 : i32
    %c0_i32_0 = arith.constant 0 : i32
    return %c0_i32, %arg0, %arg1 : i32, i32, i32
  }
  func.func @transform_4(%arg0: i32, %arg1: i32) -> (i32, i32) {
    %c0_i32 = arith.constant 0 : i32
    %c0_i32_0 = arith.constant 0 : i32
    %c0_i32_1 = arith.constant 0 : i32
    return %c0_i32, %c0_i32_0 : i32, i32
  }
  func.func @transform_5(%arg0: i32, %arg1: i32) -> (i32, i32) {
    %c0_i32 = arith.constant 0 : i32
    %c0_i32_0 = arith.constant 0 : i32
    %c0_i32_1 = arith.constant 0 : i32
    return %c0_i32, %c0_i32_0 : i32, i32
  }
  func.func @transform_6(%arg0: i32, %arg1: i32) -> (i32, i32) {
    %c0_i32 = arith.constant 0 : i32
    %c0_i32_0 = arith.constant 0 : i32
    %c0_i32_1 = arith.constant 0 : i32
    return %c0_i32, %c0_i32_0 : i32, i32
  }
  func.func @transform_7(%arg0: i32, %arg1: i32) -> (i32, i32) {
    %c0_i32 = arith.constant 0 : i32
    %c0_i32_0 = arith.constant 0 : i32
    %c0_i32_1 = arith.constant 0 : i32
    return %c0_i32, %c0_i32_0 : i32, i32
  }
  func.func @transform_8(%arg0: i32, %arg1: i32) -> (i32, i32) {
    %c0_i32 = arith.constant 0 : i32
    %c0_i32_0 = arith.constant 0 : i32
    %c0_i32_1 = arith.constant 0 : i32
    return %c0_i32, %c0_i32_0 : i32, i32
  }
  func.func @transform_9(%arg0: i32, %arg1: i32) -> (i32, i32) {
    %c0_i32 = arith.constant 0 : i32
    %c0_i32_0 = arith.constant 0 : i32
    %c0_i32_1 = arith.constant 0 : i32
    return %c0_i32, %c0_i32_0 : i32, i32
  }
  func.func @transform_10(%arg0: i32, %arg1: i32) -> (i32, i32) {
    %c0_i32 = arith.constant 0 : i32
    %c0_i32_0 = arith.constant 0 : i32
    %c0_i32_1 = arith.constant 0 : i32
    return %c0_i32, %c0_i32_0 : i32, i32
  }
  func.func @transform_11(%arg0: i32, %arg1: i32) -> (i32, i32) {
    %c0_i32 = arith.constant 0 : i32
    %c0_i32_0 = arith.constant 0 : i32
    %c0_i32_1 = arith.constant 0 : i32
    return %c0_i32, %c0_i32_0 : i32, i32
  }
  func.func @transform_12(%arg0: i32, %arg1: i32) -> (i32, i32) {
    %c0_i32 = arith.constant 0 : i32
    %c0_i32_0 = arith.constant 0 : i32
    %c0_i32_1 = arith.constant 0 : i32
    return %c0_i32, %c0_i32_0 : i32, i32
  }
  func.func @transform_13(%arg0: i32, %arg1: i32) -> (i32, i32) {
    %c0_i32 = arith.constant 0 : i32
    %c0_i32_0 = arith.constant 0 : i32
    %c0_i32_1 = arith.constant 0 : i32
    return %c0_i32, %c0_i32_0 : i32, i32
  }
  func.func @transform_14(%arg0: i32, %arg1: i32) -> (i32, i32) {
    %c0_i32 = arith.constant 0 : i32
    %c0_i32_0 = arith.constant 0 : i32
    %c0_i32_1 = arith.constant 0 : i32
    return %c0_i32, %c0_i32_0 : i32, i32
  }
  func.func @transform_15(%arg0: i32, %arg1: i32) -> (i32, i32) {
    %c0_i32 = arith.constant 0 : i32
    %c0_i32_0 = arith.constant 0 : i32
    return %arg0, %c0_i32 : i32, i32
  }
}

</mosaic_0001>

<bundles_post_ra>
// kernel: ese_gat_forward.1
= control target key start
LH: loop header
LB: loop body
LE: loop exit
PB: predicated region body
PF: predicated region fallthrough
CT: control target
= control target key end

     0   :  { %s6394_s0 = inlined_call_operand.vmem [shape: f32[8,32], index: 0, kind: input, shape index: {}]   ;;  %s6395_s1 = inlined_call_operand.vmem [shape: f32[128,32], index: 1, kind: input, shape index: {}]   ;;  %s6396_s2 = inlined_call_operand.vmem [shape: f32[8,128], index: 2, kind: input, shape index: {}]   ;;  %s6397_s3 = inlined_call_operand.vmem [shape: f32[8,8,128], index: 3, kind: input, shape index: {}]   ;;  %s6398_s4 = inlined_call_operand.vmem [shape: f32[32,32], index: 4, kind: input, shape index: {}]   ;;  %s6399_s5 = inlined_call_operand.vmem [shape: f32[32,4], index: 5, kind: input, shape index: {}]   ;;  %s6400_s6 = inlined_call_operand.vmem [shape: f32[4,32], index: 6, kind: input, shape index: {}]   ;;  %s6401_s7 = inlined_call_operand.vmem [shape: f32[1,4], index: 7, kind: input, shape index: {}]   ;;  %s6402_s8 = inlined_call_operand.vmem [shape: f32[8,4], index: 8, kind: input, shape index: {}]   ;;  %s6403_s9 = inlined_call_operand.vmem [shape: f32[1,32], index: 9, kind: input, shape index: {}]   ;;  %s6404_s10 = inlined_call_operand.vmem [shape: f32[1,32], index: 10, kind: input, shape index: {}]   ;;  %s6405_s11 = inlined_call_operand.vmem [shape: f32[32,64], index: 11, kind: input, shape index: {}]   ;;  %s6406_s12 = inlined_call_operand.vmem [shape: f32[1,64], index: 12, kind: input, shape index: {}]   ;;  %s6407_s13 = inlined_call_operand.vmem [shape: f32[64,32], index: 13, kind: input, shape index: {}]   ;;  %s6408_s14 = inlined_call_operand.vmem [shape: f32[1,32], index: 14, kind: input, shape index: {}]   ;;  %s6409_s15 = inlined_call_operand.hbm [shape: f32[8,32], index: 15, kind: output, shape index: {}]  }
   0x1   :  { %6483 = sst [smem:[#allocation32_spill]] %s6408_s14 }
   0x2   :  { %6484 = sst [smem:[#allocation33_spill]] %s6409_s15 }
   0x3   :  { %20 = vsyncpa [#allocation7], 0 }
   0x4   :  { %21 = vsyncpa [#allocation6], 0  ;;  %s43_s20 = sshll.u32 %s6402_s8, 4  ;;  %s3956_s21 = smov [#allocation5]   ;;  %s44_s20 = int_to_ptr.vmem [resolvable:$true] %s43_s20 }
   0x5   :  { %46 = dma.vmem_to_smem %s44_s20, 128, %s3956_s21, [#allocation7]  }
   0x6   :  { %3952 = dma.done.wait [#allocation7], 128  }
   0x7   :  { %3953 = vsyncadd [#allocation7], 4294967168 }
   0x8   :  { %63 = sfence }
   0x9   :  { %v96_v0 = vld [vmem:[%s6399_s5 + $0x18] sm:$0xff]  ;;  %v95_v1 = vld [vmem:[%s6399_s5 + $0x10] sm:$0xff]  ;;  %v94_v2 = vld [vmem:[%s6399_s5 + $0x8] sm:$0xff]  ;;  %vm71_vm0 = vcmask 261120   ;;  %s4637_s22 = sld [smem:[#allocation5 + $0x3]]  ;;  %vm68_vm2 = vcmask 31744  }
   0xa   :  { %v4064_v3 = vand.u32 4294901760, %v96_v0  ;;  %v4066_v4 = vand.u32 4294901760, %v95_v1  ;;  %v4068_v5 = vand.u32 4294901760, %v94_v2  ;;  %v93_v6 = vld [vmem:[%s6399_s5] sm:$0xff]  ;;  %v89_v7 = vld [vmem:[%s6395_s1 + $0x78] sm:$0xff]  ;;  %v88_v17 = vld [vmem:[%s6395_s1 + $0x70] sm:$0xff] }
   0xb   :  { %v73_v8 = vld [vmem:[%s6394_s0] sm:$0xff]  ;;  %v4079_v9 = vand.u32 4294901760, %v93_v6  ;;  %v340_v14 = vsel %vm71_vm0, %v89_v7, 0  ;;  %v337_v27 = vsel %vm71_vm0, %v88_v17, 0  ;;  %v87_v29 = vld [vmem:[%s6395_s1 + $0x68] sm:$0xff]  ;;  %v85_v45 = vld [vmem:[%s6395_s1 + $0x58] sm:$0xff] }
   0xc   :  { %v103_v10 = vsel %vm71_vm0, %v73_v8, 0  ;;  %118 = vmatpush.msra.mxu2 %v4064_v3  ;;  %v147_v11 = vsub.f32 %v96_v0, %v4064_v3  ;;  %278 = vmatpush.msra.mxu1 %v4064_v3  ;;  %v153_v12 = vsub.f32 %v95_v1, %v4066_v4  ;;  %v159_v13 = vsub.f32 %v94_v2, %v4068_v5  ;;  %v86_v39 = vld [vmem:[%s6395_s1 + $0x60] sm:$0xff]  ;;  %v84_v51 = vld [vmem:[%s6395_s1 + $0x50] sm:$0xff]  ;;  %v83_v58 = vld [vmem:[%s6395_s1 + $0x48] sm:$0xff]  ;;  %s4639_s23 = sld [smem:[#allocation5 + $0x80]]  ;;  %s3965_s15 = smov 112  }
   0xd   :  { %v165_v15 = vsub.f32 %v93_v6, %v4079_v9  ;;  %v4089_v16 = vand.u32 4294901760, %v103_v10  ;;  %v4096_v22 = vand.u32 4294901760, %v340_v14  ;;  %v4116_v35 = vand.u32 4294901760, %v337_v27  ;;  %v82_v1 = vld [vmem:[%s6395_s1 + $0x40] sm:$0xff]  ;;  %v81_v8 = vld [vmem:[%s6395_s1 + $0x38] sm:$0xff]  ;;  %s4642_s24 = sld [smem:[#allocation5 + $0x83]] }
   0xe   :  { %120 = vmatpush.msra.mxu2 %v4066_v4  ;;  %v148_v18 = vand.u32 4294901760, %v147_v11  ;;  %v154_v19 = vand.u32 4294901760, %v153_v12  ;;  %280 = vmatpush.msra.mxu1 %v4066_v4  ;;  %v160_v20 = vand.u32 4294901760, %v159_v13  ;;  %v334_v37 = vsel %vm71_vm0, %v87_v29, 0  ;;  %s4646_s25 = sld [smem:[#allocation5 + $0x100]]  ;;  %s3968_s20 = smov 16  }
   0xf   :  { %v166_v21 = vand.u32 4294901760, %v165_v15  ;;  %v4099_v23 = vsub.f32 %v103_v10, %v4089_v16  ;;  %v4111_v33 = vsub.f32 %v340_v14, %v4096_v22  ;;  %v4128_v42 = vsub.f32 %v337_v27, %v4116_v35  ;;  %v80_v14 = vld [vmem:[%s6395_s1 + $0x30] sm:$0xff]  ;;  %s4648_s26 = sld [smem:[#allocation5 + $0x103]] }
  0x10   :  { %122 = vmatpush.msra.mxu2 %v4068_v5  ;;  %247 = vmatpush.msra.mxu0 %v148_v18  ;;  %v149_v24 = vsub.f32 %v147_v11, %v148_v18  ;;  %v155_v25 = vsub.f32 %v153_v12, %v154_v19  ;;  %v161_v26 = vsub.f32 %v159_v13, %v160_v20  ;;  %v4130_v43 = vand.u32 4294901760, %v334_v37  ;;  %s4652_s27 = sld [smem:[#allocation5 + $0x183]] }
  0x11   :  { %282 = vmatpush.msra.mxu1 %v4068_v5  ;;  %v127_v28 = vand.u32 4294901760, %v4099_v23  ;;  %v167_v32 = vsub.f32 %v165_v15, %v166_v21  ;;  %6485 = vst [vmem:[#allocation11_spill] sm:$0xff] %v4111_v33  ;;  %v4124_v41 = vand.u32 4294901760, %v4111_v33  ;;  %v331_v44 = vsel %vm71_vm0, %v86_v39, 0  ;;  %v77_v39 = vld [vmem:[%s6395_s1 + $0x18] sm:$0xff]  ;;  %s4654_s8 = sld [smem:[#allocation5 + $0x203]] }
  0x12   :  { %124 = vmatpush.msra.mxu2 %v4079_v9  ;;  %251 = vmatpush.msra.mxu0 %v154_v19  ;;  %v150_v30 = vand.u32 4294901760, %v149_v24  ;;  %v156_v31 = vand.u32 4294901760, %v155_v25  ;;  %v162_v36 = vand.u32 4294901760, %v161_v26  ;;  %6486 = vst [vmem:[#allocation12_spill] sm:$0xff] %v4128_v42  ;;  %v4143_v47 = vsub.f32 %v334_v37, %v4130_v43  ;;  %s4658_s28 = sld [smem:[#allocation5 + $0x2]] }
  0x13   :  { %284 = vmatpush.msra.mxu1 %v4079_v9  ;;  %v128_v34 = vsub.f32 %v4099_v23, %v127_v28  ;;  %v168_v40 = vand.u32 4294901760, %v167_v32  ;;  %v386_v46 = vsub.f32 %v4111_v33, %v4124_v41  ;;  %v4145_v48 = vand.u32 4294901760, %v331_v44  ;;  %s4661_s29 = sld [smem:[#allocation5 + $0x82]] }
  0x14   :  { %189 = vmatpush.msrb.mxu2 %v147_v11  ;;  %151 = vmatpush.msra.mxu3 %v150_v30  ;;  %6487 = vst [vmem:[#allocation13_spill] sm:$0xff] %v4143_v47  ;;  %v4148_v49 = vand.u32 4294901760, %v4128_v42  ;;  %v328_v50 = vsel %vm71_vm0, %v85_v45, 0  ;;  %v4162_v53 = vand.u32 4294901760, %v4143_v47  ;;  %v325_v57 = vsel %vm71_vm0, %v84_v51, 0  ;;  %v78_v30 = vld [vmem:[%s6395_s1 + $0x20] sm:$0xff] }
  0x15   :  { %255 = vmatpush.msra.mxu0 %v160_v20  ;;  %539 = vmatpush.xpose.msrb.mxu1 %v4096_v22  ;;  %v129_v38 = vand.u32 4294901760, %v128_v34  ;;  %v4159_v52 = vand.u32 4294901760, %v386_v46  ;;  %v4166_v54 = vsub.f32 %v331_v44, %v4145_v48  ;;  %v4170_v56 = vand.u32 4294901760, %v328_v50  ;;  %v686_v51 = vld [vmem:[%s6398_s4 + $0x18] sm:$0xff]  ;;  %s4663_s30 = sld [smem:[#allocation5 + $0x102]] }
  0x16   :  { %192 = vmatpush.msrb.mxu2 %v153_v12  ;;  %157 = vmatpush.msra.mxu3 %v156_v31  ;;  %v392_v55 = vsub.f32 %v4128_v42, %v4148_v49  ;;  %v398_v59 = vsub.f32 %v4143_v47, %v4162_v53  ;;  %v4184_v60 = vand.u32 4294901760, %v325_v57  ;;  %v322_v0 = vsel %vm71_vm0, %v83_v58, 0  ;;  %s4666_s16 = sld [smem:[#allocation5 + $0x182]] }
  0x17   :  { %259 = vmatpush.msra.mxu0 %v166_v21  ;;  %130 = vmatmul.f32.vlgmr.msra.gmra.mxu2 %v129_v38  ;;  %6488 = vst [vmem:[#allocation14_spill] sm:$0xff] %v4159_v52  ;;  %v4191_v62 = vsub.f32 %v328_v50, %v4170_v56  ;;  %v4194_v63 = vand.u32 4294901760, %v4166_v54  ;;  %v4204_v2 = vand.u32 4294901760, %v322_v0  ;;  %v313_v17 = vsel %vm71_vm0, %v80_v14, 0  ;;  %v75_v14 = vld [vmem:[%s6395_s1 + $0x8] sm:$0xff]  ;;  %s4670_s17 = sld [smem:[#allocation5 + $0x202]] }
  0x18   :  { %195 = vmatpush.msrb.mxu2 %v159_v13  ;;  %163 = vmatpush.msra.mxu3 %v162_v36  ;;  %6489 = vst [vmem:[#allocation15_spill] sm:$0xff] %v4166_v54  ;;  %v4188_v61 = vand.u32 4294901760, %v392_v55  ;;  %v4264_v24 = vand.u32 4294901760, %v313_v17  ;;  %v307_v38 = vsel %vm71_vm0, %v78_v30, 0  ;;  %v304_v55 = vsel %vm71_vm0, %v77_v39, 0  ;;  %v683_v39 = vld [vmem:[%s6398_s4] sm:$0xff] }
  0x19   :  { %486 = vmatpush.xpose.msrb.mxu0 %v4111_v33  ;;  %541 = vmatpush.xpose.msrb.mxu1 %v4116_v35  ;;  %6491 = vst [vmem:[#allocation17_spill] sm:$0xff] %v4191_v62  ;;  %v404_v6 = vsub.f32 %v4166_v54, %v4194_v63  ;;  %v4217_v7 = vand.u32 4294901760, %v4191_v62  ;;  %v4231_v11 = vsub.f32 %v322_v0, %v4204_v2  ;;  %v4313_v46 = vand.u32 4294901760, %v307_v38  ;;  %v685_v0 = vld [vmem:[%s6398_s4 + $0x10] sm:$0xff]  ;;  %s4672_s5 = sld [smem:[#allocation5 + $0x1]] }
  0x1a   :  { %198 = vmatpush.msrb.mxu2 %v165_v15  ;;  %169 = vmatpush.msra.mxu3 %v168_v40  ;;  %6490 = vst [vmem:[#allocation16_spill] sm:$0xff] %v4188_v61  ;;  %v316_v15 = vsel %vm71_vm0, %v81_v8, 0  ;;  %v4292_v34 = vsub.f32 %v313_v17, %v4264_v24  ;;  %v4354_v17 = vand.u32 4294901760, %v685_v0  ;;  %s4676_s18 = sld [smem:[#allocation5 + $0x81]]  ;;  %vm1528_vm3 = vcmask 7168  }
  0x1b   :  { %171 = vmatmul.f32.vlgmr.msra.gmra.mxu3 %v4089_v16  ;;  %261 = vmatmul.f32.vlgmr.msra.gmra.mxu0 %v4089_v16  ;;  %v4228_v10 = vand.u32 4294901760, %v404_v6  ;;  %6495 = vst [vmem:[#allocation21_spill] sm:$0xff] %v4231_v11  ;;  %v410_v12 = vsub.f32 %v4191_v62, %v4217_v7  ;;  %v4254_v20 = vand.u32 4294901760, %v316_v15  ;;  %v4257_v21 = vand.u32 4294901760, %v4231_v11  ;;  %s4686_s21 = sld [smem:[#allocation5 + $0x181]] }
  0x1c   :  { %343 = vmatpush.xpose.msra.mxu2 %v4096_v22  ;;  %218 = vmatpush.msrb.mxu3 %v4064_v3  ;;  %v319_v3 = vsel %vm71_vm0, %v82_v1, 0  ;;  %6501 = vst [vmem:[#allocation27_spill] sm:$0xff] %v4292_v34  ;;  %v4316_v50 = vand.u32 4294901760, %v4292_v34  ;;  %v4337_v1 = vsub.f32 %v307_v38, %v4313_v46  ;;  %v4341_v6 = vand.u32 4294901760, %v304_v55  ;;  %s4697_s14 = sld [smem:[#allocation5 + $0x180]] }
  0x1d   :  { %489 = vmatpush.xpose.msrb.mxu0 %v4128_v42  ;;  %543 = vmatpush.xpose.msrb.mxu1 %v4130_v43  ;;  %6494 = vst [vmem:[#allocation20_spill] sm:$0xff] %v4228_v10  ;;  %v4250_v18 = vand.u32 4294901760, %v410_v12  ;;  %v4271_v26 = vsub.f32 %v316_v15, %v4254_v20  ;;  %v422_v27 = vsub.f32 %v4231_v11, %v4257_v21  ;;  %v290_v15 = vld [vmem:[%s6400_s6] sm:$0xf]  ;;  %v4398_v42 = vand.u32 4294901760, %v683_v39  ;;  %s4678_s6 = sld [smem:[#allocation5 + $0x101]] }
  0x1e   :  { %220 = vmatpush.msrb.mxu3 %v4066_v4  ;;  %286 = vmatmul.f32.vlgmr.msra.gmra.mxu1 %v4089_v16  ;;  %v4209_v4 = vand.u32 4294901760, %v398_v59  ;;  %v4329_v59 = vand.u32 4294901760, %v686_v51  ;;  %6503 = vst [vmem:[#allocation29_spill] sm:$0xff] %v4337_v1  ;;  %v4371_v30 = vsub.f32 %v304_v55, %v4341_v6  ;;  %v74_v55 = vld [vmem:[%s6395_s1] sm:$0xff]  ;;  %vm1905_vm4 = vcmask 15368  }
  0x1f   :  { %201 = vmatmul.f32.vlgmr.msrb.gmra.mxu2 %v4099_v23  ;;  %6497 = vst [vmem:[#allocation23_spill] sm:$0xff] %v4250_v18  ;;  %v79_v23 = vld [vmem:[%s6395_s1 + $0x28] sm:$0xff]  ;;  %v4285_v31 = vand.u32 4294901760, %v4271_v26  ;;  %v4289_v32 = vand.u32 4294901760, %v422_v27  ;;  %vm2350_vm5 = vcmask 23568   ;;  %vm2779_vm6 = vcmask 31768  }
  0x20   :  { %345 = vmatpush.xpose.msra.mxu2 %v4116_v35  ;;  %222 = vmatpush.msrb.mxu3 %v4068_v5  ;;  %6492 = vst [vmem:[#allocation18_spill] sm:$0xff] %v4209_v4  ;;  %v4212_v5 = vsub.f32 %v325_v57, %v4184_v60  ;;  %v310_v29 = vsel %vm71_vm0, %v79_v23, 0  ;;  %v76_v57 = vld [vmem:[%s6395_s1 + $0x10] sm:$0xff]  ;;  %v4361_v23 = vand.u32 4294901760, %v4337_v1  ;;  %v4364_v27 = vsub.f32 %v686_v51, %v4329_v59  ;;  %s4690_s1 = sld [smem:[#allocation5 + $0x201]] }
  0x21   :  { %492 = vmatpush.xpose.msrb.mxu0 %v4143_v47  ;;  %545 = vmatpush.xpose.msrb.mxu1 %v4145_v48  ;;  %6499 = vst [vmem:[#allocation25_spill] sm:$0xff] %v4271_v26  ;;  %v4296_v37 = vand.u32 4294901760, %v310_v29  ;;  %v434_v40 = vsub.f32 %v4271_v26, %v4285_v31  ;;  %v301_v12 = vsel %vm71_vm0, %v76_v57, 0  ;;  %v292_v51 = vsel %vm71_vm0, %v290_v15, 0 }
  0x22   :  { %224 = vmatpush.msrb.mxu3 %v4079_v9  ;;  %6493 = vst [vmem:[#allocation19_spill] sm:$0xff] %v4212_v5  ;;  %v4224_v9 = vand.u32 4294901760, %v319_v3  ;;  %v4236_v13 = vand.u32 4294901760, %v4212_v5  ;;  %v4375_v38 = vand.u32 4294901760, %v301_v12  ;;  %v452_v33 = vsub.f32 %v4337_v1, %v4361_v23 }
  0x23   :  { %228 = vmatmul.f32.vlgmr.msrb.gmra.mxu3 %v127_v28  ;;  %6500 = vst [vmem:[#allocation26_spill] sm:$0xff] %v4289_v32  ;;  %v4311_v45 = vsub.f32 %v310_v29, %v4296_v37  ;;  %v4327_v58 = vand.u32 4294901760, %v434_v40  ;;  %v298_v40 = vsel %vm71_vm0, %v75_v14, 0  ;;  %v4395_v14 = vand.u32 4294901760, %v4371_v30 }
  0x24   :  { %347 = vmatpush.xpose.msra.mxu2 %v4130_v43  ;;  %388 = vmatpush.xpose.msra.mxu3 %v4159_v52  ;;  %v4245_v16 = vsub.f32 %v319_v3, %v4224_v9  ;;  %v416_v19 = vsub.f32 %v4212_v5, %v4236_v13  ;;  %v440_v3 = vsub.f32 %v4292_v34, %v4316_v50  ;;  %vm1879_vm7 = vcmask 64512  }
  0x25   :  { %495 = vmatpush.xpose.msrb.mxu0 %v4166_v54  ;;  %547 = vmatpush.xpose.msrb.mxu1 %v4170_v56  ;;  %6502 = vst [vmem:[#allocation28_spill] sm:$0xff] %v4311_v45  ;;  %v4344_v8 = vand.u32 4294901760, %v4311_v45  ;;  %v4407_v54 = vand.u32 4294901760, %v298_v40  ;;  %vm2324_vm8 = vcmask 130112   ;;  %vm2753_vm9 = vcmask 195712  }
  0x26   :  { %6496 = vst [vmem:[#allocation22_spill] sm:$0xff] %v4245_v16  ;;  %v4268_v25 = vand.u32 4294901760, %v416_v19  ;;  %v4276_v28 = vand.u32 4294901760, %v4245_v16  ;;  %v684_v19 = vld [vmem:[%s6398_s4 + $0x8] sm:$0xff]  ;;  %v4368_v29 = vand.u32 4294901760, %v440_v3  ;;  %v4389_v3 = vsub.f32 %v685_v0, %v4354_v17  ;;  %s4730_s4 = sld [smem:[#allocation5 + $0x280]] }
  0x27   :  { %6504 = vst [vmem:[#allocation30_spill] sm:$0xff] %v4371_v30  ;;  %v4382_v57 = vand.u32 4294901760, %v684_v19  ;;  %v4405_v0 = vsub.f32 %v301_v12, %v4375_v38  ;;  %v458_v12 = vsub.f32 %v4371_v30, %v4395_v14  ;;  %vm3182_vm10 = vcmask 261312  }
  0x28   :  { %349 = vmatpush.xpose.msra.mxu2 %v4145_v48  ;;  %394 = vmatpush.xpose.msra.mxu3 %v4188_v61  ;;  %6498 = vst [vmem:[#allocation24_spill] sm:$0xff] %v4268_v25  ;;  %v428_v36 = vsub.f32 %v4245_v16, %v4276_v28 }
  0x29   :  { %498 = vmatpush.xpose.msrb.mxu0 %v4191_v62  ;;  %549 = vmatpush.xpose.msrb.mxu1 %v4184_v60  ;;  %6505 = vst [vmem:[#allocation31_spill] sm:$0xff] %v4405_v0  ;;  %v4409_v62 = vand.u32 4294901760, %v292_v51  ;;  %v4445_v61 = vand.u32 4294901760, %v458_v12 }
  0x2a   :  { %v4308_v44 = vand.u32 4294901760, %v428_v36  ;;  %v446_v36 = vsub.f32 %v4311_v45, %v4344_v8 }
  0x2b   :  { %v375_v52 = vsub.f32 %v292_v51, %v4409_v62 }
  0x2c   :  { %351 = vmatpush.xpose.msra.mxu2 %v4170_v56  ;;  %400 = vmatpush.xpose.msra.mxu3 %v4209_v4  ;;  %v4402_v47 = vand.u32 4294901760, %v446_v36  ;;  %v4418_v36 = vand.u32 4294901760, %v452_v33  ;;  %v4436_v33 = vand.u32 4294901760, %v4405_v0 }
  0x2d   :  { %501 = vmatpush.xpose.msrb.mxu0 %v4212_v5  ;;  %551 = vmatpush.xpose.msrb.mxu1 %v4204_v2  ;;  %v295_v5 = vsel %vm71_vm0, %v74_v55, 0  ;;  %v4426_v55 = vsub.f32 %v683_v39, %v4398_v42 }
  0x2e   :  { %v4433_v15 = vand.u32 4294901760, %v295_v5  ;;  %v464_v4 = vsub.f32 %v4405_v0, %v4436_v33 }
  0x30   :  { %353 = vmatpush.xpose.msra.mxu2 %v4184_v60  ;;  %406 = vmatpush.xpose.msra.mxu3 %v4228_v10  ;;  %v4451_v51 = vsub.f32 %v295_v5, %v4433_v15 }
  0x31   :  { %504 = vmatpush.xpose.msrb.mxu0 %v4231_v11  ;;  %553 = vmatpush.xpose.msrb.mxu1 %v4224_v9  ;;  %v4413_v11 = vsub.f32 %v684_v19, %v4382_v57  ;;  %v4431_v19 = vsub.f32 %v298_v40, %v4407_v54 }
  0x32   :  { %v4463_v5 = vand.u32 4294901760, %v4451_v51 }
  0x34   :  { %355 = vmatpush.xpose.msra.mxu2 %v4204_v2  ;;  %412 = vmatpush.xpose.msra.mxu3 %v4250_v18  ;;  %v465_v18 = vand.u32 4294901760, %v464_v4 }
  0x35   :  { %507 = vmatpush.xpose.msrb.mxu0 %v4245_v16  ;;  %555 = vmatpush.xpose.msrb.mxu1 %v4254_v20  ;;  %v6506_v16 = vand.u32 4294901760, %v4364_v27 }
  0x38   :  { %357 = vmatpush.xpose.msra.mxu2 %v4224_v9  ;;  %418 = vmatpush.xpose.msra.mxu3 %v4268_v25 }
  0x39   :  { %510 = vmatpush.xpose.msrb.mxu0 %v4271_v26  ;;  %557 = vmatpush.xpose.msrb.mxu1 %v4264_v24  ;;  %v851_v26 = vsub.f32 %v4364_v27, %v6506_v16  ;;  %v6507_v16 = vand.u32 4294901760, %v4389_v3 }
  0x3b   :  { %v857_v39 = vsub.f32 %v4389_v3, %v6507_v16  ;;  %v852_v40 = vand.u32 4294901760, %v851_v26  ;;  %v4456_v16 = vand.u32 4294901760, %v4431_v19 }
  0x3c   :  { %359 = vmatpush.xpose.msra.mxu2 %v4254_v20  ;;  %424 = vmatpush.xpose.msra.mxu3 %v4289_v32  ;;  %v476_v32 = vsub.f32 %v4451_v51, %v4463_v5 }
  0x3d   :  { %513 = vmatpush.xpose.msrb.mxu0 %v4292_v34  ;;  %559 = vmatpush.xpose.msrb.mxu1 %v4296_v37  ;;  %v862_v34 = vand.u32 4294901760, %v4413_v11  ;;  %v858_v10 = vand.u32 4294901760, %v857_v39 }
  0x3f   :  { %v863_v12 = vsub.f32 %v4413_v11, %v862_v34 }
  0x40   :  { %361 = vmatpush.xpose.msra.mxu2 %v4264_v24  ;;  %430 = vmatpush.xpose.msra.mxu3 %v4308_v44 }
  0x41   :  { %516 = vmatpush.xpose.msrb.mxu0 %v4311_v45  ;;  %561 = vmatpush.xpose.msrb.mxu1 %v4313_v46  ;;  %v868_v45 = vand.u32 4294901760, %v4426_v55  ;;  %v864_v39 = vand.u32 4294901760, %v863_v12  ;;  %v6518_v12 = vld [vmem:[#allocation28_spill] sm:$0xff] }
  0x44   :  { %363 = vmatpush.xpose.msra.mxu2 %v4296_v37  ;;  %436 = vmatpush.xpose.msra.mxu3 %v4327_v58 }
  0x45   :  { %519 = vmatpush.xpose.msrb.mxu0 %v4337_v1  ;;  %563 = vmatpush.xpose.msrb.mxu1 %v4341_v6  ;;  %v376_v1 = vand.u32 4294901760, %v375_v52 }
  0x47   :  { %v377_v26 = vsub.f32 %v375_v52, %v376_v1 }
  0x48   :  { %365 = vmatpush.xpose.msra.mxu2 %v4313_v46  ;;  %442 = vmatpush.xpose.msra.mxu3 %v4368_v29 }
  0x49   :  { %522 = vmatpush.xpose.msrb.mxu0 %v4371_v30  ;;  %565 = vmatpush.xpose.msrb.mxu1 %v4375_v38  ;;  %v869_v30 = vsub.f32 %v4426_v55, %v868_v45  ;;  %v378_v25 = vand.u32 4294901760, %v377_v26  ;;  %v6520_v26 = vld [vmem:[#allocation27_spill] sm:$0xff] }
  0x4c   :  { %367 = vmatpush.xpose.msra.mxu2 %v4341_v6  ;;  %448 = vmatpush.xpose.msra.mxu3 %v4402_v47 }
  0x4d   :  { %525 = vmatpush.xpose.msrb.mxu0 %v4405_v0  ;;  %567 = vmatpush.xpose.msrb.mxu1 %v4407_v54  ;;  %v470_v0 = vsub.f32 %v4431_v19, %v4456_v16 }
  0x4f   :  { %v471_v4 = vand.u32 4294901760, %v470_v0  ;;  %v6431_v0 = vmov 1  }
  0x50   :  { %369 = vmatpush.xpose.msra.mxu2 %v4375_v38  ;;  %454 = vmatpush.xpose.msra.mxu3 %v4418_v36 }
  0x51   :  { %528 = vmatpush.xpose.msrb.mxu0 %v4431_v19  ;;  %569 = vmatpush.xpose.msrb.mxu1 %v4433_v15 }
  0x54   :  { %371 = vmatpush.xpose.msra.mxu2 %v4407_v54  ;;  %460 = vmatpush.xpose.msra.mxu3 %v4445_v61 }
  0x55   :  { %853 = vmatpush.msra.mxu1 %v852_v40  ;;  %531 = vmatpush.xpose.msrb.mxu0 %v4451_v51  ;;  %v870_v40 = vand.u32 4294901760, %v869_v30 }
  0x56   :  { %573 = vmatmul.f32.vlgmr.msrb.gmra.mxu1 %v376_v1  ;;  %v477_v1 = vand.u32 4294901760, %v476_v32 }
  0x57   :  { %859 = vmatpush.msra.mxu1 %v858_v10  ;;  %v6509_v10 = vand.u32 4294901760, %v4389_v3 }
  0x58   :  { %373 = vmatpush.xpose.msra.mxu2 %v4433_v15  ;;  %534 = vmatmul.f32.vlgmr.msrb.gmra.mxu0 %v375_v52  ;;  %v6508_v52 = vand.u32 4294901760, %v4364_v27 }
  0x59   :  { %700 = vmatpush.msra.mxu0 %v4329_v59  ;;  %466 = vmatpush.xpose.msra.mxu3 %v465_v18 }
  0x5a   :  { %865 = vmatpush.msra.mxu1 %v864_v39 }
  0x5b   :  { %702 = vmatpush.msra.mxu0 %v4354_v17  ;;  %379 = vmatmul.f32.vlgmr.msra.gmra.mxu2 %v378_v25 }
  0x5c   :  { %580 = vmatpush.xpose.msrb.mxu2 %v4124_v41  ;;  %871 = vmatpush.msra.mxu1 %v870_v40  ;;  %v6522_v40 = vld [vmem:[#allocation25_spill] sm:$0xff] }
  0x5d   :  { %704 = vmatpush.msra.mxu0 %v4382_v57  ;;  %472 = vmatpush.xpose.msra.mxu3 %v471_v4 }
  0x5e   :  { %873 = vmatmul.f32.vlgmr.msra.gmra.mxu1 %v4433_v15 }
  0x5f   :  { %706 = vmatpush.msra.mxu0 %v4398_v42  ;;  %1265 = vmatpush.msrb.mxu1 %v4329_v59 }
  0x60   :  { %584 = vmatpush.xpose.msrb.mxu2 %v4148_v49  ;;  %712 = vmatmul.f32.vlgmr.msra.gmra.mxu0 %v477_v1 }
  0x61   :  { %1174 = vmatpush.msrb.mxu0 %v6508_v52  ;;  %478 = vmatpush.xpose.msra.mxu3 %v477_v1  ;;  %v6523_v1 = vld [vmem:[#allocation22_spill] sm:$0xff] }
  0x62   :  { %1267 = vmatpush.msrb.mxu1 %v4354_v17 }
  0x63   :  { %1178 = vmatpush.msrb.mxu0 %v6509_v10 }
  0x64   :  { %588 = vmatpush.xpose.msrb.mxu2 %v4162_v53  ;;  %480 = vmatmul.f32.vlgmr.msra.gmra.mxu3 %v4409_v62 }
  0x65   :  { %647 = vmatpush.xpose.msrb.mxu3 %v4096_v22  ;;  %1182 = vmatpush.msrb.mxu0 %v862_v34 }
  0x66   :  { %1269 = vmatpush.msrb.mxu1 %v4382_v57 }
  0x67   :  { %877 = vmatmul.f32.gmra.mxu1 %v4407_v54  ;;  %1186 = vmatpush.msrb.mxu0 %v868_v45 }
  0x68   :  { %592 = vmatpush.xpose.msrb.mxu2 %v4194_v63  ;;  %1271 = vmatpush.msrb.mxu1 %v4398_v42 }
  0x69   :  { %649 = vmatpush.xpose.msrb.mxu3 %v4116_v35  ;;  %720 = vmatmul.f32.gmra.mxu0 %v471_v4 }
  0x6c   :  { %596 = vmatpush.xpose.msrb.mxu2 %v4217_v7 }
  0x6d   :  { %651 = vmatpush.xpose.msrb.mxu3 %v4130_v43 }
  0x6f   :  { %881 = vmatmul.f32.gmra.mxu1 %v4375_v38 }
  0x70   :  { %600 = vmatpush.xpose.msrb.mxu2 %v4236_v13 }
  0x71   :  { %653 = vmatpush.xpose.msrb.mxu3 %v4145_v48  ;;  %728 = vmatmul.f32.gmra.mxu0 %v465_v18  ;;  %v3878_v18 = vld [vmem:[%s6401_s7] ss:$0 sm:$0xff]  ;;  %s4634_s7 = sld [smem:[#allocation5]] }
  0x74   :  { %604 = vmatpush.xpose.msrb.mxu2 %v4257_v21 }
  0x75   :  { %655 = vmatpush.xpose.msrb.mxu3 %v4170_v56 }
  0x77   :  { %885 = vmatmul.f32.gmra.mxu1 %v4341_v6 }
  0x78   :  { %608 = vmatpush.xpose.msrb.mxu2 %v4276_v28 }
  0x79   :  { %657 = vmatpush.xpose.msrb.mxu3 %v4184_v60  ;;  %736 = vmatmul.f32.gmra.mxu0 %v4445_v61  ;;  %v6432_v61 = vmov 0  }
  0x7a   :  { %3863 = vset.pattern.permute.xlu0 %v6432_v61 }
  0x7c   :  { %612 = vmatpush.xpose.msrb.mxu2 %v4285_v31 }
  0x7d   :  { %659 = vmatpush.xpose.msrb.mxu3 %v4204_v2 }
  0x7f   :  { %889 = vmatmul.f32.gmra.mxu1 %v4313_v46 }
  0x80   :  { %616 = vmatpush.xpose.msrb.mxu2 %v4316_v50 }
  0x81   :  { %661 = vmatpush.xpose.msrb.mxu3 %v4224_v9  ;;  %744 = vmatmul.f32.gmra.mxu0 %v4418_v36  ;;  %v6513_v36 = vld [vmem:[#allocation23_spill] sm:$0xff] }
  0x84   :  { %620 = vmatpush.xpose.msrb.mxu2 %v4344_v8 }
  0x85   :  { %663 = vmatpush.xpose.msrb.mxu3 %v4254_v20 }
  0x87   :  { %893 = vmatmul.f32.gmra.mxu1 %v4296_v37 }
  0x88   :  { %624 = vmatpush.xpose.msrb.mxu2 %v4361_v23 }
  0x89   :  { %665 = vmatpush.xpose.msrb.mxu3 %v4264_v24  ;;  %752 = vmatmul.f32.gmra.mxu0 %v4402_v47  ;;  %v6436_v47 = vmov 2  }
  0x8a   :  { %3865 = vset.pattern.permute.xlu1 %v6436_v47  ;;  %v1440_v47 = vstv %s4690_s1 }
  0x8c   :  { %628 = vmatpush.xpose.msrb.mxu2 %v4395_v14 }
  0x8d   :  { %667 = vmatpush.xpose.msrb.mxu3 %v4296_v37 }
  0x8f   :  { %897 = vmatmul.f32.gmra.mxu1 %v4264_v24 }
  0x90   :  { %632 = vmatpush.xpose.msrb.mxu2 %v4436_v33 }
  0x91   :  { %669 = vmatpush.xpose.msrb.mxu3 %v4313_v46  ;;  %760 = vmatmul.f32.gmra.mxu0 %v4368_v29  ;;  %v6434_v29 = vmov 3  }
  0x92   :  { %3866 = vset.pattern.permute.xlu2 %v6434_v29 }
  0x94   :  { %636 = vmatpush.xpose.msrb.mxu2 %v4456_v16 }
  0x95   :  { %671 = vmatpush.xpose.msrb.mxu3 %v4341_v6 }
  0x97   :  { %901 = vmatmul.f32.gmra.mxu1 %v4254_v20 }
  0x98   :  { %640 = vmatpush.xpose.msrb.mxu2 %v4463_v5 }
  0x99   :  { %673 = vmatpush.xpose.msrb.mxu3 %v4375_v38  ;;  %768 = vmatmul.f32.gmra.mxu0 %v4327_v58 }
  0x9a   :  { %v131_v25 = vpop.f32.mrf.mxu2 }
  0x9b   :  { %642 = vmatmul.f32.vlgmr.msrb.gmra.mxu2 %v4409_v62  ;;  %v132_v32 = vadd.f32 %v3878_v18, %v131_v25  ;;  %v6524_v25 = vld [vmem:[#allocation21_spill] sm:$0xff] }
  0x9c   :  { %951 = vmatpush.msra.mxu2 %v4364_v27  ;;  %v6510_v27 = vld [vmem:[#allocation26_spill] sm:$0xff] }
  0x9d   :  { %675 = vmatpush.xpose.msrb.mxu3 %v4407_v54 }
  0x9e   :  { %954 = vmatpush.msra.mxu2 %v4389_v3  ;;  %v172_v34 = vpop.f32.mrf.mxu3  ;;  %v6512_v3 = vld [vmem:[#allocation31_spill] sm:$0xff] }
  0x9f   :  { %905 = vmatmul.f32.gmra.mxu1 %v4224_v9  ;;  %v173_v45 = vadd.f32 %v172_v34, %v132_v32 }
  0xa0   :  { %957 = vmatpush.msra.mxu2 %v4413_v11 }
  0xa1   :  { %677 = vmatpush.xpose.msrb.mxu3 %v4433_v15  ;;  %776 = vmatmul.f32.gmra.mxu0 %v4308_v44 }
  0xa2   :  { %960 = vmatpush.msra.mxu2 %v4426_v55  ;;  %v202_v11 = vpop.f32.mrf.mxu2  ;;  %v6514_v55 = vld [vmem:[#allocation30_spill] sm:$0xff] }
  0xa3   :  { %963 = vmatmul.f32.vlgmr.msra.gmra.mxu2 %v4451_v51  ;;  %v203_v58 = vadd.f32 %v202_v11, %v173_v45  ;;  %v6516_v51 = vld [vmem:[#allocation29_spill] sm:$0xff]  ;;  %v6525_v45 = vld [vmem:[#allocation19_spill] sm:$0xff] }
  0xa4   :  { %679 = vmatmul.f32.vlgmr.msrb.gmra.mxu3 %v4409_v62 }
  0xa5   :  { %1055 = vmatpush.msra.mxu3 %v4329_v59  ;;  %v262_v59 = vpop.f32.mrf.mxu0 }
  0xa6   :  { %v229_v44 = vpop.f32.mrf.mxu3 }
  0xa7   :  { %1057 = vmatpush.msra.mxu3 %v4354_v17  ;;  %909 = vmatmul.f32.gmra.mxu1 %v4204_v2  ;;  %v230_v62 = vadd.f32 %v229_v44, %v203_v58  ;;  %v287_v17 = vpop.f32.mrf.mxu1 }
  0xa9   :  { %1059 = vmatpush.msra.mxu3 %v4382_v57  ;;  %784 = vmatmul.f32.gmra.mxu0 %v6510_v27  ;;  %v263_v30 = vadd.f32 %v262_v59, %v230_v62  ;;  %v1364_v62 = vstv %s4634_s7 }
  0xab   :  { %1061 = vmatpush.msra.mxu3 %v4398_v42  ;;  %968 = vmatmul.f32.gmra.mxu2 %v4431_v19  ;;  %v288_v57 = vadd.f32 %v287_v17, %v263_v30  ;;  %v6511_v42 = vld [vmem:[#allocation24_spill] sm:$0xff]  ;;  %v1382_v30 = vstv %s4639_s23  ;;  %s4711_s23 = sld [smem:[#allocation5 + $0x200]] }
  0xac   :  { %1065 = vmatmul.f32.vlgmr.msra.gmra.mxu3 %v4463_v5  ;;  %v6515_v19 = vld [vmem:[#allocation20_spill] sm:$0xff] }
  0xad   :  { %1339 = vperm.xlu0 %3863, %v288_v57   ;;  %1351 = vperm.xlu1 %3865, %v288_v57   ;;  %v3811_v17 = vld [vmem:[%s6397_s3 + $0x8] sm:$0xff] }
  0xae   :  { %1357 = vperm.xlu2 %3866, %v288_v57  }
  0xaf   :  { %913 = vmatmul.f32.gmra.mxu1 %v4184_v60 }
  0xb1   :  { %792 = vmatmul.f32.gmra.mxu0 %v6511_v42 }
  0xb3   :  { %973 = vmatmul.f32.gmra.mxu2 %v6512_v3 }
  0xb4   :  { %1071 = vmatmul.f32.gmra.mxu3 %v4456_v16  ;;  %v6517_v16 = vld [vmem:[#allocation18_spill] sm:$0xff] }
  0xb5   :  { %3864 = vset.pattern.permute.xlu0 %v6431_v0  ;;  %3871 = vset.pattern.permute.xlu1 %v6431_v0 }
  0xb6   :  { %1345 = vperm.xlu0 %3864, %v288_v57   ;;  %3867 = vset.pattern.permute.xlu2 %v6432_v61  ;;  %v1394_v57 = vstv %s4642_s24  ;;  %v1422_v61 = vstv %s4686_s21  ;;  %s3967_s24 = smov 8  }
  0xb7   :  { %917 = vmatmul.f32.gmra.mxu1 %v4170_v56 }
  0xb9   :  { %800 = vmatmul.f32.gmra.mxu0 %v6513_v36  ;;  %v3816_v36 = vld [vmem:[%s6397_s3 + $0x10] sm:$0xff] }
  0xbb   :  { %978 = vmatmul.f32.gmra.mxu2 %v6514_v55  ;;  %v1400_v55 = vstv %s4646_s25  ;;  %s4722_s25 = sld [smem:[#allocation5 + $0x282]] }
  0xbc   :  { %1077 = vmatmul.f32.gmra.mxu3 %v4436_v33  ;;  %v6519_v33 = vld [vmem:[#allocation16_spill] sm:$0xff] }
  0xbf   :  { %921 = vmatmul.f32.gmra.mxu1 %v4145_v48 }
  0xc1   :  { %808 = vmatmul.f32.gmra.mxu0 %v6515_v19  ;;  %v4709_v19 = vld [vmem:[%s6397_s3 + $0x18] sm:$0xff] }
  0xc3   :  { %983 = vmatmul.f32.gmra.mxu2 %v6516_v51  ;;  %v1412_v51 = vstv %s4648_s26  ;;  %s4738_s26 = sld [smem:[#allocation5 + $0x302]] }
  0xc4   :  { %1083 = vmatmul.f32.gmra.mxu3 %v4395_v14  ;;  %v6521_v14 = vld [vmem:[#allocation14_spill] sm:$0xff] }
  0xc7   :  { %925 = vmatmul.f32.gmra.mxu1 %v4130_v43 }
  0xc9   :  { %816 = vmatmul.f32.gmra.mxu0 %v6517_v16  ;;  %v1430_v16 = vstv %s4652_s27  ;;  %s4748_s27 = sld [smem:[#allocation5 + $0x283]] }
  0xcb   :  { %988 = vmatmul.f32.gmra.mxu2 %v6518_v12  ;;  %v4719_v12 = vld [vmem:[%s6397_s3 + $0x20] sm:$0xff] }
  0xcc   :  { %1089 = vmatmul.f32.gmra.mxu3 %v4361_v23 }
  0xcf   :  { %929 = vmatmul.f32.gmra.mxu1 %v4116_v35 }
  0xd1   :  { %824 = vmatmul.f32.gmra.mxu0 %v6519_v33  ;;  %v1448_v33 = vstv %s4654_s8  ;;  %s4754_s8 = sld [smem:[#allocation5 + $0x382]] }
  0xd3   :  { %993 = vmatmul.f32.gmra.mxu2 %v6520_v26  ;;  %v574_v5 = vpop.f32.mrf.mxu1 }
  0xd4   :  { %1095 = vmatmul.f32.gmra.mxu3 %v4344_v8 }
  0xd5   :  { %v535_v39 = vpop.f32.mrf.mxu0 }
  0xd7   :  { %933 = vmatmul.f32.gmra.mxu1 %v4096_v22 }
  0xd9   :  { %832 = vmatmul.f32.gmra.mxu0 %v6521_v14  ;;  %v1372_v14 = vstv %s4658_s28  ;;  %s4758_s28 = sld [smem:[#allocation5 + $0x300]] }
  0xdb   :  { %998 = vmatmul.f32.gmra.mxu2 %v6522_v40  ;;  %v4580_v4 = vpop.f32.mrf.mxu1 }
  0xdc   :  { %1101 = vmatmul.f32.gmra.mxu3 %v4316_v50 }
  0xdd   :  { %v4582_v23 = vpop.f32.mrf.mxu0 }
  0xde   :  { %v380_v10 = vpop.f32.mrf.mxu2 }
  0xdf   :  { %1273 = vmatmul.f32.vlgmr.msrb.gmra.mxu1 %v4433_v15 }
  0xe1   :  { %1188 = vmatmul.f32.vlgmr.msrb.gmra.mxu0 %v4433_v15 }
  0xe3   :  { %1003 = vmatmul.f32.gmra.mxu2 %v6523_v1 }
  0xe4   :  { %1107 = vmatmul.f32.gmra.mxu3 %v4285_v31  ;;  %v4588_v8 = vpop.f32.mrf.mxu1 }
  0xe6   :  { %v4590_v52 = vpop.f32.mrf.mxu0 }
  0xe7   :  { %1277 = vmatmul.f32.gmra.mxu1 %v4407_v54  ;;  %v481_v50 = vpop.f32.mrf.mxu3 }
  0xe8   :  { %v482_v18 = vadd.f32 %v481_v50, %v380_v10  ;;  %v1408_v10 = vstv %s4663_s30  ;;  %v1426_v50 = vstv %s4666_s16  ;;  %s4766_s30 = sld [smem:[#allocation5 + $0x303]] }
  0xe9   :  { %1192 = vmatmul.f32.gmra.mxu0 %v4407_v54  ;;  %s4769_s16 = sld [smem:[#allocation5 + $0x380]] }
  0xea   :  { %v536_v15 = vadd.f32 %v535_v39, %v482_v18  ;;  %v4726_v39 = vmul.f32 %v3811_v17, %v1394_v57  ;;  %v1368_v18 = vstv %s4672_s5  ;;  %v1409_v57 = vmul.f32 %v3816_v36, %v1408_v10 }
  0xeb   :  { %1008 = vmatmul.f32.gmra.mxu2 %v6524_v25 }
  0xec   :  { %1113 = vmatmul.f32.gmra.mxu3 %v4276_v28  ;;  %v4596_v32 = vpop.f32.mrf.mxu1  ;;  %v4598_v34 = vadd.f32 %v574_v5, %v536_v15  ;;  %v6526_v28 = vld [vmem:[#allocation17_spill] sm:$0xff]  ;;  %v4724_v5 = vmul.f32 %v3811_v17, %v1382_v30  ;;  %v4740_v15 = vmul.f32 %v3816_v36, %v1400_v55 }
  0xee   :  { %v4600_v31 = vpop.f32.mrf.mxu0 }
  0xef   :  { %1281 = vmatmul.f32.gmra.mxu1 %v4375_v38 }
  0xf1   :  { %1196 = vmatmul.f32.gmra.mxu0 %v4375_v38 }
  0xf3   :  { %1013 = vmatmul.f32.gmra.mxu2 %v6525_v45  ;;  %v1413_v45 = vmul.f32 %v3816_v36, %v1412_v51 }
  0xf4   :  { %1119 = vmatmul.f32.gmra.mxu3 %v4257_v21  ;;  %v4606_v54 = vpop.f32.mrf.mxu1  ;;  %v6527_v21 = vld [vmem:[#allocation15_spill] sm:$0xff] }
  0xf6   :  { %v4608_v11 = vpop.f32.mrf.mxu0 }
  0xf7   :  { %1285 = vmatmul.f32.gmra.mxu1 %v4341_v6 }
  0xf9   :  { %1200 = vmatmul.f32.gmra.mxu0 %v4341_v6 }
  0xfb   :  { %1018 = vmatmul.f32.gmra.mxu2 %v6526_v28  ;;  %v4743_v28 = vmul.f32 %v4709_v19, %v1430_v16 }
  0xfc   :  { %1125 = vmatmul.f32.gmra.mxu3 %v4236_v13  ;;  %v4614_v58 = vpop.f32.mrf.mxu1  ;;  %v6528_v13 = vld [vmem:[#allocation13_spill] sm:$0xff] }
  0xfe   :  { %v4616_v27 = vpop.f32.mrf.mxu0 }
  0xff   :  { %1289 = vmatmul.f32.gmra.mxu1 %v4313_v46 }
 0x101   :  { %1204 = vmatmul.f32.gmra.mxu0 %v4313_v46  ;;  %v1362_v46 = vld [vmem:[%s6397_s3] sm:$0xff] }
 0x102   :  { %v4700_v3 = vmul.f32 %v1364_v62, %v1362_v46  ;;  %v1404_v62 = vstv %s4678_s6  ;;  %v1369_v51 = vmul.f32 %v1368_v18, %v1362_v46  ;;  %s4793_s6 = sld [smem:[#allocation5 + $0x381]] }
 0x103   :  { %1023 = vmatmul.f32.gmra.mxu2 %v6527_v21  ;;  %v4746_v21 = vmul.f32 %v4719_v12, %v1448_v33  ;;  %v1405_v10 = vmul.f32 %v3816_v36, %v1404_v62 }
 0x104   :  { %1131 = vmatmul.f32.gmra.mxu3 %v4217_v7  ;;  %v4622_v38 = vpop.f32.mrf.mxu1  ;;  %v6529_v7 = vld [vmem:[#allocation12_spill] sm:$0xff] }
 0x106   :  { %v4624_v44 = vpop.f32.mrf.mxu0 }
 0x107   :  { %1293 = vmatmul.f32.gmra.mxu1 %v4296_v37 }
 0x109   :  { %1208 = vmatmul.f32.gmra.mxu0 %v4296_v37 }
 0x10b   :  { %1028 = vmatmul.f32.gmra.mxu2 %v6528_v13 }
 0x10c   :  { %1137 = vmatmul.f32.gmra.mxu3 %v4194_v63  ;;  %v4630_v6 = vpop.f32.mrf.mxu1 }
 0x10e   :  { %v4632_v59 = vpop.f32.mrf.mxu0 }
 0x10f   :  { %1297 = vmatmul.f32.gmra.mxu1 %v4264_v24 }
 0x111   :  { %1212 = vmatmul.f32.gmra.mxu0 %v4264_v24 }
 0x113   :  { %1033 = vmatmul.f32.gmra.mxu2 %v6529_v7  ;;  %v1373_v7 = vmul.f32 %v1372_v14, %v1362_v46 }
 0x114   :  { %1143 = vmatmul.f32.gmra.mxu3 %v4162_v53  ;;  %v4650_v63 = vpop.f32.mrf.mxu1  ;;  %v6530_v53 = vld [vmem:[#allocation11_spill] sm:$0xff] }
 0x116   :  { %v4656_v37 = vpop.f32.mrf.mxu0 }
 0x117   :  { %1301 = vmatmul.f32.gmra.mxu1 %v4254_v20 }
 0x119   :  { %1216 = vmatmul.f32.gmra.mxu0 %v4254_v20 }
 0x11b   :  { %1038 = vmatmul.f32.gmra.mxu2 %v6530_v53  ;;  %v1386_v53 = vstv %s4676_s18  ;;  %s4786_s18 = sld [smem:[#allocation5 + $0x301]] }
 0x11c   :  { %1149 = vmatmul.f32.gmra.mxu3 %v4148_v49  ;;  %v4674_v24 = vpop.f32.mrf.mxu1  ;;  %v1376_v49 = vstv %s4637_s22 }
 0x11e   :  { %v4680_v20 = vpop.f32.mrf.mxu0  ;;  %v643_v42 = vpop.f32.mrf.mxu2 }
 0x11f   :  { %1305 = vmatmul.f32.gmra.mxu1 %v4224_v9  ;;  %v1340_v26 = vpop.permute.xlu0 %1339  ;;  %v644_v40 = vadd.f32 %v643_v42, %v4598_v34  ;;  %v1427_v42 = vmul.f32 %v4709_v19, %v1426_v50  ;;  %v1352_v55 = vpop.permute.xlu1 %1351  ;;  %v1418_v50 = vstv %s4697_s14 }
 0x121   :  { %1220 = vmatmul.f32.gmra.mxu0 %v4224_v9  ;;  %v1377_v9 = vmul.f32 %v1376_v49, %v1362_v46  ;;  %v1358_v49 = vpop.permute.xlu2 %1357 }
 0x124   :  { %1155 = vmatmul.f32.gmra.mxu3 %v4124_v41  ;;  %v1390_v41 = vstv %s4661_s29  ;;  %v4733_v1 = vpop.f32.mrf.mxu1  ;;  %s4761_s29 = sld [smem:[#allocation5 + $0x281]] }
 0x125   :  { %6531 = vst [vmem:[#allocation26_spill] sm:$0xff] %v4733_v1  ;;  %v1391_v30 = vmul.f32 %v3811_v17, %v1390_v41  ;;  %v1387_v41 = vmul.f32 %v3811_v17, %v1386_v53  ;;  %v1462_v1 = vstv %s4722_s25  ;;  %s3969_s25 = smov 24  }
 0x126   :  { %v4750_v13 = vpop.f32.mrf.mxu0 }
 0x127   :  { %v680_v25 = vpop.f32.mrf.mxu3  ;;  %6532 = vst [vmem:[#allocation24_spill] sm:$0xff] %v4750_v13  ;;  %1309 = vmatmul.f32.gmra.mxu1 %v4204_v2  ;;  %v1454_v13 = vstv %s4730_s4 }
 0x128   :  { %v681_v34 = vadd.f32 %v680_v25, %v644_v40  ;;  %v1444_v40 = vstv %s4670_s17  ;;  %v1436_v25 = vstv %s4711_s23  ;;  %s4775_s17 = sld [smem:[#allocation5 + $0x383]]  ;;  %s3966_s23 = smov 104  }
 0x129   :  { %1224 = vmatmul.f32.gmra.mxu0 %v4204_v2  ;;  %v1445_v29 = vmul.f32 %v4719_v12, %v1444_v40  ;;  %v1480_v40 = vstv %s4738_s26 }
 0x12a   :  { %v1342_v16 = vperm.slane %v681_v34, 0  ;;  %v1360_v33 = vperm.slane %v681_v34, 3  ;;  %v1354_v14 = vperm.slane %v681_v34, 2  ;;  %v1348_v53 = vperm.slane %v681_v34, 1 }
 0x12c   :  { %v1343_v46 = vadd.f32 %v1342_v16, %v1340_v26  ;;  %v1361_v18 = vadd.f32 %v1360_v33, %v1358_v49  ;;  %v1355_v0 = vadd.f32 %v1354_v14, %v1352_v55  ;;  %v4778_v62 = vpop.f32.mrf.mxu1  ;;  %v3831_v26 = vld [vmem:[%s6397_s3 + $0x28] sm:$0xff]  ;;  %v1423_v49 = vmul.f32 %v4709_v19, %v1422_v61  ;;  %v1346_v55 = vpop.permute.xlu0 %1345 }
 0x12d   :  { %v1419_v16 = vmul.f32 %v4709_v19, %v1418_v50  ;;  %v1437_v33 = vmul.f32 %v4719_v12, %v1436_v25  ;;  %v1441_v61 = vmul.f32 %v4719_v12, %v1440_v47  ;;  %v1463_v19 = vmul.f32 %v3831_v26, %v1462_v1 }
 0x12e   :  { %v1366_v2 = vadd.f32 %v4700_v3, %v1343_v46  ;;  %v1378_v17 = vadd.f32 %v1377_v9, %v1361_v18  ;;  %v1374_v36 = vadd.f32 %v1373_v7, %v1355_v0  ;;  %v1466_v3 = vstv %s4748_s27  ;;  %v4791_v14 = vpop.f32.mrf.mxu0  ;;  %s6630_s27 = sld [smem:[#allocation32_spill]] }
 0x12f   :  { %v1349_v7 = vadd.f32 %v1348_v53, %v1346_v55  ;;  %1313 = vmatmul.f32.gmra.mxu1 %v4184_v60  ;;  %v1455_v50 = vmul.f32 %v3831_v26, %v1454_v13  ;;  %v1472_v47 = vstv %s4758_s28  ;;  %v1458_v12 = vstv %s4761_s29 }
 0x130   :  { %v1384_v0 = vadd.f32 %v4724_v5, %v1366_v2  ;;  %v1396_v9 = vadd.f32 %v4726_v39, %v1378_v17  ;;  %v1392_v34 = vadd.f32 %v1391_v30, %v1374_v36  ;;  %v3836_v30 = vld [vmem:[%s6397_s3 + $0x30] sm:$0xff]  ;;  %v1467_v18 = vmul.f32 %v3831_v26, %v1466_v3  ;;  %v3841_v17 = vld [vmem:[%s6397_s3 + $0x38] sm:$0xff] }
 0x131   :  { %v1370_v39 = vadd.f32 %v1369_v51, %v1349_v7  ;;  %1228 = vmatmul.f32.gmra.mxu0 %v4184_v60  ;;  %v1484_v1 = vstv %s4766_s30  ;;  %v1481_v51 = vmul.f32 %v3836_v30, %v1480_v40  ;;  %v1498_v36 = vstv %s4754_s8  ;;  %s3971_s8 = smov [#allocation8]  }
 0x132   :  { %v1414_v25 = vadd.f32 %v1413_v45, %v1396_v9  ;;  %v1410_v5 = vadd.f32 %v1409_v57, %v1392_v34  ;;  %v1402_v46 = vadd.f32 %v4740_v15, %v1384_v0  ;;  %v1490_v15 = vstv %s4769_s16  ;;  %s3796_s28 = sshll.u32 %s3971_s8, 4  ;;  %s6631_s16 = sld [smem:[#allocation33_spill]]  ;;  %s3797_s28 = int_to_ptr.vmem [resolvable:$true] %s3796_s28 }
 0x133   :  { %v1388_v57 = vadd.f32 %v1387_v41, %v1370_v39  ;;  %v1502_v53 = vstv %s4775_s17  ;;  %v1473_v9 = vmul.f32 %v3836_v30, %v1472_v47  ;;  %v1476_v41 = vstv %s4786_s18 }
 0x134   :  { %v1432_v13 = vadd.f32 %v4743_v28, %v1414_v25  ;;  %v1428_v45 = vadd.f32 %v1427_v42, %v1410_v5  ;;  %v1420_v2 = vadd.f32 %v1419_v16, %v1402_v46  ;;  %v4814_v0 = vpop.f32.mrf.mxu1  ;;  %v1459_v42 = vmul.f32 %v3831_v26, %v1458_v12 }
 0x135   :  { %v1406_v3 = vadd.f32 %v1405_v10, %v1388_v57  ;;  %v1485_v16 = vmul.f32 %v3836_v30, %v1484_v1  ;;  %v1499_v25 = vmul.f32 %v3841_v17, %v1498_v36  ;;  %v1494_v5 = vstv %s4793_s6  ;;  %v964_v1 = vpop.f32.mrf.mxu2  ;;  %v1066_v36 = vpop.f32.mrf.mxu3 }
 0x136   :  { %v1450_v60 = vadd.f32 %v4746_v21, %v1432_v13  ;;  %v1446_v55 = vadd.f32 %v1445_v29, %v1428_v45  ;;  %v1438_v28 = vadd.f32 %v1437_v33, %v1420_v2  ;;  %v4817_v7 = vpop.f32.mrf.mxu0  ;;  %v90_v29 = vld [vmem:[%s6396_s2] sm:$0xff]  ;;  %v1491_v10 = vmul.f32 %v3841_v17, %v1490_v15  ;;  %s3962_s2 = smov 120  }
 0x137   :  { %v1424_v34 = vadd.f32 %v1423_v49, %v1406_v3  ;;  %1317 = vmatmul.f32.gmra.mxu1 %v4170_v56  ;;  %v1503_v33 = vmul.f32 %v3841_v17, %v1502_v53  ;;  %v1477_v47 = vmul.f32 %v3836_v30, %v1476_v41  ;;  %v1495_v12 = vmul.f32 %v3841_v17, %v1494_v5 }
 0x138   :  { %v1464_v40 = vadd.f32 %v1463_v19, %v1446_v55  ;;  %v1456_v21 = vadd.f32 %v1455_v50, %v1438_v28  ;;  %v1468_v39 = vadd.f32 %v1467_v18, %v1450_v60  ;;  %vm91_vm1 = vcmp.gt.f32.partialorder %v90_v29, 0.0  ;;  %s3798_s17 = sshll.u32 %s6631_s16, 4  ;;  %s3799_s17 = int_to_ptr.hbm [resolvable:$true] %s3798_s17 }
 0x139   :  { %v1442_v46 = vadd.f32 %v1441_v61, %v1424_v34  ;;  %1232 = vmatmul.f32.gmra.mxu0 %v4170_v56  ;;  %v3961_v15 = vmov -1e+09  }
 0x13a   :  { %v1482_v26 = vadd.f32 %v1481_v51, %v1464_v40  ;;  %v1474_v49 = vadd.f32 %v1473_v9, %v1456_v21  ;;  %v1486_v19 = vadd.f32 %v1485_v16, %v1468_v39  ;;  %v92_v61 = vsel %vm91_vm1, 0.0, %v3961_v15 }
 0x13b   :  { %v1460_v45 = vadd.f32 %v1459_v42, %v1442_v46 }
 0x13c   :  { %v1500_v13 = vadd.f32 %v1499_v25, %v1482_v26  ;;  %v1492_v57 = vadd.f32 %v1491_v10, %v1474_v49  ;;  %v1504_v2 = vadd.f32 %v1503_v33, %v1486_v19  ;;  %v4825_v55 = vpop.f32.mrf.mxu1 }
 0x13d   :  { %v1478_v18 = vadd.f32 %v1477_v47, %v1460_v45  ;;  %v969_v34 = vpop.f32.mrf.mxu2  ;;  %v1072_v5 = vpop.f32.mrf.mxu3 }
 0x13e   :  { %v2327_v50 = vmul.f32 0.01, %v1500_v13  ;;  %v1505_v51 = vmul.f32 0.01, %v1492_v57  ;;  %v2756_v30 = vmul.f32 0.01, %v1504_v2  ;;  %v4827_v53 = vpop.f32.mrf.mxu0 }
 0x13f   :  { %v1496_v17 = vadd.f32 %v1495_v12, %v1478_v18  ;;  %1321 = vmatmul.f32.gmra.mxu1 %v4145_v48 }
 0x140   :  { %v2328_v56 = vmax.f32 %v1500_v13, %v2327_v50  ;;  %v1506_v60 = vmax.f32 %v1492_v57, %v1505_v51  ;;  %v2757_v3 = vmax.f32 %v1504_v2, %v2756_v30 }
 0x141   :  { %v1882_v9 = vmul.f32 0.01, %v1496_v17  ;;  %1236 = vmatmul.f32.gmra.mxu0 %v4145_v48 }
 0x142   :  { %v4830_v28 = vadd.f32 %v2328_v56, %v92_v61  ;;  %v4833_v42 = vadd.f32 %v1506_v60, %v92_v61  ;;  %v4835_v41 = vadd.f32 %v2757_v3, %v92_v61  ;;  %v887_v60 = vadd.f32 %v4606_v54, %v4608_v11 }
 0x143   :  { %v1883_v16 = vmax.f32 %v1496_v17, %v1882_v9 }
 0x144   :  { %6533 = vst [vmem:[#allocation31_spill] sm:$0xff] %v4835_v41  ;;  %2331 = vmax.xlane.f32.xlu0 %v4830_v28  ;;  %1509 = vmax.xlane.f32.xlu1 %v4833_v42  ;;  %v4841_v25 = vpop.f32.mrf.mxu1 }
 0x145   :  { %v4839_v40 = vadd.f32 %v1883_v16, %v92_v61  ;;  %v974_v21 = vpop.f32.mrf.mxu2  ;;  %v1078_v39 = vpop.f32.mrf.mxu3 }
 0x146   :  { %v4844_v29 = vpop.f32.mrf.mxu0 }
 0x147   :  { %1886 = vmax.xlane.f32.xlu2 %v4839_v40  ;;  %1325 = vmatmul.f32.gmra.mxu1 %v4130_v43 }
 0x149   :  { %1240 = vmatmul.f32.gmra.mxu0 %v4130_v43  ;;  %v875_v43 = vadd.f32 %v4580_v4, %v4582_v23 }
 0x14b   :  { %v965_v49 = vadd.f32 %v964_v1, %v875_v43 }
 0x14c   :  { %v4848_v48 = vpop.f32.mrf.mxu1 }
 0x14d   :  { %v979_v26 = vpop.f32.mrf.mxu2  ;;  %v1084_v47 = vpop.f32.mrf.mxu3  ;;  %v1067_v19 = vadd.f32 %v1066_v36, %v965_v49  ;;  %v883_v36 = vadd.f32 %v4596_v32, %v4600_v31 }
 0x14e   :  { %v4850_v10 = vpop.f32.mrf.mxu0  ;;  %v980_v9 = vadd.f32 %v979_v26, %v887_v60 }
 0x14f   :  { %1329 = vmatmul.f32.gmra.mxu1 %v4116_v35  ;;  %v975_v61 = vadd.f32 %v974_v21, %v883_v36 }
 0x150   :  { %v1085_v31 = vadd.f32 %v1084_v47, %v980_v9  ;;  %v895_v47 = vadd.f32 %v4622_v38, %v4624_v44 }
 0x151   :  { %1244 = vmatmul.f32.gmra.mxu0 %v4116_v35  ;;  %v879_v35 = vadd.f32 %v4588_v8, %v4590_v52  ;;  %v1079_v51 = vadd.f32 %v1078_v39, %v975_v61  ;;  %v891_v39 = vadd.f32 %v4614_v58, %v4616_v27 }
 0x153   :  { %v970_v50 = vadd.f32 %v969_v34, %v879_v35 }
 0x154   :  { %v4854_v33 = vpop.f32.mrf.mxu1 }
 0x155   :  { %v984_v2 = vpop.f32.mrf.mxu2  ;;  %v1090_v4 = vpop.f32.mrf.mxu3 }
 0x156   :  { %v4856_v46 = vpop.f32.mrf.mxu0  ;;  %v985_v49 = vadd.f32 %v984_v2, %v891_v39 }
 0x157   :  { %1333 = vmatmul.f32.gmra.mxu1 %v4096_v22 }
 0x158   :  { %v1091_v11 = vadd.f32 %v1090_v4, %v985_v49  ;;  %v899_v4 = vadd.f32 %v4630_v6, %v4632_v59  ;;  %v6536_v49 = vld [vmem:[#allocation24_spill] sm:$0xff] }
 0x159   :  { %1248 = vmatmul.f32.gmra.mxu0 %v4096_v22  ;;  %v1073_v22 = vadd.f32 %v1072_v5, %v970_v50 }
 0x15c   :  { %v1274_v12 = vpop.f32.mrf.mxu1 }
 0x15d   :  { %v989_v8 = vpop.f32.mrf.mxu2  ;;  %v1096_v30 = vpop.f32.mrf.mxu3 }
 0x15e   :  { %v1189_v13 = vpop.f32.mrf.mxu0  ;;  %v990_v35 = vadd.f32 %v989_v8, %v895_v47  ;;  %v3963_v8 = vmov -1e+30  }
 0x15f   :  { %v1190_v45 = vadd.f32 %v1189_v13, %v1067_v19  ;;  %69 = vst.msk [vmem:[#allocation2] sm:$0xff] %vm68_vm2, %v3963_v8 }
 0x160   :  { %v1097_v27 = vadd.f32 %v1096_v30, %v990_v35  ;;  %v3964_v35 = vmov 0.0  }
 0x161   :  { %v4864_v57 = vadd.f32 %v1274_v12, %v1190_v45  ;;  %70 = vst.msk [vmem:[#allocation3] sm:$0xff] %vm68_vm2, %v3964_v35 }
 0x162   :  { %72 = vst.msk [vmem:[#allocation4] sm:$0xff] %vm71_vm0, %v3964_v35 }
 0x163   :  { %1930 = vrot.lane.b32.xlu1 %v4864_v57, %s3962_s2 }
 0x164   :  { %v1278_v23 = vpop.f32.mrf.mxu1 }
 0x165   :  { %v994_v16 = vpop.f32.mrf.mxu2  ;;  %v1102_v21 = vpop.f32.mrf.mxu3 }
 0x166   :  { %v1193_v18 = vpop.f32.mrf.mxu0 }
 0x167   :  { %v1194_v1 = vadd.f32 %v1193_v18, %v1073_v22  ;;  %v995_v18 = vadd.f32 %v994_v16, %v899_v4 }
 0x169   :  { %v4870_v15 = vadd.f32 %v1278_v23, %v1194_v1  ;;  %v1103_v1 = vadd.f32 %v1102_v21, %v995_v18 }
 0x16b   :  { %6534 = vst [vmem:[#allocation23_spill] sm:$0xff] %v4870_v15  ;;  %1932 = vrot.lane.b32.xlu2 %v4870_v15, %s3962_s2 }
 0x16c   :  { %v1282_v52 = vpop.f32.mrf.mxu1 }
 0x16d   :  { %v999_v19 = vpop.f32.mrf.mxu2  ;;  %v1108_v45 = vpop.f32.mrf.mxu3 }
 0x16e   :  { %v1197_v56 = vpop.f32.mrf.mxu0 }
 0x16f   :  { %v1198_v17 = vadd.f32 %v1197_v56, %v1079_v51 }
 0x171   :  { %v4876_v3 = vadd.f32 %v1282_v52, %v1198_v17  ;;  %v903_v52 = vadd.f32 %v4650_v63, %v4656_v37 }
 0x173   :  { %1934 = vrot.lane.b32.xlu0 %v4876_v3, %s3962_s2  ;;  %v1000_v59 = vadd.f32 %v999_v19, %v903_v52 }
 0x174   :  { %v1286_v32 = vpop.f32.mrf.mxu1 }
 0x175   :  { %v1004_v22 = vpop.f32.mrf.mxu2  ;;  %v1114_v38 = vpop.f32.mrf.mxu3  ;;  %v1109_v56 = vadd.f32 %v1108_v45, %v1000_v59 }
 0x176   :  { %v1201_v34 = vpop.f32.mrf.mxu0 }
 0x177   :  { %v1202_v5 = vadd.f32 %v1201_v34, %v1085_v31 }
 0x179   :  { %v4882_v43 = vadd.f32 %v1286_v32, %v1202_v5  ;;  %v907_v32 = vadd.f32 %v4674_v24, %v4680_v20 }
 0x17b   :  { %1936 = vrot.lane.b32.xlu1 %v4882_v43, %s3962_s2  ;;  %v1005_v16 = vadd.f32 %v1004_v22, %v907_v32 }
 0x17c   :  { %v1290_v54 = vpop.f32.mrf.mxu1 }
 0x17d   :  { %v1009_v51 = vpop.f32.mrf.mxu2  ;;  %v1120_v17 = vpop.f32.mrf.mxu3  ;;  %v1115_v37 = vadd.f32 %v1114_v38, %v1005_v16 }
 0x17e   :  { %v1205_v26 = vpop.f32.mrf.mxu0 }
 0x17f   :  { %v1206_v12 = vadd.f32 %v1205_v26, %v1091_v11 }
 0x181   :  { %v4888_v13 = vadd.f32 %v1290_v54, %v1206_v12  ;;  %v6537_v54 = vld [vmem:[#allocation26_spill] sm:$0xff] }
 0x182   :  { %v911_v11 = vadd.f32 %v6537_v54, %v6536_v49  ;;  %v6541_v49 = vmov 2  }
 0x183   :  { %6535 = vst [vmem:[#allocation30_spill] sm:$0xff] %v4888_v13  ;;  %1938 = vrot.lane.b32.xlu2 %v4888_v13, %s3962_s2 }
 0x184   :  { %v1294_v58 = vpop.f32.mrf.mxu1  ;;  %v1010_v12 = vadd.f32 %v1009_v51, %v911_v11 }
 0x185   :  { %v1014_v34 = vpop.f32.mrf.mxu2  ;;  %v1126_v39 = vpop.f32.mrf.mxu3 }
 0x186   :  { %v1209_v2 = vpop.f32.mrf.mxu0  ;;  %v1121_v20 = vadd.f32 %v1120_v17, %v1010_v12 }
 0x187   :  { %v1210_v50 = vadd.f32 %v1209_v2, %v1097_v27 }
 0x189   :  { %v4894_v23 = vadd.f32 %v1294_v58, %v1210_v50  ;;  %v915_v58 = vadd.f32 %v4778_v62, %v4791_v14  ;;  %v4931_v14 = vld [vmem:[#allocation2] sm:$0xff] }
 0x18a   :  { %6538 = vst [vmem:[#allocation20_spill] sm:$0xff] %v4931_v14 }
 0x18b   :  { %1940 = vrot.lane.b32.xlu1 %v4894_v23, %s3962_s2  ;;  %v1015_v50 = vadd.f32 %v1014_v34, %v915_v58 }
 0x18c   :  { %v1298_v44 = vpop.f32.mrf.mxu1 }
 0x18d   :  { %v1019_v45 = vpop.f32.mrf.mxu2  ;;  %v1132_v2 = vpop.f32.mrf.mxu3  ;;  %v1127_v22 = vadd.f32 %v1126_v39, %v1015_v50 }
 0x18e   :  { %v1213_v36 = vpop.f32.mrf.mxu0 }
 0x18f   :  { %v1214_v61 = vadd.f32 %v1213_v36, %v1103_v1 }
 0x191   :  { %v4901_v6 = vadd.f32 %v1298_v44, %v1214_v61  ;;  %v919_v61 = vadd.f32 %v4814_v0, %v4817_v7 }
 0x193   :  { %1942 = vrot.lane.b32.xlu2 %v4901_v6, %s3962_s2  ;;  %v1020_v59 = vadd.f32 %v1019_v45, %v919_v61 }
 0x194   :  { %v1302_v30 = vpop.f32.mrf.mxu1 }
 0x195   :  { %v1024_v1 = vpop.f32.mrf.mxu2  ;;  %v1138_v62 = vpop.f32.mrf.mxu3 }
 0x196   :  { %v1217_v60 = vpop.f32.mrf.mxu0 }
 0x197   :  { %v1218_v9 = vadd.f32 %v1217_v60, %v1109_v56  ;;  %v1133_v56 = vadd.f32 %v1132_v2, %v1020_v59 }
 0x199   :  { %v4907_v31 = vadd.f32 %v1302_v30, %v1218_v9  ;;  %v923_v30 = vadd.f32 %v4825_v55, %v4827_v53 }
 0x19b   :  { %1944 = vrot.lane.b32.xlu1 %v4907_v31, %s3962_s2  ;;  %v1025_v0 = vadd.f32 %v1024_v1, %v923_v30 }
 0x19c   :  { %v1306_v63 = vpop.f32.mrf.mxu1 }
 0x19d   :  { %v1029_v60 = vpop.f32.mrf.mxu2  ;;  %v1139_v32 = vadd.f32 %v1138_v62, %v1025_v0  ;;  %v1144_v16 = vpop.f32.mrf.mxu3  ;;  %v935_v62 = vadd.f32 %v4854_v33, %v4856_v46 }
 0x19e   :  { %v1221_v5 = vpop.f32.mrf.mxu0 }
 0x19f   :  { %v1222_v21 = vadd.f32 %v1221_v5, %v1115_v37  ;;  %v927_v5 = vadd.f32 %v4841_v25, %v4844_v29 }
 0x1a1   :  { %v4913_v26 = vadd.f32 %v1306_v63, %v1222_v21  ;;  %v1030_v54 = vadd.f32 %v1029_v60, %v927_v5 }
 0x1a3   :  { %1946 = vrot.lane.b32.xlu1 %v4913_v26, %s3962_s2  ;;  %v1145_v29 = vadd.f32 %v1144_v16, %v1030_v54 }
 0x1a4   :  { %v1310_v24 = vpop.f32.mrf.mxu1 }
 0x1a5   :  { %v1034_v12 = vpop.f32.mrf.mxu2 }
 0x1a6   :  { %v1225_v19 = vpop.f32.mrf.mxu0 }
 0x1a7   :  { %v1226_v47 = vadd.f32 %v1225_v19, %v1121_v20  ;;  %v1150_v19 = vpop.f32.mrf.mxu3 }
 0x1a9   :  { %v4920_v27 = vadd.f32 %v1310_v24, %v1226_v47  ;;  %v931_v47 = vadd.f32 %v4848_v48, %v4850_v10  ;;  %v6544_v10 = vmov 3  }
 0x1ab   :  { %1948 = vrot.lane.b32.xlu0 %v4920_v27, %s3962_s2  ;;  %v1035_v2 = vadd.f32 %v1034_v12, %v931_v47 }
 0x1ac   :  { %v1314_v4 = vpop.f32.mrf.mxu1 }
 0x1ad   :  { %v1039_v1 = vpop.f32.mrf.mxu2 }
 0x1ae   :  { %v1229_v18 = vpop.f32.mrf.mxu0 }
 0x1af   :  { %v1230_v38 = vadd.f32 %v1229_v18, %v1127_v22  ;;  %v1156_v61 = vpop.f32.mrf.mxu3 }
 0x1b1   :  { %v4925_v44 = vadd.f32 %v1314_v4, %v1230_v38  ;;  %v1151_v4 = vadd.f32 %v1150_v19, %v1035_v2  ;;  %v5058_v19 = vand.u32 4294901760, %v4913_v26 }
 0x1b3   :  { %2379 = vrot.lane.b32.xlu0 %v4925_v44, %s3965_s15  ;;  %1950 = vrot.lane.b32.xlu1 %v4925_v44, %s3962_s2 }
 0x1b4   :  { %v1318_v36 = vpop.f32.mrf.mxu1 }
 0x1b6   :  { %v1233_v52 = vpop.f32.mrf.mxu0 }
 0x1b7   :  { %v1510_v8 = vpop.xlane.xlu1 %1509  ;;  %v1234_v7 = vadd.f32 %v1233_v52, %v1133_v56  ;;  %v2332_v35 = vpop.xlane.xlu0 %2331 }
 0x1b8   :  { %v4936_v51 = vmax.f32 %v4931_v14, %v1510_v8  ;;  %v1040_v8 = vadd.f32 %v1039_v1, %v935_v62 }
 0x1b9   :  { %v4945_v37 = vadd.f32 %v1318_v36, %v1234_v7 }
 0x1ba   :  { %6539 = vst [vmem:[#allocation29_spill] sm:$0xff] %v4936_v51  ;;  %1517 = vperm.xlu2 %3867, %v4936_v51   ;;  %v1887_v55 = vpop.xlane.xlu2 %1886  ;;  %v1157_v52 = vadd.f32 %v1156_v61, %v1040_v8  ;;  %v5088_v61 = vand.u32 4294901760, %v4901_v6 }
 0x1bb   :  { %1881 = vst.msk [vmem:[#allocation2] sm:$0xff] %vm1528_vm3, %v4936_v51  ;;  %v5025_v16 = vand.u32 4294901760, %v4945_v37 }
 0x1bc   :  { %v1322_v9 = vpop.f32.mrf.mxu1  ;;  %v5117_v17 = vsub.f32 %v4901_v6, %v5088_v61 }
 0x1bd   :  { %v5048_v12 = vsub.f32 %v4945_v37, %v5025_v16 }
 0x1be   :  { %v1237_v63 = vpop.f32.mrf.mxu0 }
 0x1bf   :  { %v1238_v34 = vadd.f32 %v1237_v63, %v1139_v32 }
 0x1c1   :  { %v4956_v39 = vadd.f32 %v1322_v9, %v1238_v34 }
 0x1c2   :  { %v4947_v53 = vld [vmem:[#allocation2] sm:$0xff]  ;;  %1952 = vrot.lane.b32.xlu2 %v4945_v37, %s3962_s2 }
 0x1c3   :  { %v4952_v21 = vmax.f32 %v4947_v53, %v1887_v55  ;;  %3868 = vset.pattern.permute.xlu2 %v6541_v49  ;;  %1954 = vrot.lane.b32.xlu1 %v4956_v39, %s3962_s2  ;;  %v5009_v60 = vand.u32 4294901760, %v4956_v39  ;;  %v5034_v55 = vand.u32 4294901760, %v4925_v44 }
 0x1c4   :  { %v1326_v25 = vpop.f32.mrf.mxu1 }
 0x1c5   :  { %6540 = vst [vmem:[#allocation18_spill] sm:$0xff] %v4952_v21  ;;  %1894 = vperm.xlu0 %3864, %v4952_v21   ;;  %v5038_v5 = vsub.f32 %v4956_v39, %v5009_v60 }
 0x1c6   :  { %2326 = vst.msk [vmem:[#allocation2] sm:$0xff] %vm1905_vm4, %v4952_v21  ;;  %v1241_v24 = vpop.f32.mrf.mxu0  ;;  %v5203_v21 = vpop.permute.xlu2 %1932 }
 0x1c7   :  { %v1242_v20 = vadd.f32 %v1241_v24, %v1145_v29  ;;  %v5044_v29 = vand.u32 4294901760, %v4920_v27  ;;  %v6440_v47 = vand.u32 4294901760, %v5038_v5 }
 0x1c9   :  { %v4970_v45 = vadd.f32 %v1326_v25, %v1242_v20  ;;  %v1599_v62 = vsub.f32 %v5038_v5, %v6440_v47  ;;  %v5136_v47 = vand.u32 4294901760, %v4876_v3 }
 0x1ca   :  { %2381 = vrot.lane.b32.xlu2 %v4945_v37, %s3965_s15 }
 0x1cb   :  { %1956 = vrot.lane.b32.xlu1 %v4970_v45, %s3962_s2  ;;  %v5000_v46 = vand.u32 4294901760, %v4970_v45 }
 0x1cc   :  { %v1330_v48 = vpop.f32.mrf.mxu1 }
 0x1cd   :  { %v4972_v58 = vld [vmem:[#allocation2] sm:$0xff]  ;;  %2383 = vrot.lane.b32.xlu0 %v4956_v39, %s3965_s15  ;;  %v5020_v32 = vsub.f32 %v4970_v45, %v5000_v46 }
 0x1ce   :  { %6542 = vst [vmem:[#allocation28_spill] sm:$0xff] %v4972_v58  ;;  %v4979_v50 = vmax.f32 %v4972_v58, %v2332_v35  ;;  %3877 = vset.pattern.permute.xlu0 %v6544_v10  ;;  %v1245_v18 = vpop.f32.mrf.mxu0  ;;  %v5063_v35 = vsub.f32 %v4925_v44, %v5034_v55 }
 0x1cf   :  { %v1246_v38 = vadd.f32 %v1245_v18, %v1151_v4  ;;  %v6441_v25 = vand.u32 4294901760, %v5020_v32  ;;  %v5076_v4 = vand.u32 4294901760, %v4907_v31  ;;  %v6439_v18 = vand.u32 4294901760, %v5048_v12 }
 0x1d0   :  { %6543 = vst [vmem:[#allocation16_spill] sm:$0xff] %v4979_v50  ;;  %v6438_v8 = vand.u32 4294901760, %v5063_v35 }
 0x1d1   :  { %2755 = vst.msk [vmem:[#allocation2] sm:$0xff] %vm2350_vm5, %v4979_v50  ;;  %v4988_v36 = vadd.f32 %v1330_v48, %v1246_v38  ;;  %v1593_v48 = vsub.f32 %v5020_v32, %v6441_v25  ;;  %v5081_v38 = vsub.f32 %v4920_v27, %v5044_v29  ;;  %v5160_v25 = vand.u32 4294901760, %v4864_v57 }
 0x1d3   :  { %2385 = vrot.lane.b32.xlu1 %v4970_v45, %s3965_s15  ;;  %2387 = vrot.lane.b32.xlu2 %v4988_v36, %s3965_s15  ;;  %v4997_v59 = vand.u32 4294901760, %v4988_v36 }
 0x1d4   :  { %v1334_v56 = vpop.f32.mrf.mxu1 }
 0x1d5   :  { %2375 = vrot.lane.b32.xlu0 %v4913_v26, %s3965_s15  ;;  %v5006_v7 = vsub.f32 %v4988_v36, %v4997_v59 }
 0x1d6   :  { %v1249_v30 = vpop.f32.mrf.mxu0 }
 0x1d7   :  { %v1250_v33 = vadd.f32 %v1249_v30, %v1157_v52  ;;  %v6443_v34 = vand.u32 4294901760, %v5006_v7  ;;  %v5093_v52 = vsub.f32 %v4913_v26, %v5058_v19  ;;  %v1594_v30 = vand.u32 4294901760, %v1593_v48 }
 0x1d8   :  { %v1600_v48 = vand.u32 4294901760, %v1599_v62 }
 0x1d9   :  { %v5002_v0 = vadd.f32 %v1334_v56, %v1250_v33  ;;  %v1587_v20 = vsub.f32 %v5006_v7, %v6443_v34  ;;  %v1605_v56 = vsub.f32 %v5048_v12, %v6439_v18  ;;  %v5100_v33 = vand.u32 4294901760, %v4894_v23 }
 0x1da   :  { %v6445_v22 = vand.u32 4294901760, %v5093_v52  ;;  %v5148_v34 = vand.u32 4294901760, %v4870_v15 }
 0x1db   :  { %1958 = vrot.lane.b32.xlu1 %v4988_v36, %s3962_s2  ;;  %v5016_v9 = vand.u32 4294901760, %v5002_v0  ;;  %2377 = vrot.lane.b32.xlu2 %v4920_v27, %s3965_s15  ;;  %v1588_v1 = vand.u32 4294901760, %v1587_v20  ;;  %v5105_v20 = vsub.f32 %v4907_v31, %v5076_v4  ;;  %v1606_v62 = vand.u32 4294901760, %v1605_v56 }
 0x1dc   :  { %v5132_v18 = vsub.f32 %v4894_v23, %v5100_v33  ;;  %v1623_v56 = vsub.f32 %v5093_v52, %v6445_v22 }
 0x1dd   :  { %2371 = vrot.lane.b32.xlu0 %v4901_v6, %s3965_s15  ;;  %1538 = vmatpush.msrb.mxu2 %v5016_v9  ;;  %v5030_v63 = vsub.f32 %v5002_v0, %v5016_v9 }
 0x1de   :  { %v1624_v49 = vand.u32 4294901760, %v1623_v56 }
 0x1df   :  { %1540 = vmatpush.msrb.mxu2 %v4997_v59  ;;  %v6444_v54 = vand.u32 4294901760, %v5030_v63 }
 0x1e1   :  { %1542 = vmatpush.msrb.mxu2 %v5000_v46  ;;  %v1581_v24 = vsub.f32 %v5030_v63, %v6444_v54 }
 0x1e3   :  { %1544 = vmatpush.msrb.mxu2 %v5009_v60  ;;  %v1582_v2 = vand.u32 4294901760, %v1581_v24  ;;  %1960 = vrot.lane.b32.xlu1 %v5002_v0, %s3962_s2  ;;  %v6442_v24 = vand.u32 4294901760, %v5081_v38 }
 0x1e4   :  { %2373 = vrot.lane.b32.xlu2 %v4907_v31, %s3965_s15 }
 0x1e5   :  { %2369 = vrot.lane.b32.xlu0 %v4894_v23, %s3965_s15  ;;  %1546 = vmatpush.msrb.mxu2 %v5025_v16  ;;  %v1617_v11 = vsub.f32 %v5081_v38, %v6442_v24 }
 0x1e6   :  { %1583 = vmatpush.msrb.mxu3 %v1582_v2  ;;  %v5109_v2 = vand.u32 4294901760, %v4888_v13 }
 0x1e7   :  { %1548 = vmatpush.msrb.mxu2 %v5034_v55  ;;  %v1618_v54 = vand.u32 4294901760, %v1617_v11 }
 0x1e8   :  { %1589 = vmatpush.msrb.mxu3 %v1588_v1  ;;  %v1611_v1 = vsub.f32 %v5063_v35, %v6438_v8  ;;  %v6447_v8 = vand.u32 4294901760, %v5105_v20  ;;  %v5144_v24 = vsub.f32 %v4888_v13, %v5109_v2 }
 0x1e9   :  { %1550 = vmatpush.msrb.mxu2 %v5044_v29 }
 0x1ea   :  { %1595 = vmatpush.msrb.mxu3 %v1594_v30  ;;  %v5123_v30 = vand.u32 4294901760, %v4882_v43  ;;  %v6546_v58 = vand.u32 4294901760, %v5144_v24 }
 0x1eb   :  { %1552 = vmatpush.msrb.mxu2 %v5058_v19 }
 0x1ec   :  { %1601 = vmatpush.msrb.mxu3 %v1600_v48  ;;  %2339 = vperm.xlu2 %3868, %v4979_v50   ;;  %v1612_v48 = vand.u32 4294901760, %v1611_v1  ;;  %v1629_v1 = vsub.f32 %v5105_v20, %v6447_v8  ;;  %v5156_v22 = vsub.f32 %v4882_v43, %v5123_v30  ;;  %v5168_v8 = vsub.f32 %v4876_v3, %v5136_v47 }
 0x1ed   :  { %2389 = vrot.lane.b32.xlu0 %v5002_v0, %s3965_s15  ;;  %1554 = vmatpush.msrb.mxu2 %v5076_v4  ;;  %v5181_v50 = vsub.f32 %v4870_v15, %v5148_v34 }
 0x1ee   :  { %1607 = vmatpush.msrb.mxu3 %v1606_v62  ;;  %v6450_v62 = vand.u32 4294901760, %v5132_v18  ;;  %v6455_v51 = vand.u32 4294901760, %v5168_v8  ;;  %v6547_v14 = vand.u32 4294901760, %v5156_v22 }
 0x1ef   :  { %1556 = vmatpush.msrb.mxu2 %v5088_v61 }
 0x1f0   :  { %1613 = vmatpush.msrb.mxu3 %v1612_v48  ;;  %v6545_v48 = vand.u32 4294901760, %v5117_v17  ;;  %v1641_v56 = vsub.f32 %v5132_v18, %v6450_v62  ;;  %v5191_v62 = vsub.f32 %v4864_v57, %v5160_v25 }
 0x1f1   :  { %1558 = vmatpush.msrb.mxu2 %v5100_v33 }
 0x1f2   :  { %1619 = vmatpush.msrb.mxu3 %v1618_v54  ;;  %v1635_v11 = vsub.f32 %v5117_v17, %v6545_v48  ;;  %v1630_v54 = vand.u32 4294901760, %v1629_v1  ;;  %v1647_v1 = vsub.f32 %v5144_v24, %v6546_v58  ;;  %v1642_v48 = vand.u32 4294901760, %v1641_v56 }
 0x1f3   :  { %1560 = vmatpush.msrb.mxu2 %v5109_v2 }
 0x1f4   :  { %1625 = vmatpush.msrb.mxu3 %v1624_v49  ;;  %2367 = vrot.lane.b32.xlu2 %v4888_v13, %s3965_s15  ;;  %v1636_v49 = vand.u32 4294901760, %v1635_v11  ;;  %v1664_v11 = vand.u32 4294901760, %v5181_v50  ;;  %v1648_v58 = vand.u32 4294901760, %v1647_v1  ;;  %v1670_v13 = vand.u32 4294901760, %v5191_v62 }
 0x1f5   :  { %2365 = vrot.lane.b32.xlu0 %v4882_v43, %s3965_s15  ;;  %1562 = vmatpush.msrb.mxu2 %v5123_v30 }
 0x1f6   :  { %3869 = vset.pattern.permute.xlu2 %v6544_v10  ;;  %1631 = vmatpush.msrb.mxu3 %v1630_v54  ;;  %v1653_v10 = vsub.f32 %v5156_v22, %v6547_v14  ;;  %v1659_v54 = vsub.f32 %v5168_v8, %v6455_v51  ;;  %v1665_v56 = vsub.f32 %v5181_v50, %v1664_v11  ;;  %v5221_v51 = vpop.permute.xlu2 %1938 }
 0x1f7   :  { %1564 = vmatpush.msrb.mxu2 %v5136_v47 }
 0x1f8   :  { %1637 = vmatpush.msrb.mxu3 %v1636_v49  ;;  %v1654_v14 = vand.u32 4294901760, %v1653_v10  ;;  %v1671_v49 = vsub.f32 %v5191_v62, %v1670_v13  ;;  %v1666_v1 = vand.u32 4294901760, %v1665_v56 }
 0x1f9   :  { %1566 = vmatpush.msrb.mxu2 %v5148_v34 }
 0x1fa   :  { %1643 = vmatpush.msrb.mxu3 %v1642_v48  ;;  %v1660_v48 = vand.u32 4294901760, %v1659_v54  ;;  %v1672_v10 = vand.u32 4294901760, %v1671_v49 }
 0x1fb   :  { %1568 = vmatpush.msrb.mxu2 %v5160_v25 }
 0x1fc   :  { %1649 = vmatpush.msrb.mxu3 %v1648_v58  ;;  %2363 = vrot.lane.b32.xlu2 %v4876_v3, %s3965_s15  ;;  %v5219_v58 = vpop.permute.xlu1 %1930 }
 0x1fd   :  { %2361 = vrot.lane.b32.xlu0 %v4870_v15, %s3965_s15  ;;  %1681 = vmatpush.msra.mxu2 %v5030_v63 }
 0x1fe   :  { %1655 = vmatpush.msrb.mxu3 %v1654_v14 }
 0x1ff   :  { %1684 = vmatpush.msra.mxu2 %v5006_v7 }
 0x200   :  { %1661 = vmatpush.msrb.mxu3 %v1660_v48 }
 0x201   :  { %1687 = vmatpush.msra.mxu2 %v5020_v32 }
 0x202   :  { %1667 = vmatpush.msrb.mxu3 %v1666_v1 }
 0x203   :  { %1690 = vmatpush.msra.mxu2 %v5038_v5 }
 0x204   :  { %1673 = vmatpush.msrb.mxu3 %v1672_v10  ;;  %2359 = vrot.lane.b32.xlu2 %v4864_v57, %s3965_s15  ;;  %v5234_v54 = vpop.permute.xlu1 %1936 }
 0x205   :  { %2816 = vrot.lane.b32.xlu0 %v4988_v36, %s3966_s23  ;;  %1693 = vmatpush.msra.mxu2 %v5048_v12  ;;  %v5236_v36 = vpop.permute.xlu2 %1942 }
 0x206   :  { %1734 = vmatpush.msra.mxu3 %v5016_v9 }
 0x207   :  { %1696 = vmatpush.msra.mxu2 %v5063_v35 }
 0x208   :  { %1736 = vmatpush.msra.mxu3 %v4997_v59 }
 0x209   :  { %1699 = vmatpush.msra.mxu2 %v5081_v38 }
 0x20a   :  { %1738 = vmatpush.msra.mxu3 %v5000_v46 }
 0x20b   :  { %1702 = vmatpush.msra.mxu2 %v5093_v52 }
 0x20c   :  { %1740 = vmatpush.msra.mxu3 %v5009_v60  ;;  %2814 = vrot.lane.b32.xlu2 %v4970_v45, %s3966_s23 }
 0x20d   :  { %2812 = vrot.lane.b32.xlu0 %v4956_v39, %s3966_s23  ;;  %1705 = vmatpush.msra.mxu2 %v5105_v20  ;;  %v5251_v39 = vpop.permute.xlu1 %1940 }
 0x20e   :  { %1742 = vmatpush.msra.mxu3 %v5025_v16  ;;  %2760 = vmax.xlane.f32.xlu1 %v4835_v41 }
 0x20f   :  { %1708 = vmatpush.msra.mxu2 %v5117_v17 }
 0x210   :  { %1744 = vmatpush.msra.mxu3 %v5034_v55 }
 0x211   :  { %1711 = vmatpush.msra.mxu2 %v5132_v18 }
 0x212   :  { %1746 = vmatpush.msra.mxu3 %v5044_v29 }
 0x213   :  { %1714 = vmatpush.msra.mxu2 %v5144_v24 }
 0x214   :  { %v1518_v14 = vpop.permute.xlu2 %1517  ;;  %1748 = vmatpush.msra.mxu3 %v5058_v19  ;;  %2810 = vrot.lane.b32.xlu2 %v4945_v37, %s3966_s23 }
 0x215   :  { %2808 = vrot.lane.b32.xlu0 %v4925_v44, %s3966_s23  ;;  %v1520_v45 = vsub.f32 %v4833_v42, %v1518_v14  ;;  %1717 = vmatpush.msra.mxu2 %v5156_v22  ;;  %v5266_v42 = vpop.permute.xlu0 %1934  ;;  %v5268_v44 = vpop.permute.xlu1 %1944 }
 0x216   :  { %1750 = vmatpush.msra.mxu3 %v5076_v4 }
 0x217   :  { %v1521_v56 = vmul.f32 1.442695, %v1520_v45  ;;  %1720 = vmatpush.msra.mxu2 %v5168_v8  ;;  %v6548_v45 = vand.u32 4294901760, %v5030_v63  ;;  %v6555_v63 = vand.u32 4294901760, %v5093_v52 }
 0x218   :  { %1752 = vmatpush.msra.mxu3 %v5088_v61 }
 0x219   :  { %3883 = vpow2.f32 %v1521_v56  ;;  %1723 = vmatpush.msra.mxu2 %v5181_v50 }
 0x21a   :  { %1754 = vmatpush.msra.mxu3 %v5100_v33 }
 0x21b   :  { %1726 = vmatpush.msra.mxu2 %v5191_v62 }
 0x21c   :  { %1756 = vmatpush.msra.mxu3 %v5109_v2  ;;  %2806 = vrot.lane.b32.xlu2 %v4920_v27, %s3966_s23 }
 0x21d   :  { %2802 = vrot.lane.b32.xlu0 %v4907_v31, %s3966_s23  ;;  %v5287_v49 = vpop.permute.xlu0 %1948  ;;  %v5292_v1 = vpop.permute.xlu1 %1946 }
 0x21e   :  { %1758 = vmatpush.msra.mxu3 %v5123_v30 }
 0x21f   :  { %v5276_v37 = vpop.eup %3883 }
 0x220   :  { %v5280_v48 = vand.u32 4294901760, %v5276_v37  ;;  %1760 = vmatpush.msra.mxu3 %v5136_v47 }
 0x222   :  { %1675 = vmatmul.f32.vlgmr.msrb.gmra.mxu3 %v5280_v48  ;;  %v1570_v31 = vsub.f32 %v5276_v37, %v5280_v48 }
 0x223   :  { %1762 = vmatpush.msra.mxu3 %v5148_v34 }
 0x224   :  { %v1571_v27 = vand.u32 4294901760, %v1570_v31 }
 0x225   :  { %2798 = vrot.lane.b32.xlu0 %v4894_v23, %s3966_s23  ;;  %1764 = vmatpush.msra.mxu3 %v5160_v25  ;;  %v6549_v23 = vand.u32 4294901760, %v5006_v7  ;;  %v6552_v7 = vand.u32 4294901760, %v5048_v12 }
 0x226   :  { %v1572_v10 = vsub.f32 %v1570_v31, %v1571_v27 }
 0x227   :  { %1842 = vmatpush.msrb.mxu3 %v5016_v9  ;;  %2818 = vrot.lane.b32.xlu1 %v5002_v0, %s3966_s23  ;;  %v5308_v9 = vpop.permute.xlu0 %2379  ;;  %v6550_v0 = vand.u32 4294901760, %v5020_v32 }
 0x228   :  { %v1573_v14 = vand.u32 4294901760, %v1572_v10 }
 0x229   :  { %1844 = vmatpush.msrb.mxu3 %v4997_v59  ;;  %v5306_v59 = vpop.permute.xlu1 %1950 }
 0x22a   :  { %1574 = vmatmul.f32.vlgmr.msrb.gmra.mxu2 %v1573_v14  ;;  %1768 = vmatmul.f32.vlgmr.msra.gmra.mxu3 %v1571_v27  ;;  %v5417_v27 = vand.u32 4294901760, %v5292_v1 }
 0x22b   :  { %1775 = vmatpush.msrb.mxu2 %v6548_v45  ;;  %1846 = vmatpush.msrb.mxu3 %v5000_v46  ;;  %v6551_v46 = vand.u32 4294901760, %v5038_v5 }
 0x22d   :  { %2792 = vrot.lane.b32.xlu0 %v4876_v3, %s3966_s23  ;;  %1779 = vmatpush.msrb.mxu2 %v6549_v23  ;;  %v1953_v3 = vpop.permute.xlu2 %1952 }
 0x22e   :  { %1848 = vmatpush.msrb.mxu3 %v5009_v60  ;;  %v6553_v60 = vand.u32 4294901760, %v5063_v35  ;;  %v6559_v35 = vand.u32 4294901760, %v5144_v24  ;;  %v5385_v52 = vand.u32 4294901760, %v1953_v3 }
 0x22f   :  { %1783 = vmatpush.msrb.mxu2 %v6550_v0  ;;  %2804 = vrot.lane.b32.xlu1 %v4913_v26, %s3966_s23  ;;  %v6554_v26 = vand.u32 4294901760, %v5081_v38 }
 0x230   :  { %1850 = vmatpush.msrb.mxu3 %v5025_v16  ;;  %v5407_v56 = vsub.f32 %v1953_v3, %v5385_v52 }
 0x231   :  { %1787 = vmatpush.msrb.mxu2 %v6551_v46  ;;  %v5436_v46 = vand.u32 4294901760, %v5268_v44 }
 0x232   :  { %1852 = vmatpush.msrb.mxu3 %v5034_v55  ;;  %1729 = vmatmul.f32.vlgmr.msra.gmra.mxu2 %v1570_v31  ;;  %v6556_v55 = vand.u32 4294901760, %v5105_v20 }
 0x233   :  { %1791 = vmatpush.msrb.mxu2 %v6552_v7 }
 0x234   :  { %1854 = vmatpush.msrb.mxu3 %v5044_v29  ;;  %v6557_v29 = vand.u32 4294901760, %v5117_v17  ;;  %v6560_v17 = vand.u32 4294901760, %v5156_v22 }
 0x235   :  { %1795 = vmatpush.msrb.mxu2 %v6553_v60  ;;  %v1955_v16 = vpop.permute.xlu1 %1954  ;;  %v5335_v5 = vpop.permute.xlu2 %2381 }
 0x236   :  { %1856 = vmatpush.msrb.mxu3 %v5058_v19  ;;  %v5378_v50 = vand.u32 4294901760, %v1955_v16 }
 0x237   :  { %v1895_v32 = vpop.permute.xlu0 %1894  ;;  %1799 = vmatpush.msrb.mxu2 %v6554_v26  ;;  %2800 = vrot.lane.b32.xlu1 %v4901_v6, %s3966_s23  ;;  %v6558_v6 = vand.u32 4294901760, %v5132_v18  ;;  %v6561_v18 = vand.u32 4294901760, %v5168_v8 }
 0x238   :  { %1858 = vmatpush.msrb.mxu3 %v5076_v4 }
 0x239   :  { %1803 = vmatpush.msrb.mxu2 %v6555_v63 }
 0x23a   :  { %1860 = vmatpush.msrb.mxu3 %v5088_v61 }
 0x23b   :  { %1807 = vmatpush.msrb.mxu2 %v6556_v55  ;;  %v5460_v55 = vand.u32 4294901760, %v5236_v36 }
 0x23c   :  { %1862 = vmatpush.msrb.mxu3 %v5100_v33 }
 0x23d   :  { %1811 = vmatpush.msrb.mxu2 %v6557_v29  ;;  %v1957_v12 = vpop.permute.xlu1 %1956  ;;  %v5353_v4 = vpop.permute.xlu2 %2387 }
 0x23e   :  { %1864 = vmatpush.msrb.mxu3 %v5109_v2  ;;  %v5376_v61 = vand.u32 4294901760, %v1957_v12  ;;  %v5395_v2 = vand.u32 4294901760, %v5306_v59 }
 0x23f   :  { %1815 = vmatpush.msrb.mxu2 %v6558_v6  ;;  %v5343_v19 = vpop.permute.xlu0 %2383  ;;  %2794 = vrot.lane.b32.xlu1 %v4882_v43, %s3966_s23 }
 0x240   :  { %1866 = vmatpush.msrb.mxu3 %v5123_v30  ;;  %v5388_v33 = vsub.f32 %v1957_v12, %v5376_v61  ;;  %v5398_v30 = vsub.f32 %v1955_v16, %v5378_v50  ;;  %v5424_v14 = vsub.f32 %v5306_v59, %v5395_v2  ;;  %v6460_v59 = vand.u32 4294901760, %v5407_v56 }
 0x241   :  { %1819 = vmatpush.msrb.mxu2 %v6559_v35 }
 0x242   :  { %1868 = vmatpush.msrb.mxu3 %v5136_v47  ;;  %v6461_v45 = vand.u32 4294901760, %v5398_v30  ;;  %v6458_v16 = vand.u32 4294901760, %v5424_v14  ;;  %v2046_v6 = vsub.f32 %v5407_v56, %v6460_v59 }
 0x243   :  { %1823 = vmatpush.msrb.mxu2 %v6560_v17  ;;  %v5476_v17 = vand.u32 4294901760, %v5251_v39 }
 0x244   :  { %1870 = vmatpush.msrb.mxu3 %v5148_v34  ;;  %v2040_v63 = vsub.f32 %v5398_v30, %v6461_v45 }
 0x245   :  { %1827 = vmatpush.msrb.mxu2 %v6561_v18  ;;  %v5359_v43 = vpop.permute.xlu1 %2385  ;;  %v5370_v34 = vpop.permute.xlu2 %2377 }
 0x246   :  { %1872 = vmatpush.msrb.mxu3 %v5160_v25 }
 0x247   :  { %1874 = vmatmul.f32.vlgmr.msrb.gmra.mxu3 %v5280_v48  ;;  %1831 = vmatpush.msrb.mxu2 %v1664_v11  ;;  %v5365_v22 = vpop.permute.xlu0 %2375 }
 0x248   :  { %2788 = vrot.lane.b32.xlu1 %v4864_v57, %s3966_s23 }
 0x249   :  { %1835 = vmatpush.msrb.mxu2 %v1670_v13  ;;  %v1897_v13 = vsub.f32 %v4839_v40, %v1895_v32  ;;  %v5452_v32 = vsub.f32 %v5292_v1, %v5417_v27  ;;  %v5466_v1 = vsub.f32 %v5268_v44, %v5436_v46 }
 0x24a   :  { %1837 = vmatmul.f32.vlgmr.msrb.gmra.mxu2 %v5280_v48  ;;  %v6462_v48 = vand.u32 4294901760, %v5388_v33 }
 0x24b   :  { %v1898_v11 = vmul.f32 1.442695, %v1897_v13  ;;  %v6456_v44 = vand.u32 4294901760, %v5452_v32  ;;  %v2052_v13 = vsub.f32 %v5424_v14, %v6458_v16 }
 0x24c   :  { %v2034_v60 = vsub.f32 %v5388_v33, %v6462_v48  ;;  %v5572_v48 = vand.u32 4294901760, %v5219_v58 }
 0x24d   :  { %v1959_v25 = vpop.permute.xlu1 %1958  ;;  %v5390_v24 = vpop.permute.xlu2 %2373  ;;  %3885 = vpow2.f32 %v1898_v11 }
 0x24e   :  { %v5372_v47 = vand.u32 4294901760, %v1959_v25  ;;  %v2035_v12 = vand.u32 4294901760, %v2034_v60  ;;  %6569 = vst [vmem:[#allocation15_spill] sm:$0xff] %v5572_v48  ;;  %v5614_v41 = vsub.f32 %v5219_v58, %v5572_v48 }
 0x24f   :  { %v5374_v38 = vpop.permute.xlu0 %2371 }
 0x250   :  { %v5381_v57 = vsub.f32 %v1959_v25, %v5372_v47  ;;  %v2041_v25 = vand.u32 4294901760, %v2040_v63 }
 0x252   :  { %v6463_v62 = vand.u32 4294901760, %v5381_v57 }
 0x253   :  { %v5473_v35 = vpop.eup %3885 }
 0x254   :  { %v2028_v0 = vsub.f32 %v5381_v57, %v6463_v62  ;;  %6562 = vst [vmem:[#allocation27_spill] sm:$0xff] %v5473_v35 }
 0x255   :  { %v1961_v8 = vpop.permute.xlu1 %1960  ;;  %v2340_v26 = vpop.permute.xlu2 %2339 }
 0x256   :  { %v5392_v20 = vand.u32 4294901760, %v1961_v8  ;;  %v2342_v18 = vsub.f32 %v4830_v28, %v2340_v26  ;;  %v5491_v28 = vsub.f32 %v5236_v36, %v5460_v55  ;;  %v5504_v36 = vand.u32 4294901760, %v5234_v54 }
 0x257   :  { %1525 = vadd.xlane.f32.xlu0 %v5276_v37  ;;  %v5410_v37 = vand.u32 4294901760, %v5287_v49  ;;  %v5419_v10 = vpop.permute.xlu0 %2369  ;;  %v5508_v26 = vsub.f32 %v5251_v39, %v5476_v17 }
 0x258   :  { %v5402_v40 = vsub.f32 %v1961_v8, %v5392_v20  ;;  %1979 = vmatpush.msra.mxu0 %v5392_v20  ;;  %2175 = vmatpush.msra.mxu3 %v5392_v20  ;;  %v5487_v8 = vand.u32 4294901760, %v5221_v51  ;;  %6564 = vst [vmem:[#allocation25_spill] sm:$0xff] %v5504_v36  ;;  %v6464_v39 = vand.u32 4294901760, %v5491_v28 }
 0x259   :  { %v5442_v3 = vsub.f32 %v5287_v49, %v5410_v37  ;;  %v2029_v49 = vand.u32 4294901760, %v2028_v0  ;;  %v5497_v0 = vand.u32 4294901760, %v5473_v35  ;;  %v6466_v16 = vand.u32 4294901760, %v5508_v26 }
 0x25a   :  { %v6465_v31 = vand.u32 4294901760, %v5402_v40  ;;  %1981 = vmatpush.msra.mxu0 %v5372_v47  ;;  %2122 = vmatpush.msra.mxu2 %v5402_v40  ;;  %6563 = vst [vmem:[#allocation14_spill] sm:$0xff] %v5487_v8 }
 0x25b   :  { %2177 = vmatpush.msra.mxu3 %v5372_v47  ;;  %v6457_v29 = vand.u32 4294901760, %v5442_v3 }
 0x25c   :  { %v2022_v23 = vsub.f32 %v5402_v40, %v6465_v31  ;;  %1983 = vmatpush.msra.mxu0 %v5376_v61  ;;  %2125 = vmatpush.msra.mxu2 %v5381_v57 }
 0x25d   :  { %2179 = vmatpush.msra.mxu3 %v5376_v61  ;;  %v2058_v60 = vsub.f32 %v5442_v3, %v6457_v29  ;;  %v5541_v29 = vsub.f32 %v5234_v54, %v5504_v36  ;;  %v5554_v54 = vand.u32 4294901760, %v5203_v21 }
 0x25e   :  { %v2023_v7 = vand.u32 4294901760, %v2022_v23  ;;  %1985 = vmatpush.msra.mxu0 %v5378_v50  ;;  %2128 = vmatpush.msra.mxu2 %v5388_v33  ;;  %v6459_v23 = vand.u32 4294901760, %v5466_v1 }
 0x25f   :  { %2181 = vmatpush.msra.mxu3 %v5378_v50  ;;  %v2390_v11 = vpop.permute.xlu0 %2389  ;;  %6567 = vst [vmem:[#allocation19_spill] sm:$0xff] %v5554_v54  ;;  %v5594_v31 = vsub.f32 %v5203_v21, %v5554_v54 }
 0x260   :  { %1987 = vmatpush.msra.mxu0 %v5385_v52  ;;  %2024 = vmatpush.msra.mxu1 %v2023_v7  ;;  %v2047_v7 = vand.u32 4294901760, %v2046_v6  ;;  %v5512_v63 = vand.u32 4294901760, %v2390_v11  ;;  %v2064_v6 = vsub.f32 %v5452_v32, %v6456_v44  ;;  %v5537_v44 = vand.u32 4294901760, %v5266_v42 }
 0x261   :  { %2131 = vmatpush.msra.mxu2 %v5398_v30  ;;  %2183 = vmatpush.msra.mxu3 %v5385_v52 }
 0x262   :  { %1989 = vmatpush.msra.mxu0 %v5395_v2  ;;  %2030 = vmatpush.msra.mxu1 %v2029_v49  ;;  %v2343_v49 = vmul.f32 1.442695, %v2342_v18  ;;  %v5526_v18 = vand.u32 4294901760, %v5353_v4  ;;  %6565 = vst [vmem:[#allocation22_spill] sm:$0xff] %v5537_v44  ;;  %v5576_v62 = vsub.f32 %v5266_v42, %v5537_v44 }
 0x263   :  { %2134 = vmatpush.msra.mxu2 %v5407_v56  ;;  %2185 = vmatpush.msra.mxu3 %v5395_v2 }
 0x264   :  { %1991 = vmatpush.msra.mxu0 %v5410_v37  ;;  %2036 = vmatpush.msra.mxu1 %v2035_v12  ;;  %v2053_v12 = vand.u32 4294901760, %v2052_v13  ;;  %v2059_v13 = vand.u32 4294901760, %v2058_v60  ;;  %3887 = vpow2.f32 %v2343_v49  ;;  %v5547_v60 = vand.u32 4294901760, %v5359_v43 }
 0x265   :  { %2137 = vmatpush.msra.mxu2 %v5424_v14  ;;  %2187 = vmatpush.msra.mxu3 %v5410_v37  ;;  %v2076_v49 = vsub.f32 %v5491_v28, %v6464_v39  ;;  %v5597_v39 = vand.u32 4294901760, %v5335_v5 }
 0x266   :  { %1993 = vmatpush.msra.mxu0 %v5417_v27  ;;  %2042 = vmatpush.msra.mxu1 %v2041_v25  ;;  %v5520_v25 = vsub.f32 %v5221_v51, %v5487_v8  ;;  %v5534_v51 = vsub.f32 %v5473_v35, %v5497_v0  ;;  %v5617_v35 = vpop.permute.xlu2 %2367 }
 0x267   :  { %2140 = vmatpush.msra.mxu2 %v5442_v3  ;;  %2189 = vmatpush.msra.mxu3 %v5417_v27 }
 0x268   :  { %1995 = vmatpush.msra.mxu0 %v5436_v46  ;;  %2048 = vmatpush.msra.mxu1 %v2047_v7  ;;  %v2070_v7 = vsub.f32 %v5466_v1, %v6459_v23  ;;  %v2065_v23 = vand.u32 4294901760, %v2064_v6  ;;  %v6469_v59 = vand.u32 4294901760, %v5520_v25  ;;  %v2012_v45 = vand.u32 4294901760, %v5534_v51 }
 0x269   :  { %2143 = vmatpush.msra.mxu2 %v5452_v32  ;;  %2191 = vmatpush.msra.mxu3 %v5436_v46 }
 0x26a   :  { %1997 = vmatpush.msra.mxu0 %v5460_v55  ;;  %2054 = vmatpush.msra.mxu1 %v2053_v12  ;;  %v5550_v12 = vsub.f32 %v2390_v11, %v5512_v63  ;;  %v5564_v11 = vsub.f32 %v5353_v4, %v5526_v18  ;;  %v2071_v6 = vand.u32 4294901760, %v2070_v7  ;;  %v2082_v4 = vsub.f32 %v5508_v26, %v6466_v16  ;;  %v5590_v42 = vpop.eup %3887 }
 0x26b   :  { %2146 = vmatpush.msra.mxu2 %v5466_v1  ;;  %2193 = vmatpush.msra.mxu3 %v5460_v55  ;;  %v2088_v16 = vsub.f32 %v5520_v25, %v6469_v59  ;;  %v2013_v21 = vsub.f32 %v5534_v51, %v2012_v45 }
 0x26c   :  { %6566 = vst [vmem:[#allocation21_spill] sm:$0xff] %v5550_v12  ;;  %1999 = vmatpush.msra.mxu0 %v5476_v17  ;;  %2060 = vmatpush.msra.mxu1 %v2059_v13  ;;  %v5567_v13 = vand.u32 4294901760, %v5343_v19  ;;  %v2083_v59 = vand.u32 4294901760, %v2082_v4  ;;  %v6571_v58 = vand.u32 4294901760, %v5550_v12  ;;  %v5635_v4 = vsub.f32 %v5335_v5, %v5597_v39  ;;  %v5664_v5 = vpop.permute.xlu0 %2365 }
 0x26d   :  { %2149 = vmatpush.msra.mxu2 %v5491_v28  ;;  %2195 = vmatpush.msra.mxu3 %v5476_v17  ;;  %6568 = vst [vmem:[#allocation17_spill] sm:$0xff] %v5564_v11 }
 0x26e   :  { %2001 = vmatpush.msra.mxu0 %v5487_v8  ;;  %2066 = vmatpush.msra.mxu1 %v2065_v23  ;;  %v5586_v23 = vsub.f32 %v5359_v43, %v5547_v60  ;;  %v2077_v43 = vand.u32 4294901760, %v2076_v49  ;;  %v5607_v7 = vsub.f32 %v5343_v19, %v5567_v13  ;;  %v6570_v19 = vand.u32 4294901760, %v5541_v29 }
 0x26f   :  { %2152 = vmatpush.msra.mxu2 %v5508_v26  ;;  %2197 = vmatpush.msra.mxu3 %v5487_v8  ;;  %v2451_v15 = vsub.f32 %v5550_v12, %v6571_v58  ;;  %v5639_v8 = vand.u32 4294901760, %v5370_v34  ;;  %v2014_v58 = vand.u32 4294901760, %v2013_v21  ;;  %v5657_v21 = vand.u32 4294901760, %v5365_v22 }
 0x270   :  { %2003 = vmatpush.msra.mxu0 %v5504_v36  ;;  %2072 = vmatpush.msra.mxu1 %v2071_v6  ;;  %v2094_v6 = vsub.f32 %v5541_v29, %v6570_v19  ;;  %v2089_v19 = vand.u32 4294901760, %v2088_v16  ;;  %v6573_v16 = vand.u32 4294901760, %v5576_v62 }
 0x271   :  { %2155 = vmatpush.msra.mxu2 %v5520_v25  ;;  %2199 = vmatpush.msra.mxu3 %v5504_v36  ;;  %v5624_v36 = vand.u32 4294901760, %v5308_v9 }
 0x272   :  { %2347 = vadd.xlane.f32.xlu1 %v5590_v42  ;;  %2005 = vmatpush.msra.mxu0 %v5537_v44  ;;  %v2100_v12 = vsub.f32 %v5576_v62, %v6573_v16  ;;  %v6575_v16 = vand.u32 4294901760, %v5402_v40  ;;  %v6578_v40 = vand.u32 4294901760, %v5381_v57  ;;  %v5696_v57 = vpop.permute.xlu2 %2363 }
 0x273   :  { %2078 = vmatpush.msra.mxu1 %v2077_v43  ;;  %2158 = vmatpush.msra.mxu2 %v5541_v29  ;;  %v6572_v43 = vand.u32 4294901760, %v5564_v11  ;;  %v5654_v49 = vsub.f32 %v5308_v9, %v5624_v36  ;;  %v6576_v9 = vand.u32 4294901760, %v5594_v31 }
 0x274   :  { %2201 = vmatpush.msra.mxu3 %v5537_v44  ;;  %2007 = vmatpush.msra.mxu0 %v5554_v54 }
 0x275   :  { %2084 = vmatpush.msra.mxu1 %v2083_v59  ;;  %2161 = vmatpush.msra.mxu2 %v5576_v62  ;;  %v2457_v44 = vsub.f32 %v5564_v11, %v6572_v43  ;;  %v2095_v59 = vand.u32 4294901760, %v2094_v6  ;;  %v6574_v43 = vand.u32 4294901760, %v5586_v23  ;;  %v2106_v11 = vsub.f32 %v5594_v31, %v6576_v9 }
 0x276   :  { %2203 = vmatpush.msra.mxu3 %v5554_v54  ;;  %2009 = vmatpush.msra.mxu0 %v5572_v48  ;;  %v2452_v54 = vand.u32 4294901760, %v2451_v15  ;;  %v5673_v15 = vsub.f32 %v5370_v34, %v5639_v8  ;;  %v6577_v6 = vand.u32 4294901760, %v5607_v7  ;;  %v6579_v9 = vand.u32 4294901760, %v5614_v41 }
 0x277   :  { %2090 = vmatpush.msra.mxu1 %v2089_v19  ;;  %2164 = vmatpush.msra.mxu2 %v5594_v31  ;;  %v2463_v19 = vsub.f32 %v5586_v23, %v6574_v43  ;;  %v2458_v43 = vand.u32 4294901760, %v2457_v44  ;;  %v5693_v44 = vand.u32 4294901760, %v5374_v38 }
 0x278   :  { %2205 = vmatpush.msra.mxu3 %v5572_v48  ;;  %2015 = vmatmul.f32.vlgmr.msra.gmra.mxu0 %v2014_v58  ;;  %v5676_v58 = vand.u32 4294901760, %v5390_v24  ;;  %v2112_v34 = vsub.f32 %v5614_v41, %v6579_v9  ;;  %v6481_v48 = vand.u32 4294901760, %v5654_v49 }
 0x279   :  { %2209 = vmatmul.f32.vlgmr.msra.gmra.mxu3 %v2012_v45  ;;  %2216 = vmatpush.msrb.mxu0 %v6575_v16  ;;  %v2469_v45 = vsub.f32 %v5607_v7, %v6577_v6  ;;  %v2101_v16 = vand.u32 4294901760, %v2100_v12  ;;  %v2107_v12 = vand.u32 4294901760, %v2106_v11  ;;  %v6480_v6 = vand.u32 4294901760, %v5673_v15 }
 0x27a   :  { %2453 = vmatpush.msrb.mxu3 %v2452_v54  ;;  %2096 = vmatpush.msra.mxu1 %v2095_v59  ;;  %v5690_v54 = vsub.f32 %v5365_v22, %v5657_v21  ;;  %v2464_v59 = vand.u32 4294901760, %v2463_v19  ;;  %v6580_v22 = vand.u32 4294901760, %v5388_v33  ;;  %v2113_v11 = vand.u32 4294901760, %v2112_v34 }
 0x27b   :  { %2167 = vmatpush.msra.mxu2 %v5614_v41  ;;  %2220 = vmatpush.msrb.mxu0 %v6578_v40  ;;  %v5702_v40 = vsub.f32 %v5390_v24, %v5676_v58  ;;  %v2470_v9 = vand.u32 4294901760, %v2469_v45  ;;  %v5716_v24 = vsub.f32 %v5374_v38, %v5693_v44  ;;  %v6582_v33 = vand.u32 4294901760, %v5398_v30 }
 0x27c   :  { %2170 = vmatmul.f32.vlgmr.msra.gmra.mxu2 %v5534_v51  ;;  %2459 = vmatpush.msrb.mxu3 %v2458_v43  ;;  %v6581_v51 = vand.u32 4294901760, %v5635_v4  ;;  %v5710_v43 = vand.u32 4294901760, %v5419_v10  ;;  %v5726_v34 = vand.u32 4294901760, %v5617_v35 }
 0x27d   :  { %2408 = vmatpush.msrb.mxu2 %v5512_v63  ;;  %2102 = vmatpush.msra.mxu1 %v2101_v16  ;;  %v2492_v16 = vand.u32 4294901760, %v5690_v54 }
 0x27e   :  { %2224 = vmatpush.msrb.mxu0 %v6580_v22  ;;  %2465 = vmatpush.msrb.mxu3 %v2464_v59  ;;  %v2475_v19 = vsub.f32 %v5635_v4, %v6581_v51  ;;  %v5720_v59 = vld [vmem:[#allocation2] sm:$0xff]  ;;  %v2481_v22 = vsub.f32 %v5654_v49, %v6481_v48  ;;  %v2487_v51 = vsub.f32 %v5673_v15, %v6480_v6  ;;  %v6587_v48 = vand.u32 4294901760, %v5424_v14 }
 0x27f   :  { %2410 = vmatpush.msrb.mxu2 %v5526_v18  ;;  %2108 = vmatpush.msra.mxu1 %v2107_v12  ;;  %6583 = vst [vmem:[#allocation13_spill] sm:$0xff] %v5720_v59  ;;  %v6584_v12 = vand.u32 4294901760, %v5407_v56  ;;  %v5763_v56 = vsub.f32 %v5617_v35, %v5726_v34  ;;  %v6589_v14 = vand.u32 4294901760, %v5702_v40  ;;  %v2360_v35 = vpop.permute.xlu2 %2359 }
 0x280   :  { %2228 = vmatpush.msrb.mxu0 %v6582_v33  ;;  %2471 = vmatpush.msrb.mxu3 %v2470_v9  ;;  %v2476_v9 = vand.u32 4294901760, %v2475_v19  ;;  %v5741_v33 = vsub.f32 %v5419_v10, %v5710_v43  ;;  %v6585_v19 = vld [vmem:[#allocation18_spill] sm:$0xff]  ;;  %v2504_v10 = vand.u32 4294901760, %v5716_v24  ;;  %v2482_v30 = vand.u32 4294901760, %v2481_v22 }
 0x281   :  { %v2761_v45 = vpop.xlane.xlu1 %2760  ;;  %2412 = vmatpush.msrb.mxu2 %v5547_v60  ;;  %2114 = vmatpush.msra.mxu1 %v2113_v11  ;;  %v5744_v11 = vand.u32 4294901760, %v5664_v5  ;;  %v2499_v22 = vsub.f32 %v5702_v40, %v6589_v14 }
 0x282   :  { %v5730_v38 = vmax.f32 %v5720_v59, %v2761_v45  ;;  %2116 = vmatmul.f32.vlgmr.msra.gmra.mxu1 %v5497_v0  ;;  %2232 = vmatpush.msrb.mxu0 %v6584_v12  ;;  %v2362_v45 = vpop.permute.xlu0 %2361  ;;  %v6586_v12 = vsub.f32 %v4947_v53, %v6585_v19  ;;  %v5766_v59 = vand.u32 4294901760, %v5696_v57  ;;  %v6588_v53 = vand.u32 4294901760, %v5442_v3 }
 0x283   :  { %2283 = vmatpush.msrb.mxu1 %v5392_v20  ;;  %2414 = vmatpush.msrb.mxu2 %v5567_v13  ;;  %v2493_v20 = vsub.f32 %v5690_v54, %v2492_v16  ;;  %v5778_v19 = vsub.f32 %v5664_v5, %v5744_v11  ;;  %v2505_v3 = vsub.f32 %v5716_v24, %v2504_v10 }
 0x284   :  { %3184 = vst.msk [vmem:[#allocation2] sm:$0xff] %vm2779_vm6, %v5730_v38  ;;  %v1890_v6 = vmul.f32 1.442695, %v6586_v12  ;;  %2477 = vmatpush.msrb.mxu3 %v2476_v9  ;;  %2236 = vmatpush.msrb.mxu0 %v6587_v48  ;;  %v2488_v48 = vand.u32 4294901760, %v2487_v51  ;;  %v2510_v9 = vand.u32 4294901760, %v5741_v33  ;;  %v5780_v12 = vand.u32 4294901760, %v2362_v45 }
 0x285   :  { %2285 = vmatpush.msrb.mxu1 %v5372_v47  ;;  %2416 = vmatpush.msrb.mxu2 %v5597_v39  ;;  %v2494_v47 = vand.u32 4294901760, %v2493_v20  ;;  %v5791_v5 = vsub.f32 %v5696_v57, %v5766_v59  ;;  %v6590_v51 = vand.u32 4294901760, %v5452_v32  ;;  %v2522_v20 = vand.u32 4294901760, %v5778_v19 }
 0x286   :  { %2483 = vmatpush.msrb.mxu3 %v2482_v30  ;;  %2240 = vmatpush.msrb.mxu0 %v6588_v53  ;;  %3889 = vpow2.f32 %v1890_v6  ;;  %v2516_v30 = vand.u32 4294901760, %v5763_v56  ;;  %v2500_v6 = vand.u32 4294901760, %v2499_v22  ;;  %v5801_v53 = vsub.f32 %v2362_v45, %v5780_v12 }
 0x287   :  { %2287 = vmatpush.msrb.mxu1 %v5376_v61  ;;  %2418 = vmatpush.msrb.mxu2 %v5624_v36  ;;  %v5796_v61 = vand.u32 4294901760, %v2360_v35  ;;  %v2506_v32 = vand.u32 4294901760, %v2505_v3  ;;  %v2528_v57 = vand.u32 4294901760, %v5791_v5  ;;  %v6592_v45 = vand.u32 4294901760, %v5491_v28 }
 0x288   :  { %2489 = vmatpush.msrb.mxu3 %v2488_v48  ;;  %2768 = vperm.xlu2 %3869, %v5730_v38   ;;  %v6591_v48 = vand.u32 4294901760, %v5466_v1  ;;  %v2534_v28 = vand.u32 4294901760, %v5801_v53 }
 0x289   :  { %2244 = vmatpush.msrb.mxu0 %v6590_v51  ;;  %2289 = vmatpush.msrb.mxu1 %v5378_v50  ;;  %v2511_v50 = vsub.f32 %v5741_v33, %v2510_v9  ;;  %v5822_v22 = vsub.f32 %v2360_v35, %v5796_v61  ;;  %v2523_v51 = vsub.f32 %v5778_v19, %v2522_v20  ;;  %v6594_v35 = vld [vmem:[#allocation30_spill] sm:$0xff] }
 0x28a   :  { %2420 = vmatpush.msrb.mxu2 %v5639_v8  ;;  %2495 = vmatpush.msrb.mxu3 %v2494_v47  ;;  %v5811_v14 = vpop.permute.xlu0 %2816  ;;  %v5826_v47 = vand.u32 4294901760, %v5590_v42 }
 0x28b   :  { %2248 = vmatpush.msrb.mxu0 %v6591_v48  ;;  %2291 = vmatpush.msrb.mxu1 %v5385_v52  ;;  %v2517_v52 = vsub.f32 %v5763_v56, %v2516_v30  ;;  %v2512_v3 = vand.u32 4294901760, %v2511_v50  ;;  %v2529_v48 = vsub.f32 %v5791_v5, %v2528_v57  ;;  %v6595_v50 = vand.u32 4294901760, %v5520_v25 }
 0x28c   :  { %2422 = vmatpush.msrb.mxu2 %v5657_v21  ;;  %2501 = vmatpush.msrb.mxu3 %v2500_v6  ;;  %v5819_v1 = vpop.eup %3889  ;;  %v6597_v25 = vand.u32 4294901760, %v5576_v62  ;;  %v6599_v62 = vld [vmem:[#allocation23_spill] sm:$0xff] }
 0x28d   :  { %2252 = vmatpush.msrb.mxu0 %v6592_v45  ;;  %2293 = vmatpush.msrb.mxu1 %v5395_v2  ;;  %v6593_v2 = vand.u32 4294901760, %v5508_v26  ;;  %v2518_v6 = vand.u32 4294901760, %v2517_v52  ;;  %v2540_v26 = vand.u32 4294901760, %v5822_v22  ;;  %v2535_v45 = vsub.f32 %v5801_v53, %v2534_v28 }
 0x28e   :  { %2424 = vmatpush.msrb.mxu2 %v5676_v58  ;;  %2507 = vmatpush.msrb.mxu3 %v2506_v32  ;;  %v2524_v32 = vand.u32 4294901760, %v2523_v51  ;;  %v6596_v52 = vand.u32 4294901760, %v5541_v29  ;;  %v6598_v29 = vand.u32 4294901760, %v5594_v31  ;;  %v6602_v31 = vld [vmem:[#allocation21_spill] sm:$0xff] }
 0x28f   :  { %1910 = vperm.xlu1 %3871, %v5819_v1   ;;  %2256 = vmatpush.msrb.mxu0 %v6593_v2 }
 0x290   :  { %2295 = vmatpush.msrb.mxu1 %v5410_v37  ;;  %2426 = vmatpush.msrb.mxu2 %v5693_v44  ;;  %v5848_v37 = vsub.f32 %v5590_v42, %v5826_v47  ;;  %v2541_v42 = vsub.f32 %v5822_v22, %v2540_v26 }
 0x291   :  { %2513 = vmatpush.msrb.mxu3 %v2512_v3  ;;  %2796 = vrot.lane.b32.xlu2 %v6594_v35, %s3966_s23 }
 0x292   :  { %2260 = vmatpush.msrb.mxu0 %v6595_v50  ;;  %2297 = vmatpush.msrb.mxu1 %v5417_v27  ;;  %v2530_v27 = vand.u32 4294901760, %v2529_v48  ;;  %v2441_v2 = vand.u32 4294901760, %v5848_v37  ;;  %v5865_v3 = vpop.permute.xlu0 %2812  ;;  %v2542_v51 = vand.u32 4294901760, %v2541_v42  ;;  %v6604_v48 = vld [vmem:[#allocation17_spill] sm:$0xff]  ;;  %v6610_v42 = vld [vmem:[#allocation15_spill] sm:$0xff] }
 0x293   :  { %2428 = vmatpush.msrb.mxu2 %v5710_v43  ;;  %2519 = vmatpush.msrb.mxu3 %v2518_v6  ;;  %v6601_v6 = vld [vmem:[#allocation14_spill] sm:$0xff] }
 0x294   :  { %2264 = vmatpush.msrb.mxu0 %v6596_v52  ;;  %2299 = vmatpush.msrb.mxu1 %v5436_v46  ;;  %v2536_v46 = vand.u32 4294901760, %v2535_v45  ;;  %v2442_v35 = vsub.f32 %v5848_v37, %v2441_v2  ;;  %v6606_v45 = vld [vmem:[#allocation22_spill] sm:$0xff]  ;;  %v6607_v52 = vand.u32 4294901760, %v6604_v48 }
 0x295   :  { %2430 = vmatpush.msrb.mxu2 %v5726_v34  ;;  %2525 = vmatpush.msrb.mxu3 %v2524_v32  ;;  %v6605_v32 = vand.u32 4294901760, %v6602_v31 }
 0x296   :  { %2268 = vmatpush.msrb.mxu0 %v6597_v25  ;;  %2301 = vmatpush.msrb.mxu1 %v5460_v55  ;;  %v6600_v55 = vand.u32 4294901760, %v5614_v41  ;;  %v6603_v41 = vld [vmem:[#allocation25_spill] sm:$0xff]  ;;  %v6609_v25 = vand.u32 4294901760, %v5586_v23 }
 0x297   :  { %2432 = vmatpush.msrb.mxu2 %v5744_v11  ;;  %2531 = vmatpush.msrb.mxu3 %v2530_v27  ;;  %v6608_v27 = vld [vmem:[#allocation19_spill] sm:$0xff] }
 0x298   :  { %2272 = vmatpush.msrb.mxu0 %v6598_v29  ;;  %2303 = vmatpush.msrb.mxu1 %v5476_v17  ;;  %v2443_v17 = vand.u32 4294901760, %v2442_v35 }
 0x299   :  { %2434 = vmatpush.msrb.mxu2 %v5766_v59  ;;  %2537 = vmatpush.msrb.mxu3 %v2536_v46  ;;  %v6611_v46 = vand.u32 4294901760, %v5607_v7 }
 0x29a   :  { %2790 = vrot.lane.b32.xlu2 %v6599_v62, %s3966_s23  ;;  %2276 = vmatpush.msrb.mxu0 %v6600_v55  ;;  %v5889_v50 = vpop.permute.xlu0 %2808 }
 0x29b   :  { %2305 = vmatpush.msrb.mxu1 %v6601_v6  ;;  %2436 = vmatpush.msrb.mxu2 %v5780_v12  ;;  %v6619_v6 = vld [vmem:[#allocation27_spill] sm:$0xff] }
 0x29c   :  { %2543 = vmatpush.msrb.mxu3 %v2542_v51  ;;  %2278 = vmatmul.f32.vlgmr.msrb.gmra.mxu0 %v5497_v0 }
 0x29d   :  { %2545 = vmatmul.f32.vlgmr.msrb.gmra.mxu3 %v5826_v47  ;;  %2551 = vmatpush.msra.mxu0 %v6602_v31 }
 0x29e   :  { %2712 = vmatpush.msra.mxu3 %v5512_v63  ;;  %2307 = vmatpush.msrb.mxu1 %v6603_v41 }
 0x29f   :  { %2438 = vmatpush.msrb.mxu2 %v5796_v61  ;;  %2554 = vmatpush.msra.mxu0 %v6604_v48 }
 0x2a0   :  { %2444 = vmatmul.f32.vlgmr.msrb.gmra.mxu2 %v2443_v17  ;;  %2714 = vmatpush.msra.mxu3 %v5526_v18 }
 0x2a1   :  { %2645 = vmatpush.msra.mxu2 %v6605_v32  ;;  %2309 = vmatpush.msrb.mxu1 %v6606_v45 }
 0x2a2   :  { %2557 = vmatpush.msra.mxu0 %v5586_v23  ;;  %2716 = vmatpush.msra.mxu3 %v5547_v60  ;;  %v6612_v23 = vand.u32 4294901760, %v5635_v4 }
 0x2a3   :  { %2649 = vmatpush.msra.mxu2 %v6607_v52  ;;  %2311 = vmatpush.msrb.mxu1 %v6608_v27 }
 0x2a4   :  { %2560 = vmatpush.msra.mxu0 %v5607_v7  ;;  %2718 = vmatpush.msra.mxu3 %v5567_v13  ;;  %v2815_v7 = vpop.permute.xlu2 %2814 }
 0x2a5   :  { %2653 = vmatpush.msra.mxu2 %v6609_v25  ;;  %2313 = vmatpush.msrb.mxu1 %v6610_v42 }
 0x2a6   :  { %2315 = vmatmul.f32.vlgmr.msrb.gmra.mxu1 %v5497_v0  ;;  %2563 = vmatpush.msra.mxu0 %v5635_v4  ;;  %v5916_v0 = vpop.permute.xlu0 %2802  ;;  %v6616_v4 = vld [vmem:[#allocation20_spill] sm:$0xff] }
 0x2a7   :  { %2604 = vmatpush.msra.mxu1 %v5512_v63  ;;  %2657 = vmatpush.msra.mxu2 %v6611_v46  ;;  %v6613_v63 = vand.u32 4294901760, %v5654_v49  ;;  %v6053_v51 = vand.u32 4294901760, %v5916_v0 }
 0x2a8   :  { %2720 = vmatpush.msra.mxu3 %v5597_v39  ;;  %2566 = vmatpush.msra.mxu0 %v5654_v49  ;;  %v5956_v49 = vand.u32 4294901760, %v5811_v14 }
 0x2a9   :  { %2606 = vmatpush.msra.mxu1 %v5526_v18  ;;  %2661 = vmatpush.msra.mxu2 %v6612_v23  ;;  %v6614_v18 = vand.u32 4294901760, %v5673_v15  ;;  %v6076_v32 = vsub.f32 %v5916_v0, %v6053_v51 }
 0x2aa   :  { %2722 = vmatpush.msra.mxu3 %v5624_v36  ;;  %2569 = vmatpush.msra.mxu0 %v5673_v15 }
 0x2ab   :  { %2608 = vmatpush.msra.mxu1 %v5547_v60  ;;  %2665 = vmatpush.msra.mxu2 %v6613_v63  ;;  %v6615_v60 = vand.u32 4294901760, %v5702_v40  ;;  %v2927_v23 = vand.u32 4294901760, %v6076_v32 }
 0x2ac   :  { %2724 = vmatpush.msra.mxu3 %v5639_v8  ;;  %2572 = vmatpush.msra.mxu0 %v5690_v54 }
 0x2ad   :  { %2610 = vmatpush.msra.mxu1 %v5567_v13  ;;  %2669 = vmatpush.msra.mxu2 %v6614_v18  ;;  %v2819_v13 = vpop.permute.xlu1 %2818 }
 0x2ae   :  { %2726 = vmatpush.msra.mxu3 %v5657_v21  ;;  %2575 = vmatpush.msra.mxu0 %v5702_v40 }
 0x2af   :  { %2612 = vmatpush.msra.mxu1 %v5597_v39  ;;  %2673 = vmatpush.msra.mxu2 %v2492_v16  ;;  %v5943_v39 = vpop.permute.xlu0 %2798 }
 0x2b0   :  { %2728 = vmatpush.msra.mxu3 %v5676_v58  ;;  %2578 = vmatpush.msra.mxu0 %v5716_v24  ;;  %v5983_v24 = vand.u32 4294901760, %v5865_v3  ;;  %v6079_v45 = vand.u32 4294901760, %v5943_v39 }
 0x2b1   :  { %2614 = vmatpush.msra.mxu1 %v5624_v36  ;;  %2677 = vmatpush.msra.mxu2 %v6615_v60  ;;  %v2811_v36 = vpop.permute.xlu2 %2810 }
 0x2b2   :  { %2730 = vmatpush.msra.mxu3 %v5693_v44  ;;  %2581 = vmatpush.msra.mxu0 %v5741_v33  ;;  %v5993_v33 = vand.u32 4294901760, %v2811_v36  ;;  %v6100_v0 = vsub.f32 %v5943_v39, %v6079_v45 }
 0x2b3   :  { %2616 = vmatpush.msra.mxu1 %v5639_v8  ;;  %2681 = vmatpush.msra.mxu2 %v2504_v10  ;;  %v5950_v8 = vand.u32 4294901760, %v2819_v13 }
 0x2b4   :  { %2732 = vmatpush.msra.mxu3 %v5710_v43  ;;  %2584 = vmatpush.msra.mxu0 %v5763_v56  ;;  %v2939_v39 = vand.u32 4294901760, %v6100_v0 }
 0x2b5   :  { %2618 = vmatpush.msra.mxu1 %v5657_v21  ;;  %2685 = vmatpush.msra.mxu2 %v2510_v9  ;;  %v6617_v21 = vld [vmem:[#allocation29_spill] sm:$0xff]  ;;  %v5971_v40 = vsub.f32 %v2819_v13, %v5950_v8  ;;  %v2805_v16 = vpop.permute.xlu1 %2804 }
 0x2b6   :  { %2734 = vmatpush.msra.mxu3 %v5726_v34  ;;  %2587 = vmatpush.msra.mxu0 %v5778_v19  ;;  %v6618_v15 = vsub.f32 %v6616_v4, %v6617_v21  ;;  %v6005_v19 = vsub.f32 %v5865_v3, %v5983_v24  ;;  %v2928_v4 = vsub.f32 %v6076_v32, %v2927_v23 }
 0x2b7   :  { %2620 = vmatpush.msra.mxu1 %v5676_v58  ;;  %2689 = vmatpush.msra.mxu2 %v2516_v30  ;;  %v5966_v58 = vand.u32 4294901760, %v2815_v7  ;;  %v2879_v56 = vand.u32 4294901760, %v5971_v40  ;;  %v5996_v10 = vpop.permute.xlu0 %2792  ;;  %v6008_v30 = vand.u32 4294901760, %v5889_v50 }
 0x2b8   :  { %2736 = vmatpush.msra.mxu3 %v5744_v11  ;;  %2590 = vmatpush.msra.mxu0 %v5791_v5  ;;  %v1513_v54 = vmul.f32 1.442695, %v6618_v15 }
 0x2b9   :  { %2622 = vmatpush.msra.mxu1 %v5693_v44  ;;  %2693 = vmatpush.msra.mxu2 %v2522_v20  ;;  %v5978_v44 = vsub.f32 %v5811_v14, %v5956_v49  ;;  %v2807_v9 = vpop.permute.xlu2 %2806  ;;  %v1523_v14 = vld [vmem:[#allocation3] sm:$0xff] }
 0x2ba   :  { %2738 = vmatpush.msra.mxu3 %v5766_v59  ;;  %2593 = vmatpush.msra.mxu0 %v5801_v53  ;;  %3891 = vpow2.f32 %v1513_v54  ;;  %v6021_v53 = vand.u32 4294901760, %v2807_v9  ;;  %v2929_v54 = vand.u32 4294901760, %v2928_v4 }
 0x2bb   :  { %2624 = vmatpush.msra.mxu1 %v5710_v43  ;;  %2697 = vmatpush.msra.mxu2 %v2528_v57  ;;  %v5989_v43 = vsub.f32 %v2815_v7, %v5966_v58  ;;  %v2880_v57 = vsub.f32 %v5971_v40, %v2879_v56 }
 0x2bc   :  { %2740 = vmatpush.msra.mxu3 %v5780_v12  ;;  %2596 = vmatpush.msra.mxu0 %v5822_v22  ;;  %v6050_v55 = vsub.f32 %v2807_v9, %v6021_v53  ;;  %v6620_v9 = vmov 0  }
 0x2bd   :  { %2626 = vmatpush.msra.mxu1 %v5726_v34  ;;  %2701 = vmatpush.msra.mxu2 %v2534_v28  ;;  %v2885_v34 = vand.u32 4294901760, %v5978_v44  ;;  %v2891_v5 = vand.u32 4294901760, %v5989_v43  ;;  %v6036_v28 = vsub.f32 %v5889_v50, %v6008_v30 }
 0x2be   :  { %2742 = vmatpush.msra.mxu3 %v5796_v61  ;;  %2599 = vmatmul.f32.vlgmr.msra.gmra.mxu0 %v5848_v37 }
 0x2bf   :  { %2744 = vmatmul.f32.vlgmr.msra.gmra.mxu3 %v5826_v47  ;;  %2837 = vmatpush.msrb.mxu0 %v5950_v8  ;;  %v2886_v22 = vsub.f32 %v5978_v44, %v2885_v34  ;;  %v2892_v3 = vsub.f32 %v5989_v43, %v2891_v5  ;;  %v2909_v17 = vand.u32 4294901760, %v6036_v28 }
 0x2c0   :  { %3033 = vmatpush.msrb.mxu3 %v5950_v8  ;;  %2628 = vmatpush.msra.mxu1 %v5744_v11  ;;  %v6016_v20 = vpop.eup %3891  ;;  %v6019_v11 = vsub.f32 %v2811_v36, %v5993_v33 }
 0x2c1   :  { %2705 = vmatpush.msra.mxu2 %v2540_v26  ;;  %2839 = vmatpush.msrb.mxu0 %v5956_v49  ;;  %v6038_v26 = vand.u32 4294901760, %v2805_v16  ;;  %v1524_v29 = vmul.f32 %v6016_v20, %v1523_v14  ;;  %v2887_v31 = vand.u32 4294901760, %v2886_v22  ;;  %v2893_v37 = vand.u32 4294901760, %v2892_v3  ;;  %v6621_v22 = vld [vmem:[#allocation28_spill] sm:$0xff] }
 0x2c2   :  { %2707 = vmatmul.f32.vlgmr.msra.gmra.mxu2 %v5826_v47  ;;  %3035 = vmatpush.msrb.mxu3 %v5956_v49  ;;  %v2897_v47 = vand.u32 4294901760, %v6005_v19  ;;  %v2903_v62 = vand.u32 4294901760, %v6019_v11  ;;  %v2910_v46 = vsub.f32 %v6036_v28, %v2909_v17 }
 0x2c3   :  { %2980 = vmatpush.msrb.mxu2 %v5971_v40  ;;  %2630 = vmatpush.msra.mxu1 %v5766_v59  ;;  %v2801_v59 = vpop.permute.xlu1 %2800  ;;  %v6062_v48 = vsub.f32 %v2805_v16, %v6038_v26  ;;  %v2940_v16 = vsub.f32 %v6100_v0, %v2939_v39  ;;  %v1575_v40 = vpop.f32.mrf.mxu2 }
 0x2c4   :  { %2841 = vmatpush.msrb.mxu0 %v5966_v58  ;;  %3037 = vmatpush.msrb.mxu3 %v5966_v58  ;;  %v6064_v50 = vand.u32 4294901760, %v2801_v59  ;;  %v2904_v52 = vsub.f32 %v6019_v11, %v2903_v62  ;;  %v2911_v60 = vand.u32 4294901760, %v2910_v46 }
 0x2c5   :  { %2983 = vmatpush.msrb.mxu2 %v5978_v44  ;;  %2632 = vmatpush.msra.mxu1 %v5780_v12  ;;  %v2881_v12 = vand.u32 4294901760, %v2880_v57  ;;  %v2921_v27 = vand.u32 4294901760, %v6062_v48  ;;  %v2941_v14 = vand.u32 4294901760, %v2940_v16  ;;  %v1676_v44 = vpop.f32.mrf.mxu3 }
 0x2c6   :  { %2843 = vmatpush.msrb.mxu0 %v5983_v24  ;;  %3039 = vmatpush.msrb.mxu3 %v5983_v24  ;;  %v6089_v25 = vsub.f32 %v2801_v59, %v6064_v50  ;;  %v2905_v63 = vand.u32 4294901760, %v2904_v52  ;;  %v6622_v59 = vld [vmem:[#allocation16_spill] sm:$0xff] }
 0x2c7   :  { %2986 = vmatpush.msrb.mxu2 %v5989_v43  ;;  %2634 = vmatpush.msra.mxu1 %v5796_v61  ;;  %v2898_v61 = vsub.f32 %v6005_v19, %v2897_v47  ;;  %v2922_v13 = vsub.f32 %v6062_v48, %v2921_v27  ;;  %v6623_v3 = vsub.f32 %v6621_v22, %v6622_v59 }
 0x2c8   :  { %1902 = vadd.xlane.f32.xlu2 %v6619_v6  ;;  %2638 = vmatmul.f32.vlgmr.msra.gmra.mxu1 %v2441_v2  ;;  %v2915_v2 = vand.u32 4294901760, %v6050_v55  ;;  %v2933_v18 = vand.u32 4294901760, %v6089_v25  ;;  %v6624_v6 = vld [vmem:[#allocation31_spill] sm:$0xff] }
 0x2c9   :  { %2845 = vmatpush.msrb.mxu0 %v5993_v33  ;;  %2882 = vmatpush.msrb.mxu1 %v2881_v12  ;;  %v2899_v42 = vand.u32 4294901760, %v2898_v61  ;;  %v2923_v21 = vand.u32 4294901760, %v2922_v13 }
 0x2ca   :  { %v1526_v35 = vpop.xlane.xlu0 %1525  ;;  %2989 = vmatpush.msrb.mxu2 %v6005_v19  ;;  %3041 = vmatpush.msrb.mxu3 %v5993_v33  ;;  %v2916_v7 = vsub.f32 %v6050_v55, %v2915_v2  ;;  %v2934_v15 = vsub.f32 %v6089_v25, %v2933_v18 }
 0x2cb   :  { %v1527_v41 = vadd.f32 %v1526_v35, %v1524_v29  ;;  %2847 = vmatpush.msrb.mxu0 %v6008_v30  ;;  %2888 = vmatpush.msrb.mxu1 %v2887_v31  ;;  %v2335_v29 = vmul.f32 1.442695, %v6623_v3  ;;  %v2795_v12 = vpop.permute.xlu1 %2794  ;;  %v1730_v43 = vpop.f32.mrf.mxu2 }
 0x2cc   :  { %2992 = vmatpush.msrb.mxu2 %v6019_v11  ;;  %3043 = vmatpush.msrb.mxu3 %v6008_v30  ;;  %v2917_v36 = vand.u32 4294901760, %v2916_v7  ;;  %v2935_v57 = vand.u32 4294901760, %v2934_v15  ;;  %v6139_v61 = vand.u32 4294901760, %v2795_v12 }
 0x2cd   :  { %1529 = vst.msk [vmem:[#allocation3] sm:$0xff] %vm1528_vm3, %v1527_v41  ;;  %2849 = vmatpush.msrb.mxu0 %v6021_v53  ;;  %2894 = vmatpush.msrb.mxu1 %v2893_v37  ;;  %3893 = vpow2.f32 %v2335_v29  ;;  %v6625_v37 = vld [vmem:[#allocation13_spill] sm:$0xff] }
 0x2ce   :  { %2995 = vmatpush.msrb.mxu2 %v6036_v28  ;;  %3045 = vmatpush.msrb.mxu3 %v6021_v53  ;;  %v6626_v52 = vsub.f32 %v6625_v37, %v5730_v38  ;;  %v6152_v7 = vsub.f32 %v2795_v12, %v6139_v61 }
 0x2cf   :  { %2851 = vmatpush.msrb.mxu0 %v6038_v26  ;;  %2900 = vmatpush.msrb.mxu1 %v2899_v42 }
 0x2d0   :  { %2998 = vmatpush.msrb.mxu2 %v6050_v55  ;;  %3047 = vmatpush.msrb.mxu3 %v6038_v26  ;;  %v2764_v42 = vmul.f32 1.442695, %v6626_v52 }
 0x2d1   :  { %2853 = vmatpush.msrb.mxu0 %v6053_v51  ;;  %2906 = vmatpush.msrb.mxu1 %v2905_v63  ;;  %v6627_v63 = vmov 2  }
 0x2d2   :  { %3001 = vmatpush.msrb.mxu2 %v6062_v48  ;;  %3049 = vmatpush.msrb.mxu3 %v6053_v51 }
 0x2d3   :  { %2855 = vmatpush.msrb.mxu0 %v6064_v50  ;;  %2912 = vmatpush.msrb.mxu1 %v2911_v60  ;;  %v6144_v46 = vpop.eup %3893  ;;  %v2789_v13 = vpop.permute.xlu1 %2788 }
 0x2d4   :  { %3004 = vmatpush.msrb.mxu2 %v6076_v32  ;;  %3051 = vmatpush.msrb.mxu3 %v6064_v50  ;;  %v6168_v16 = vand.u32 4294901760, %v2789_v13 }
 0x2d5   :  { %2857 = vmatpush.msrb.mxu0 %v6079_v45  ;;  %2918 = vmatpush.msrb.mxu1 %v2917_v36 }
 0x2d6   :  { %3007 = vmatpush.msrb.mxu2 %v6089_v25  ;;  %3053 = vmatpush.msrb.mxu3 %v6079_v45  ;;  %v6188_v12 = vsub.f32 %v2789_v13, %v6168_v16  ;;  %v1530_v25 = vld [vmem:[#allocation4] sm:$0xff] }
 0x2d7   :  { %2924 = vmatpush.msrb.mxu1 %v2923_v21  ;;  %3870 = vset.pattern.permute.xlu2 %v6620_v9  ;;  %v2951_v21 = vand.u32 4294901760, %v6152_v7 }
 0x2d8   :  { %3010 = vmatpush.msrb.mxu2 %v6100_v0  ;;  %3873 = vset.pattern.permute.xlu1 %v6620_v9 }
 0x2d9   :  { %2930 = vmatpush.msrb.mxu1 %v2929_v54  ;;  %v2952_v3 = vsub.f32 %v6152_v7, %v2951_v21 }
 0x2db   :  { %2936 = vmatpush.msrb.mxu1 %v2935_v57  ;;  %v2953_v37 = vand.u32 4294901760, %v2952_v3 }
 0x2dd   :  { %2942 = vmatpush.msrb.mxu1 %v2941_v14  ;;  %v6628_v14 = vmov 3  }
 0x2e0   :  { %1533 = vperm.xlu2 %3870, %v6016_v20   ;;  %v6149_v20 = vand.u32 4294901760, %v5996_v10 }
 0x2e2   :  { %v2769_v35 = vpop.permute.xlu2 %2768  ;;  %v6158_v4 = vsub.f32 %v5996_v10, %v6149_v20 }
 0x2e3   :  { %v2771_v31 = vsub.f32 %v6624_v6, %v2769_v35 }
 0x2e4   :  { %v2957_v22 = vand.u32 4294901760, %v6158_v4 }
 0x2e5   :  { %v2772_v41 = vmul.f32 1.442695, %v2771_v31 }
 0x2e7   :  { %3895 = vpow2.f32 %v2772_v41 }
 0x2e8   :  { %3872 = vset.pattern.permute.xlu2 %v6627_v63  ;;  %3897 = vpow2.f32 %v2764_v42  ;;  %v2958_v42 = vsub.f32 %v6158_v4, %v2957_v22 }
 0x2e9   :  { %2355 = vperm.xlu2 %3872, %v6144_v46  }
 0x2eb   :  { %v2797_v60 = vpop.permute.xlu2 %2796 }
 0x2ec   :  { %v6154_v36 = vand.u32 4294901760, %v2797_v60 }
 0x2ed   :  { %v3896_v38 = vpop.eup %3895 }
 0x2ee   :  { %v6161_v15 = vand.u32 4294901760, %v3896_v38  ;;  %v6164_v54 = vsub.f32 %v2797_v60, %v6154_v36  ;;  %2859 = vmatpush.msrb.mxu0 %v6154_v36  ;;  %3055 = vmatpush.msrb.mxu3 %v6154_v36  ;;  %v6174_v57 = vpop.eup %3897  ;;  %v2969_v60 = vand.u32 4294901760, %v6188_v12 }
 0x2ef   :  { %2776 = vadd.xlane.f32.xlu0 %v3896_v38 }
 0x2f0   :  { %v2945_v9 = vand.u32 4294901760, %v6164_v54  ;;  %2861 = vmatpush.msrb.mxu0 %v6139_v61  ;;  %3013 = vmatpush.msrb.mxu2 %v6164_v54  ;;  %v2869_v10 = vsub.f32 %v3896_v38, %v6161_v15  ;;  %v2970_v3 = vsub.f32 %v6188_v12, %v2969_v60 }
 0x2f1   :  { %3874 = vset.pattern.permute.xlu2 %v6628_v14  ;;  %3057 = vmatpush.msrb.mxu3 %v6139_v61  ;;  %v2959_v14 = vand.u32 4294901760, %v2958_v42 }
 0x2f2   :  { %2784 = vperm.xlu2 %3874, %v6174_v57   ;;  %2863 = vmatpush.msrb.mxu0 %v6149_v20  ;;  %v2946_v59 = vsub.f32 %v6164_v54, %v2945_v9  ;;  %v2870_v29 = vand.u32 4294901760, %v2869_v10 }
 0x2f3   :  { %3016 = vmatpush.msrb.mxu2 %v6152_v7  ;;  %3059 = vmatpush.msrb.mxu3 %v6149_v20 }
 0x2f4   :  { %v2791_v35 = vpop.permute.xlu2 %2790  ;;  %v2947_v6 = vand.u32 4294901760, %v2946_v59  ;;  %v2871_v31 = vsub.f32 %v2869_v10, %v2870_v29 }
 0x2f5   :  { %v6192_v41 = vand.u32 4294901760, %v2791_v35  ;;  %3019 = vmatpush.msrb.mxu2 %v6158_v4  ;;  %v2348_v4 = vpop.xlane.xlu1 %2347 }
 0x2f6   :  { %2948 = vmatpush.msrb.mxu1 %v2947_v6  ;;  %v2872_v52 = vand.u32 4294901760, %v2871_v31 }
 0x2f7   :  { %v2962_v13 = vsub.f32 %v2791_v35, %v6192_v41  ;;  %2865 = vmatpush.msrb.mxu0 %v6192_v41  ;;  %3061 = vmatpush.msrb.mxu3 %v6192_v41 }
 0x2f8   :  { %2954 = vmatpush.msrb.mxu1 %v2953_v37 }
 0x2f9   :  { %v2963_v38 = vand.u32 4294901760, %v2962_v13  ;;  %2867 = vmatpush.msrb.mxu0 %v6168_v16  ;;  %3022 = vmatpush.msrb.mxu2 %v2962_v13 }
 0x2fa   :  { %3063 = vmatpush.msrb.mxu3 %v6168_v16  ;;  %2873 = vmatmul.f32.vlgmr.msrb.gmra.mxu0 %v2872_v52 }
 0x2fb   :  { %3067 = vmatmul.f32.vlgmr.msrb.gmra.mxu3 %v2870_v29  ;;  %3074 = vmatpush.msra.mxu0 %v2879_v56  ;;  %v2964_v59 = vsub.f32 %v2962_v13, %v2963_v38  ;;  %v2971_v29 = vand.u32 4294901760, %v2970_v3 }
 0x2fc   :  { %2960 = vmatpush.msrb.mxu1 %v2959_v14  ;;  %3025 = vmatpush.msrb.mxu2 %v6188_v12 }
 0x2fd   :  { %3028 = vmatmul.f32.vlgmr.msrb.gmra.mxu2 %v2869_v10  ;;  %3078 = vmatpush.msra.mxu0 %v2885_v34  ;;  %v2965_v35 = vand.u32 4294901760, %v2964_v59 }
 0x2fe   :  { %3876 = vset.pattern.permute.xlu2 %v6627_v63 }
 0x2ff   :  { %3082 = vmatpush.msra.mxu0 %v2891_v5  ;;  %2966 = vmatpush.msrb.mxu1 %v2965_v35 }
 0x301   :  { %3086 = vmatpush.msra.mxu0 %v2897_v47  ;;  %2972 = vmatpush.msrb.mxu1 %v2971_v29  ;;  %v1911_v13 = vpop.permute.xlu1 %1910 }
 0x302   :  { %2974 = vmatmul.f32.vlgmr.msrb.gmra.mxu1 %v6161_v15 }
 0x303   :  { %3090 = vmatpush.msra.mxu0 %v2903_v62  ;;  %3141 = vmatpush.msra.mxu1 %v5950_v8  ;;  %v1769_v8 = vpop.f32.mrf.mxu3  ;;  %v1677_v62 = vadd.f32 %v1676_v44, %v1575_v40 }
 0x305   :  { %3094 = vmatpush.msra.mxu0 %v2909_v17  ;;  %3143 = vmatpush.msra.mxu1 %v5956_v49  ;;  %v1838_v49 = vpop.f32.mrf.mxu2  ;;  %v1731_v55 = vadd.f32 %v1730_v43, %v1677_v62 }
 0x307   :  { %3098 = vmatpush.msra.mxu0 %v2915_v2  ;;  %3145 = vmatpush.msra.mxu1 %v5966_v58  ;;  %v2117_v58 = vpop.f32.mrf.mxu1 }
 0x309   :  { %3102 = vmatpush.msra.mxu0 %v2921_v27  ;;  %3147 = vmatpush.msra.mxu1 %v5983_v24 }
 0x30b   :  { %3106 = vmatpush.msra.mxu0 %v2927_v23  ;;  %3149 = vmatpush.msra.mxu1 %v5993_v33  ;;  %v1875_v24 = vpop.f32.mrf.mxu3  ;;  %v2016_v33 = vpop.f32.mrf.mxu0 }
 0x30c   :  { %v2118_v56 = vadd.f32 %v2117_v58, %v2016_v33 }
 0x30d   :  { %3110 = vmatpush.msra.mxu0 %v2933_v18  ;;  %3151 = vmatpush.msra.mxu1 %v6008_v30  ;;  %v2171_v34 = vpop.f32.mrf.mxu2 }
 0x30e   :  { %v2172_v19 = vadd.f32 %v2171_v34, %v2118_v56 }
 0x30f   :  { %3114 = vmatpush.msra.mxu0 %v2939_v39  ;;  %3153 = vmatpush.msra.mxu1 %v6021_v53 }
 0x311   :  { %3118 = vmatpush.msra.mxu0 %v2945_v9  ;;  %3155 = vmatpush.msra.mxu1 %v6038_v26  ;;  %v1900_v26 = vld [vmem:[#allocation3] sm:$0xff] }
 0x313   :  { %3122 = vmatpush.msra.mxu0 %v2951_v21  ;;  %3157 = vmatpush.msra.mxu1 %v6053_v51  ;;  %v2210_v30 = vpop.f32.mrf.mxu3  ;;  %v1901_v51 = vmul.f32 %v5819_v1, %v1900_v26 }
 0x314   :  { %v2211_v11 = vadd.f32 %v2210_v30, %v2172_v19 }
 0x315   :  { %3126 = vmatpush.msra.mxu0 %v2957_v22  ;;  %3159 = vmatpush.msra.mxu1 %v6064_v50  ;;  %v1770_v50 = vadd.f32 %v1769_v8, %v1731_v55 }
 0x317   :  { %3130 = vmatpush.msra.mxu0 %v2963_v38  ;;  %3161 = vmatpush.msra.mxu1 %v6079_v45  ;;  %v1839_v32 = vadd.f32 %v1838_v49, %v1770_v50 }
 0x319   :  { %3134 = vmatpush.msra.mxu0 %v2969_v60  ;;  %3163 = vmatpush.msra.mxu1 %v6154_v36  ;;  %v2279_v5 = vpop.f32.mrf.mxu0  ;;  %v1876_v18 = vadd.f32 %v1875_v24, %v1839_v32 }
 0x31a   :  { %3136 = vmatmul.f32.vlgmr.msra.gmra.mxu0 %v6161_v15  ;;  %v2280_v53 = vadd.f32 %v2279_v5, %v2211_v11 }
 0x31b   :  { %3165 = vmatpush.msra.mxu1 %v6139_v61 }
 0x31d   :  { %3167 = vmatpush.msra.mxu1 %v6149_v20 }
 0x31f   :  { %3169 = vmatpush.msra.mxu1 %v6192_v41  ;;  %v6629_v41 = vmov 1  }
 0x320   :  { %v2546_v45 = vpop.f32.mrf.mxu3 }
 0x321   :  { %3171 = vmatpush.msra.mxu1 %v6168_v16 }
 0x322   :  { %3173 = vmatmul.f32.vlgmr.msra.gmra.mxu1 %v6161_v15 }
 0x323   :  { %v2316_v47 = vpop.f32.mrf.mxu1  ;;  %v2445_v2 = vpop.f32.mrf.mxu2 }
 0x324   :  { %v2317_v28 = vadd.f32 %v2316_v47, %v2280_v53  ;;  %v2547_v23 = vadd.f32 %v2546_v45, %v2445_v2 }
 0x326   :  { %2320 = vrot.lane.b32.xlu0 %v2317_v28, %s3967_s24 }
 0x33b   :  { %v1903_v17 = vpop.xlane.xlu2 %1902  ;;  %v2600_v27 = vpop.f32.mrf.mxu0 }
 0x33c   :  { %v1904_v48 = vadd.f32 %v1903_v17, %v1901_v51  ;;  %v2601_v39 = vadd.f32 %v2600_v27, %v2547_v23 }
 0x33e   :  { %1906 = vst.msk [vmem:[#allocation3] sm:$0xff] %vm1905_vm4, %v1904_v48 }
 0x342   :  { %v2745_v16 = vpop.f32.mrf.mxu3 }
 0x343   :  { %v1534_v0 = vpop.permute.xlu2 %1533 }
 0x344   :  { %v1536_v61 = vmul.f32 %v1534_v0, %v1530_v25 }
 0x345   :  { %v2639_v63 = vpop.f32.mrf.mxu1  ;;  %v2345_v20 = vld [vmem:[#allocation3] sm:$0xff]  ;;  %v2708_v21 = vpop.f32.mrf.mxu2 }
 0x346   :  { %v1878_v7 = vadd.f32 %v1876_v18, %v1536_v61  ;;  %v2640_v1 = vadd.f32 %v2639_v63, %v2601_v39  ;;  %v2346_v36 = vmul.f32 %v6144_v46, %v2345_v20 }
 0x348   :  { %1880 = vst.msk [vmem:[#allocation4] sm:$0xff] %vm1879_vm7, %v1878_v7  ;;  %v2709_v15 = vadd.f32 %v2708_v21, %v2640_v1  ;;  %v2349_v54 = vadd.f32 %v2348_v4, %v2346_v36 }
 0x34a   :  { %v2746_v9 = vadd.f32 %v2745_v16, %v2709_v15  ;;  %2351 = vst.msk [vmem:[#allocation3] sm:$0xff] %vm2350_vm5, %v2349_v54 }
 0x34b   :  { %v2356_v58 = vpop.permute.xlu2 %2355 }
 0x34c   :  { %2749 = vrot.lane.b32.xlu0 %v2746_v9, %s3968_s20 }
 0x34f   :  { %v1907_v60 = vld [vmem:[#allocation4] sm:$0xff] }
 0x350   :  { %v1913_v14 = vmul.f32 %v1911_v13, %v1907_v60 }
 0x351   :  { %v2774_v10 = vld [vmem:[#allocation3] sm:$0xff] }
 0x352   :  { %v2775_v22 = vmul.f32 %v6174_v57, %v2774_v10 }
 0x353   :  { %v2785_v5 = vpop.permute.xlu2 %2784 }
 0x362   :  { %v2777_v12 = vpop.xlane.xlu0 %2776 }
 0x363   :  { %v2778_v6 = vadd.f32 %v2777_v12, %v2775_v22 }
 0x365   :  { %2780 = vst.msk [vmem:[#allocation3] sm:$0xff] %vm2779_vm6, %v2778_v6 }
 0x36c   :  { %v3236_v46 = vld [vmem:[#allocation3] sm:$0xff] }
 0x36d   :  { %v3237_v31 = vmax.f32 %v3236_v46, 1e-30 }
 0x36f   :  { %3241 = vperm.xlu2 %3876, %v3237_v31   ;;  %3193 = vperm.xlu1 %3873, %v3237_v31  }
 0x377   :  { %3875 = vset.pattern.permute.xlu1 %v6629_v41  ;;  %v2874_v52 = vpop.f32.mrf.mxu0 }
 0x378   :  { %3217 = vperm.xlu1 %3875, %v3237_v31  }
 0x37e   :  { %v3068_v35 = vpop.f32.mrf.mxu3 }
 0x37f   :  { %v2975_v37 = vpop.f32.mrf.mxu1 }
 0x380   :  { %v2976_v42 = vadd.f32 %v2975_v37, %v2874_v52  ;;  %v3029_v38 = vpop.f32.mrf.mxu2 }
 0x382   :  { %v3030_v59 = vadd.f32 %v3029_v38, %v2976_v42 }
 0x384   :  { %v3069_v40 = vadd.f32 %v3068_v35, %v3030_v59 }
 0x397   :  { %v3137_v29 = vpop.f32.mrf.mxu0 }
 0x398   :  { %v2321_v57 = vpop.permute.xlu0 %2320  ;;  %v3138_v44 = vadd.f32 %v3137_v29, %v3069_v40 }
 0x399   :  { %v2323_v3 = vadd.f32 %v2321_v57, %v1913_v14 }
 0x39b   :  { %2325 = vst.msk [vmem:[#allocation4] sm:$0xff] %vm2324_vm8, %v2323_v3 }
 0x39f   :  { %v3174_v43 = vpop.f32.mrf.mxu1 }
 0x3a0   :  { %v3175_v8 = vadd.f32 %v3174_v43, %v3138_v44 }
 0x3a2   :  { %3178 = vrot.lane.b32.xlu0 %v3175_v8, %s3969_s25  ;;  %v2352_v49 = vld [vmem:[#allocation4] sm:$0xff] }
 0x3a3   :  { %v2358_v24 = vmul.f32 %v2356_v58, %v2352_v49 }
 0x3aa   :  { %3265 = vperm.xlu0 %3877, %v3237_v31  }
 0x3be   :  { %v2750_v33 = vpop.permute.xlu0 %2749 }
 0x3bf   :  { %v2752_v56 = vadd.f32 %v2750_v33, %v2358_v24 }
 0x3c1   :  { %2754 = vst.msk [vmem:[#allocation4] sm:$0xff] %vm2753_vm9, %v2752_v56  ;;  %v3915_v56 = vld [vmem:[%s6394_s0] sm:$0xff] }
 0x3c8   :  { %v2781_v47 = vld [vmem:[#allocation4] sm:$0xff] }
 0x3c9   :  { %v3242_v26 = vpop.permute.xlu2 %3241  ;;  %v2787_v55 = vmul.f32 %v2785_v5, %v2781_v47 }
 0x3ca   :  { %v3255_v46 = vand.u32 2147483648, %v3242_v26  ;;  %vm3249_vm5 = vweird.f32 %v3242_v26  ;;  %v3253_v31 = vand.u32 2147483647, %v3242_v26 }
 0x3cc   :  { %v3256_v52 = vor.u32 1.1754944e-38, %v3255_v46 }
 0x3e1   :  { %v3194_v34 = vpop.permute.xlu1 %3193 }
 0x3e2   :  { %3899 = vrcp.f32 %v3194_v34  ;;  %v3207_v2 = vand.u32 2147483648, %v3194_v34  ;;  %vm3201_vm12 = vweird.f32 %v3194_v34  ;;  %v3205_v32 = vand.u32 2147483647, %v3194_v34 }
 0x3e4   :  { %v3208_v23 = vor.u32 1.1754944e-38, %v3207_v2  ;;  %vm3206_vm14 = vcmp.eq.f32.partialorder %v3205_v32, 8.507059e+37  ;;  %v3333_v32 = vld [vmem:[%s6405_s11 + $0x10] sm:$0xff] }
 0x3e8   :  { %v3900_v19 = vpop.eup %3899 }
 0x3e9   :  { %v3197_v11 = vmul.f32 %v3900_v19, %v3194_v34  ;;  %vm3202_vm11 = vweird.f32 %v3900_v19 }
 0x3ea   :  { %v3218_v30 = vpop.permute.xlu1 %3217  ;;  %vm3203_vm13 = vmor %vm3201_vm12, %vm3202_vm11 }
 0x3eb   :  { %3901 = vrcp.f32 %v3218_v30  ;;  %v3198_v53 = vsub.f32 1.0, %v3197_v11  ;;  %v3231_v1 = vand.u32 2147483648, %v3218_v30  ;;  %vm3225_vm1 = vweird.f32 %v3218_v30 }
 0x3ec   :  { %3903 = vrcp.f32 %v3242_v26  ;;  %v3229_v4 = vand.u32 2147483647, %v3218_v30 }
 0x3ed   :  { %v3199_v62 = vmul.f32 %v3900_v19, %v3198_v53  ;;  %v3232_v54 = vor.u32 1.1754944e-38, %v3231_v1 }
 0x3ee   :  { %vm3230_vm3 = vcmp.eq.f32.partialorder %v3229_v4, 8.507059e+37 }
 0x3ef   :  { %v3200_v50 = vadd.f32 %v3900_v19, %v3199_v62 }
 0x3f1   :  { %v3902_v28 = vpop.eup %3901  ;;  %v3204_v27 = vsel %vm3203_vm13, %v3900_v19, %v3200_v50  ;;  %v3334_v50 = vld [vmem:[%s6405_s11 + $0x18] sm:$0xff] }
 0x3f2   :  { %v3221_v17 = vmul.f32 %v3902_v28, %v3218_v30  ;;  %v3904_v25 = vpop.eup %3903  ;;  %v3209_v39 = vsel %vm3206_vm14, %v3208_v23, %v3204_v27  ;;  %vm3226_vm15 = vweird.f32 %v3902_v28  ;;  %v3970_v30 = vmov 32.0  }
 0x3f3   :  { %v3245_v63 = vmul.f32 %v3904_v25, %v3242_v26  ;;  %vm3227_vm2 = vmor %vm3225_vm1, %vm3226_vm15  ;;  %vm3250_vm4 = vweird.f32 %v3904_v25  ;;  %v3354_v2 = vand.u32 4294901760, %v3334_v50  ;;  %v3356_v27 = vand.u32 4294901760, %v3333_v32 }
 0x3f4   :  { %v3222_v45 = vsub.f32 1.0, %v3221_v17  ;;  %vm3251_vm6 = vmor %vm3249_vm5, %vm3250_vm4 }
 0x3f5   :  { %v3246_v36 = vsub.f32 1.0, %v3245_v63  ;;  %3455 = vmatpush.msrb.mxu1 %v3354_v2  ;;  %3355 = vmatpush.msra.mxu2 %v3354_v2 }
 0x3f6   :  { %v3223_v0 = vmul.f32 %v3902_v28, %v3222_v45  ;;  %v3384_v45 = vsub.f32 %v3334_v50, %v3354_v2 }
 0x3f7   :  { %v3247_v16 = vmul.f32 %v3904_v25, %v3246_v36  ;;  %3457 = vmatpush.msrb.mxu1 %v3356_v27  ;;  %3357 = vmatpush.msra.mxu2 %v3356_v27 }
 0x3f8   :  { %v3224_v7 = vadd.f32 %v3902_v28, %v3223_v0  ;;  %v3385_v23 = vand.u32 4294901760, %v3384_v45  ;;  %v3390_v0 = vsub.f32 %v3333_v32, %v3356_v27  ;;  %3426 = vmatpush.msrb.mxu0 %v3384_v45  ;;  %v3538_v32 = vld [vmem:[%s6407_s13 + $0x10] sm:$0xff] }
 0x3f9   :  { %v3248_v6 = vadd.f32 %v3904_v25, %v3247_v16 }
 0x3fa   :  { %v3228_v21 = vsel %vm3227_vm2, %v3902_v28, %v3224_v7  ;;  %v3391_v63 = vand.u32 4294901760, %v3390_v0  ;;  %3429 = vmatpush.msrb.mxu0 %v3390_v0  ;;  %vm3548_vm2 = vcmask 523264  }
 0x3fb   :  { %v3233_v9 = vsel %vm3230_vm3, %v3232_v54, %v3228_v21  ;;  %v3252_v37 = vsel %vm3251_vm6, %v3904_v25, %v3248_v6  ;;  %v3332_v25 = vld [vmem:[%s6405_s11 + $0x8] sm:$0xff] }
 0x3fc   :  { %v3392_v36 = vsub.f32 %v3390_v0, %v3391_v63 }
 0x414   :  { %v3179_v51 = vpop.permute.xlu0 %3178 }
 0x415   :  { %v3181_v48 = vadd.f32 %v3179_v51, %v2787_v55 }
 0x417   :  { %3183 = vst.msk [vmem:[#allocation4] sm:$0xff] %vm3182_vm10, %v3181_v48 }
 0x41c   :  { %v3266_v18 = vpop.permute.xlu0 %3265 }
 0x41d   :  { %3905 = vrcp.f32 %v3266_v18  ;;  %v3279_v59 = vand.u32 2147483648, %v3266_v18  ;;  %vm3273_vm12 = vweird.f32 %v3266_v18  ;;  %v3277_v57 = vand.u32 2147483647, %v3266_v18 }
 0x41e   :  { %v3190_v61 = vld [vmem:[#allocation4] sm:$0xff] }
 0x41f   :  { %v3210_v20 = vmul.f32 %v3209_v39, %v3190_v61  ;;  %v3280_v35 = vor.u32 1.1754944e-38, %v3279_v59  ;;  %vm3278_vm13 = vcmp.eq.f32.partialorder %v3277_v57, 8.507059e+37  ;;  %v3331_v39 = vld [vmem:[%s6405_s11] sm:$0xff]  ;;  %v3386_v61 = vsub.f32 %v3384_v45, %v3385_v23 }
 0x420   :  { %v3360_v7 = vand.u32 4294901760, %v3331_v39 }
 0x421   :  { %3211 = vst.msk [vmem:[#allocation4] sm:$0xff] %vm1879_vm7, %v3210_v20  ;;  %vm3254_vm7 = vcmp.eq.f32.partialorder %v3253_v31, 8.507059e+37  ;;  %v3387_v1 = vand.u32 4294901760, %v3386_v61 }
 0x422   :  { %v3257_v60 = vsel %vm3254_vm7, %v3256_v52, %v3252_v37  ;;  %v3402_v21 = vsub.f32 %v3331_v39, %v3360_v7 }
 0x423   :  { %v3906_v15 = vpop.eup %3905  ;;  %3388 = vmatpush.msra.mxu3 %v3387_v1  ;;  %v3536_v1 = vld [vmem:[%s6407_s13] sm:$0xff] }
 0x424   :  { %v3269_v12 = vmul.f32 %v3906_v15, %v3266_v18  ;;  %vm3274_vm11 = vweird.f32 %v3906_v15  ;;  %v3358_v18 = vand.u32 4294901760, %v3332_v25  ;;  %v3403_v16 = vand.u32 4294901760, %v3402_v21 }
 0x426   :  { %v3270_v41 = vsub.f32 1.0, %v3269_v12  ;;  %v3396_v20 = vsub.f32 %v3332_v25, %v3358_v18  ;;  %3459 = vmatpush.msrb.mxu1 %v3358_v18  ;;  %3359 = vmatpush.msra.mxu2 %v3358_v18 }
 0x428   :  { %v3214_v10 = vld [vmem:[#allocation4] sm:$0xff]  ;;  %v3271_v42 = vmul.f32 %v3906_v15, %v3270_v41  ;;  %v3397_v4 = vand.u32 4294901760, %v3396_v20  ;;  %3432 = vmatpush.msrb.mxu0 %v3396_v20  ;;  %3461 = vmatpush.msrb.mxu1 %v3360_v7 }
 0x429   :  { %v3234_v22 = vmul.f32 %v3233_v9, %v3214_v10  ;;  %3361 = vmatpush.msra.mxu2 %v3360_v7 }
 0x42a   :  { %v3272_v14 = vadd.f32 %v3906_v15, %v3271_v42  ;;  %v3398_v54 = vsub.f32 %v3396_v20, %v3397_v4  ;;  %3435 = vmatpush.msrb.mxu0 %v3402_v21 }
 0x42b   :  { %3235 = vst.msk [vmem:[#allocation4] sm:$0xff] %vm2324_vm8, %v3234_v22  ;;  %vm3275_vm8 = vmor %vm3273_vm12, %vm3274_vm11  ;;  %3484 = vmatpush.msrb.mxu2 %v3385_v23  ;;  %v3404_v22 = vsub.f32 %v3402_v21, %v3403_v16  ;;  %v6357_v23 = vand.u32 4294901760, %v3538_v32 }
 0x42c   :  { %v3276_v3 = vsel %vm3275_vm8, %v3906_v15, %v3272_v14  ;;  %v3393_v15 = vand.u32 4294901760, %v3392_v36  ;;  %v3399_v10 = vand.u32 4294901760, %v3398_v54  ;;  %v3880_v14 = vld [vmem:[%s6404_s10] ss:$0 sm:$0xff] }
 0x42d   :  { %v3281_v40 = vsel %vm3278_vm13, %v3280_v35, %v3276_v3  ;;  %3488 = vmatpush.msrb.mxu2 %v3391_v63  ;;  %v3405_v6 = vand.u32 4294901760, %v3404_v22  ;;  %v3624_v63 = vsub.f32 %v3538_v32, %v6357_v23 }
 0x42e   :  { %3394 = vmatpush.msra.mxu3 %v3393_v15  ;;  %v3574_v15 = vand.u32 4294901760, %v3536_v1 }
 0x42f   :  { %3492 = vmatpush.msrb.mxu2 %v3397_v4  ;;  %v3625_v4 = vand.u32 4294901760, %v3624_v63 }
 0x430   :  { %3400 = vmatpush.msra.mxu3 %v3399_v10  ;;  %v3636_v10 = vsub.f32 %v3536_v1, %v3574_v15 }
 0x431   :  { %3496 = vmatpush.msrb.mxu2 %v3403_v16  ;;  %v3626_v16 = vsub.f32 %v3624_v63, %v3625_v4 }
 0x432   :  { %v3238_v13 = vld [vmem:[#allocation4] sm:$0xff]  ;;  %3406 = vmatpush.msra.mxu3 %v3405_v6 }
 0x433   :  { %v3258_v38 = vmul.f32 %v3257_v60, %v3238_v13  ;;  %v3879_v13 = vld [vmem:[%s6403_s9] ss:$0 sm:$0xff] }
 0x434   :  { %3515 = vmatpush.msrb.mxu3 %v3354_v2 }
 0x435   :  { %3259 = vst.msk [vmem:[#allocation4] sm:$0xff] %vm2753_vm9, %v3258_v38 }
 0x436   :  { %3517 = vmatpush.msrb.mxu3 %v3356_v27 }
 0x438   :  { %3519 = vmatpush.msrb.mxu3 %v3358_v18  ;;  %v3537_v18 = vld [vmem:[%s6407_s13 + $0x8] sm:$0xff] }
 0x439   :  { %v6366_v20 = vand.u32 4294901760, %v3537_v18 }
 0x43a   :  { %3521 = vmatpush.msrb.mxu3 %v3360_v7 }
 0x43b   :  { %v3630_v21 = vsub.f32 %v3537_v18, %v6366_v20 }
 0x43c   :  { %v3262_v29 = vld [vmem:[#allocation4] sm:$0xff] }
 0x43d   :  { %v3282_v44 = vmul.f32 %v3281_v40, %v3262_v29 }
 0x43f   :  { %3283 = vst.msk [vmem:[#allocation4] sm:$0xff] %vm3182_vm10, %v3282_v44 }
 0x446   :  { %v3284_v43 = vld [vmem:[#allocation4] sm:$0xff] }
 0x447   :  { %v3286_v8 = vmin.f32 %v3284_v43, 0.0  ;;  %vm3285_vm9 = vcmp.gt.f32.partialorder %v3284_v43, 0.0 }
 0x449   :  { %v3287_v49 = vmul.f32 1.442695, %v3286_v8 }
 0x44b   :  { %3907 = vpow2.f32 %v3287_v49  ;;  %v3543_v49 = vld [vmem:[%s6407_s13 + $0x38] sm:$0xff] }
 0x44c   :  { %3909 = vrcp.f32 %v3970_v30 }
 0x451   :  { %v3908_v58 = vpop.eup %3907 }
 0x452   :  { %v3846_v24 = vadd.f32 -1.0, %v3908_v58  ;;  %v3910_v5 = vpop.eup %3909  ;;  %v6305_v58 = vand.u32 4294901760, %v3543_v49 }
 0x453   :  { %v3296_v11 = vmul.f32 32.0, %v3910_v5  ;;  %vm3300_vm10 = vweird.f32 %v3910_v5 }
 0x454   :  { %v3290_v33 = vsel %vm3285_vm9, %v3284_v43, %v3846_v24  ;;  %v3542_v24 = vld [vmem:[%s6407_s13 + $0x30] sm:$0xff]  ;;  %3561 = vmatpush.msra.mxu0 %v6305_v58 }
 0x455   :  { %v6272_v34 = vadd.f32 %v3915_v56, %v3290_v33  ;;  %v3297_v53 = vsub.f32 1.0, %v3296_v11  ;;  %v6311_v33 = vsub.f32 %v3543_v49, %v6305_v58  ;;  %v6313_v56 = vand.u32 4294901760, %v3542_v24 }
 0x457   :  { %v3292_v19 = vsel %vm71_vm0, %v6272_v34, 0.0  ;;  %v3298_v47 = vmul.f32 %v3910_v5, %v3297_v53  ;;  %v3595_v30 = vand.u32 4294901760, %v6311_v33  ;;  %3563 = vmatpush.msra.mxu0 %v6313_v56  ;;  %v3540_v53 = vld [vmem:[%s6407_s13 + $0x20] sm:$0xff] }
 0x458   :  { %3293 = vadd.xlane.f32.xlu1 %v3292_v19  ;;  %v3541_v19 = vld [vmem:[%s6407_s13 + $0x28] sm:$0xff] }
 0x459   :  { %v3299_v28 = vadd.f32 %v3910_v5, %v3298_v47  ;;  %v6324_v11 = vand.u32 4294901760, %v3541_v19  ;;  %v3596_v47 = vsub.f32 %v6311_v33, %v3595_v30 }
 0x45b   :  { %v3301_v26 = vsel %vm3300_vm10, %v3910_v5, %v3299_v28  ;;  %v6322_v5 = vsub.f32 %v3542_v24, %v6313_v56  ;;  %3565 = vmatpush.msra.mxu0 %v6324_v11 }
 0x45d   :  { %v3601_v28 = vand.u32 4294901760, %v6322_v5 }
 0x4cb   :  { %v3294_v62 = vpop.xlane.xlu1 %3293 }
 0x4cc   :  { %v3302_v55 = vmul.f32 %v3301_v26, %v3294_v62  ;;  %v6337_v62 = vand.u32 4294901760, %v3540_v53 }
 0x4ce   :  { %v6277_v51 = vsub.f32 %v6272_v34, %v3302_v55  ;;  %v3539_v55 = vld [vmem:[%s6407_s13 + $0x18] sm:$0xff]  ;;  %v3612_v50 = vsub.f32 %v3540_v53, %v6337_v62  ;;  %3567 = vmatpush.msra.mxu0 %v6337_v62 }
 0x4cf   :  { %v6350_v2 = vand.u32 4294901760, %v3539_v55 }
 0x4d0   :  { %v3304_v17 = vmul.f32 %v6277_v51, %v6277_v51  ;;  %v3613_v25 = vand.u32 4294901760, %v3612_v50 }
 0x4d1   :  { %v3618_v0 = vsub.f32 %v3539_v55, %v6350_v2  ;;  %3569 = vmatpush.msra.mxu0 %v6350_v2 }
 0x4d2   :  { %v3305_v48 = vsel %vm71_vm0, %v3304_v17, 0.0  ;;  %v3602_v17 = vsub.f32 %v6322_v5, %v3601_v28  ;;  %v3614_v61 = vsub.f32 %v3612_v50, %v3613_v25 }
 0x4d3   :  { %3306 = vadd.xlane.f32.xlu2 %v3305_v48  ;;  %v3619_v7 = vand.u32 4294901760, %v3618_v0  ;;  %3571 = vmatpush.msra.mxu0 %v6357_v23 }
 0x4d4   :  { %v3603_v45 = vand.u32 4294901760, %v3602_v17  ;;  %v3615_v36 = vand.u32 4294901760, %v3614_v61 }
 0x4d5   :  { %v3620_v54 = vsub.f32 %v3618_v0, %v3619_v7  ;;  %3573 = vmatpush.msra.mxu0 %v6366_v20 }
 0x4d7   :  { %v3621_v22 = vand.u32 4294901760, %v3620_v54  ;;  %3575 = vmatpush.msra.mxu0 %v3574_v15 }
 0x546   :  { %v3307_v9 = vpop.xlane.xlu2 %3306 }
 0x547   :  { %v3308_v12 = vmul.f32 %v3307_v9, %v3301_v26  ;;  %v6335_v26 = vsub.f32 %v3541_v19, %v6324_v11  ;;  %v3631_v9 = vand.u32 4294901760, %v3630_v21 }
 0x549   :  { %v3309_v46 = vadd.f32 1e-06, %v3308_v12  ;;  %v3607_v48 = vand.u32 4294901760, %v6335_v26  ;;  %v3627_v12 = vand.u32 4294901760, %v3626_v16  ;;  %v3632_v6 = vsub.f32 %v3630_v21, %v3631_v9 }
 0x54b   :  { %3911 = vrsqrt.f32 %v3309_v46  ;;  %vm3316_vm15 = vweird.f32 %v3309_v46  ;;  %v3608_v27 = vsub.f32 %v6335_v26, %v3607_v48 }
 0x54d   :  { %v3609_v39 = vand.u32 4294901760, %v3608_v27 }
 0x551   :  { %v3912_v31 = vpop.eup %3911 }
 0x552   :  { %v3311_v41 = vmul.f32 %v3912_v31, %v3309_v46  ;;  %vm3317_vm14 = vweird.f32 %v3912_v31  ;;  %v3637_v46 = vand.u32 4294901760, %v3636_v10 }
 0x553   :  { %vm3318_vm1 = vmor %vm3316_vm15, %vm3317_vm14 }
 0x554   :  { %v3312_v37 = vmul.f32 %v3912_v31, %v3311_v41  ;;  %v3633_v41 = vand.u32 4294901760, %v3632_v6 }
 0x556   :  { %v3313_v52 = vmul.f32 0.5, %v3312_v37  ;;  %v3638_v37 = vsub.f32 %v3636_v10, %v3637_v46 }
 0x558   :  { %v3314_v42 = vsub.f32 1.5, %v3313_v52 }
 0x55a   :  { %v3315_v60 = vmul.f32 %v3912_v31, %v3314_v42 }
 0x55c   :  { %v3319_v38 = vsel %vm3318_vm1, %v3912_v31, %v3315_v60  ;;  %v3881_v31 = vld [vmem:[%s6406_s12] ss:$0 sm:$0xff]  ;;  %v3639_v60 = vand.u32 4294901760, %v3638_v37 }
 0x55d   :  { %v3320_v59 = vmul.f32 %v3319_v38, %v6277_v51  ;;  %v3597_v51 = vand.u32 4294901760, %v3596_v47 }
 0x55f   :  { %v3325_v57 = vmul.f32 %v3879_v13, %v3320_v59  ;;  %3598 = vmatpush.msra.mxu1 %v3597_v51 }
 0x561   :  { %v3330_v3 = vadd.f32 %v3880_v14, %v3325_v57  ;;  %3604 = vmatpush.msra.mxu1 %v3603_v45 }
 0x563   :  { %v3340_v35 = vsel %vm71_vm0, %v3330_v3, 0  ;;  %3610 = vmatpush.msra.mxu1 %v3609_v39 }
 0x564   :  { %v3362_v29 = vand.u32 4294901760, %v3340_v35 }
 0x565   :  { %3616 = vmatpush.msra.mxu1 %v3615_v36 }
 0x566   :  { %3408 = vmatmul.f32.vlgmr.msra.gmra.mxu3 %v3362_v29  ;;  %v3363_v40 = vsub.f32 %v3340_v35, %v3362_v29 }
 0x567   :  { %3693 = vmatpush.msra.mxu3 %v6305_v58  ;;  %3622 = vmatpush.msra.mxu1 %v3621_v22 }
 0x568   :  { %3438 = vmatmul.f32.vlgmr.msrb.gmra.mxu0 %v3363_v40  ;;  %v3364_v44 = vand.u32 4294901760, %v3363_v40 }
 0x569   :  { %3695 = vmatpush.msra.mxu3 %v6313_v56  ;;  %3726 = vmatpush.msrb.mxu0 %v3595_v30 }
 0x56a   :  { %3465 = vmatmul.f32.vlgmr.msrb.gmra.mxu1 %v3364_v44  ;;  %v3365_v43 = vsub.f32 %v3363_v40, %v3364_v44 }
 0x56b   :  { %3697 = vmatpush.msra.mxu3 %v6324_v11  ;;  %3730 = vmatpush.msrb.mxu0 %v3601_v28 }
 0x56c   :  { %v3366_v8 = vand.u32 4294901760, %v3365_v43  ;;  %3628 = vmatpush.msra.mxu1 %v3627_v12 }
 0x56d   :  { %3699 = vmatpush.msra.mxu3 %v6337_v62  ;;  %3734 = vmatpush.msrb.mxu0 %v3607_v48 }
 0x56e   :  { %3367 = vmatmul.f32.vlgmr.msra.gmra.mxu2 %v3366_v8  ;;  %3523 = vmatmul.f32.vlgmr.msrb.gmra.mxu3 %v3362_v29 }
 0x56f   :  { %3656 = vmatpush.msra.mxu2 %v6311_v33  ;;  %3701 = vmatpush.msra.mxu3 %v6350_v2 }
 0x570   :  { %3634 = vmatpush.msra.mxu1 %v3633_v41  ;;  %3738 = vmatpush.msrb.mxu0 %v3613_v25 }
 0x571   :  { %3659 = vmatpush.msra.mxu2 %v6322_v5  ;;  %3703 = vmatpush.msra.mxu3 %v6357_v23 }
 0x572   :  { %3640 = vmatpush.msra.mxu1 %v3639_v60  ;;  %3742 = vmatpush.msrb.mxu0 %v3619_v7 }
 0x573   :  { %3662 = vmatpush.msra.mxu2 %v6335_v26  ;;  %3705 = vmatpush.msra.mxu3 %v6366_v20 }
 0x574   :  { %3769 = vmatpush.msrb.mxu1 %v6305_v58  ;;  %3746 = vmatpush.msrb.mxu0 %v3625_v4 }
 0x575   :  { %3665 = vmatpush.msra.mxu2 %v3612_v50  ;;  %3707 = vmatpush.msra.mxu3 %v3574_v15 }
 0x576   :  { %3498 = vmatmul.f32.vlgmr.msrb.gmra.mxu2 %v3362_v29  ;;  %3771 = vmatpush.msrb.mxu1 %v6313_v56 }
 0x577   :  { %3668 = vmatpush.msra.mxu2 %v3618_v0  ;;  %3750 = vmatpush.msrb.mxu0 %v3631_v9 }
 0x578   :  { %3773 = vmatpush.msrb.mxu1 %v6324_v11 }
 0x579   :  { %3671 = vmatpush.msra.mxu2 %v3624_v63  ;;  %3754 = vmatpush.msrb.mxu0 %v3637_v46 }
 0x57a   :  { %3775 = vmatpush.msrb.mxu1 %v6337_v62  ;;  %v3882_v62 = vld [vmem:[%s6630_s27] ss:$0 sm:$0xff] }
 0x57b   :  { %3674 = vmatpush.msra.mxu2 %v3630_v21 }
 0x57c   :  { %3777 = vmatpush.msrb.mxu1 %v6350_v2 }
 0x57d   :  { %3677 = vmatpush.msra.mxu2 %v3636_v10 }
 0x57e   :  { %3779 = vmatpush.msrb.mxu1 %v6357_v23 }
 0x580   :  { %3781 = vmatpush.msrb.mxu1 %v6366_v20 }
 0x582   :  { %3783 = vmatpush.msrb.mxu1 %v3574_v15 }
 0x5e5   :  { %v3439_v14 = vpop.f32.mrf.mxu0 }
 0x5e7   :  { %v3466_v57 = vpop.f32.mrf.mxu1 }
 0x5e9   :  { %v3409_v52 = vpop.f32.mrf.mxu3 }
 0x5f1   :  { %v3368_v42 = vpop.f32.mrf.mxu2  ;;  %v3524_v40 = vpop.f32.mrf.mxu3 }
 0x5f2   :  { %v3369_v13 = vadd.f32 %v3881_v31, %v3368_v42 }
 0x5f4   :  { %v3410_v38 = vadd.f32 %v3409_v52, %v3369_v13 }
 0x5f6   :  { %v3440_v59 = vadd.f32 %v3439_v14, %v3410_v38 }
 0x5f8   :  { %v3467_v3 = vadd.f32 %v3466_v57, %v3440_v59 }
 0x5f9   :  { %v3499_v35 = vpop.f32.mrf.mxu2 }
 0x5fa   :  { %v3500_v29 = vadd.f32 %v3499_v35, %v3467_v3 }
 0x5fc   :  { %v3525_v44 = vadd.f32 %v3524_v40, %v3500_v29 }
 0x5fe   :  { %v3528_v43 = vmul.f32 %v3525_v44, %v3525_v44  ;;  %v3527_v56 = vmul.f32 0.5, %v3525_v44 }
 0x600   :  { %v3529_v8 = vmul.f32 %v3528_v43, %v3525_v44 }
 0x602   :  { %v3530_v49 = vmul.f32 0.044715, %v3529_v8 }
 0x604   :  { %v3531_v58 = vadd.f32 %v3530_v49, %v3525_v44 }
 0x606   :  { %v3532_v24 = vmul.f32 0.7978846, %v3531_v58 }
 0x608   :  { %3913 = vtanh.f32 %v3532_v24 }
 0x60e   :  { %v3914_v33 = vpop.eup %3913 }
 0x60f   :  { %v3534_v19 = vadd.f32 1.0, %v3914_v33 }
 0x611   :  { %v3535_v30 = vmul.f32 %v3534_v19, %v3527_v56 }
 0x613   :  { %v3550_v5 = vsel %vm3548_vm2, %v3535_v30, 0 }
 0x614   :  { %v3576_v11 = vand.u32 4294901760, %v3550_v5 }
 0x616   :  { %3642 = vmatmul.f32.vlgmr.msra.gmra.mxu1 %v3576_v11  ;;  %v3577_v53 = vsub.f32 %v3550_v5, %v3576_v11 }
 0x618   :  { %3680 = vmatmul.f32.vlgmr.msra.gmra.mxu2 %v3577_v53  ;;  %v3578_v47 = vand.u32 4294901760, %v3577_v53 }
 0x61a   :  { %3711 = vmatmul.f32.vlgmr.msra.gmra.mxu3 %v3578_v47  ;;  %v3579_v28 = vsub.f32 %v3577_v53, %v3578_v47 }
 0x61c   :  { %v3580_v26 = vand.u32 4294901760, %v3579_v28 }
 0x61e   :  { %3581 = vmatmul.f32.vlgmr.msra.gmra.mxu0 %v3580_v26  ;;  %3785 = vmatmul.f32.vlgmr.msrb.gmra.mxu1 %v3576_v11 }
 0x626   :  { %3756 = vmatmul.f32.vlgmr.msrb.gmra.mxu0 %v3576_v11 }
 0x693   :  { %v3643_v55 = vpop.f32.mrf.mxu1 }
 0x69b   :  { %v3582_v51 = vpop.f32.mrf.mxu0  ;;  %v3681_v50 = vpop.f32.mrf.mxu2 }
 0x69c   :  { %v3583_v17 = vadd.f32 %v3882_v62, %v3582_v51  ;;  %v3786_v23 = vpop.f32.mrf.mxu1 }
 0x69d   :  { %v3712_v32 = vpop.f32.mrf.mxu3 }
 0x69e   :  { %v3644_v48 = vadd.f32 %v3643_v55, %v3583_v17 }
 0x6a0   :  { %v3682_v2 = vadd.f32 %v3681_v50, %v3644_v48 }
 0x6a2   :  { %v3713_v45 = vadd.f32 %v3712_v32, %v3682_v2 }
 0x6a3   :  { %v3757_v27 = vpop.f32.mrf.mxu0 }
 0x6a4   :  { %v3758_v25 = vadd.f32 %v3757_v27, %v3713_v45 }
 0x6a6   :  { %v3787_v0 = vadd.f32 %v3786_v23, %v3758_v25 }
 0x6a8   :  { %v3789_v18 = vadd.f32 %v3787_v0, %v6272_v34 }
 0x6aa   :  { %3790 = vst.msk [vmem:[#allocation8] sm:$0xff] %vm71_vm0, %v3789_v18 }
 0x6ab   :  { %3801 = dma.vmem_to_hbm [thread:$0]  %s3797_s28, 128, %s3799_s17, [#allocation6]  }
 0x6ac   :  { %3954 = dma.done.wait [#allocation6], 128  }
 0x6ad   :  { %3955 = vsyncadd [#allocation6], 4294967168 }
 0x6ae   :  { %3806 = vsyncpa [#allocation6], 1 }
 0x6af   :  { %3807 = vsyncpa [#allocation7], 1 }

</bundles_post_ra>
